<compile_context>
chip_gen: v5e
topology: v5e:2x2
jax: 0.10.0
libtpu: 0.0.40
codegen_flags: <defaults>
</compile_context>

<pallas_src>
import jax
import jax.numpy as jnp
from jax.experimental import pallas as pl
from jax.experimental.pallas import tpu as pltpu

LANES = 128
# Matmul-operand dtype. f32 preserves fidelity with the torch reference at this
# latency-bound size; set to jnp.bfloat16 on v6e/v7x once B*L grows (accumulation is
# always f32 via preferred_element_type).
MATMUL_DTYPE = jnp.float32


def _mm(a, b):
    return jnp.dot(a.astype(MATMUL_DTYPE), b.astype(MATMUL_DTYPE),
                   preferred_element_type=jnp.float32)


# -----------------------------------------------------------------------------
# One-time host-side parameter packing (load-time layout transform, not per-call)
# -----------------------------------------------------------------------------
def pack_resnetsa_params(params):
    """Pack all weights / BN params into one (rows, 128) f32 slab + a (3,) gamma vector.

    Returns (slab, gammas, cfg); `cfg` is a static python-int layout description that the
    kernel builder closes over.  Every matrix starts at an 8-aligned row offset and is
    zero-padded to 128 lanes.
    """
    mats = []
    off = 0

    def add(mat):
        nonlocal off
        mat = jnp.asarray(mat, jnp.float32)
        r, c = mat.shape
        o = off
        mats.append((o, mat))
        off = o + ((r + 7) // 8) * 8          # keep the next matrix sublane-aligned
        return (o, int(r), int(c))

    def add_conv(w, g, b):
        K, cin, cout = w.shape                # weights stored as (K, Cin, Cout)
        return dict(K=int(K), cin=int(cin), cout=int(cout),
                    w=add(w.reshape(K * cin, cout)),
                    g=add(jnp.reshape(g, (1, -1))),
                    b=add(jnp.reshape(b, (1, -1))))

    blocks, gammas = [], []
    for name in ("block1", "block2", "block3"):
        p = params[name]
        blk = dict(
            conv1=add_conv(p["conv1_w"], p["conv1_g"], p["conv1_b"]),
            conv2=add_conv(p["conv2_w"], p["conv2_g"], p["conv2_b"]),
            conv3=add_conv(p["conv3_w"], p["conv3_g"], p["conv3_b"]),
            sa_w=add(p["sa_w_t"]),            # (C, C) spectral-normalized, transposed
        )
        gammas.append(jnp.asarray(p["sa_gamma"], jnp.float32).reshape(()))
        if "sc_w" in p:
            blk["sc"] = add_conv(p["sc_w"], p["sc_g"], p["sc_b"])
        blocks.append(blk)

    fc = dict(w=add(params["fc_w_t"]), b=add(jnp.reshape(params["fc_b"], (1, -1))))

    slab = jnp.zeros((off, LANES), jnp.float32)
    for o, m in mats:
        slab = slab.at[o:o + m.shape[0], :m.shape[1]].set(m)
    gam = jnp.stack(gammas)                   # (3,) f32 -> SMEM

    return slab, gam, dict(blocks=blocks, fc=fc)


# -----------------------------------------------------------------------------
# The single fused kernel
# -----------------------------------------------------------------------------
def _make_kernel(cfg, B, L, eps):
    BL = B * L

    def wslice(p_ref, ent):
        o, r, c = ent                         # static python ints -> free ref slice
        return p_ref[o:o + r, 0:c]

    def conv_bn(p_ref, a, spec, relu):
        """Conv1d('same', stride 1, no bias) + BatchNorm1d(batch stats) + optional ReLU.

        a: lane-dense (B*L, Cin) f32 slab.  Returns (B*L, Cout) f32 slab.
        """
        K, cin = spec["K"], spec["cin"]
        pad = K // 2
        if K == 1:
            xc = a
        else:
            # im2col: K lane-concatenated, rolled + masked copies of `a`.
            # pltpu.roll matches np.roll: rolled[r] = a[(r - s) % BL]; with s = (-d) % BL
            # that is a[r + d].  Rows whose within-sample position t = r % L has t + d
            # outside [0, L) are the 'same'-padding zeros (this also kills the
            # cross-batch / wrap-around rows of the flat roll).
            tpos = jax.lax.broadcasted_iota(jnp.int32, (BL, cin), 0) % L
            pieces = []
            for k in range(K):
                d = k - pad
                if d == 0:
                    pieces.append(a)
                else:
                    rolled = pltpu.roll(a, (-d) % BL, 0)
                    valid = (tpos >= -d) if d < 0 else (tpos < L - d)
                    pieces.append(jnp.where(valid, rolled, 0.0))
            xc = jnp.concatenate(pieces, axis=1)              # (B*L, K*Cin)
        acc = _mm(xc, wslice(p_ref, spec["w"]))               # ONE MXU push per conv

        # BatchNorm1d, training-mode statistics over (B, L) per channel, two-pass.
        inv_n = 1.0 / float(BL)
        mean = jnp.sum(acc, axis=0, keepdims=True) * inv_n    # (1, Cout)
        xm = acc - mean
        var = jnp.sum(xm * xm, axis=0, keepdims=True) * inv_n
        scale = jax.lax.rsqrt(var + eps) * wslice(p_ref, spec["g"])
        y = xm * scale + wslice(p_ref, spec["b"])
        return jnp.maximum(y, 0.0) if relu else y

    def sa_residual_act(p_ref, gamma, y, sc, sa_ent):
        """SimpleSelfAttention + residual add + final ReLU of the ResBlock.

        torch (NCL): convx = W1x1 @ x ; o = (x x^T) @ convx ; out = relu(gamma*o + x + sc)
        channels-last: o = convx @ (x^T x)   (x^T x symmetric).  All slabs (B*L, C).
        """
        C = sa_ent[2]
        convx = _mm(y, wslice(p_ref, sa_ent))                 # (B*L, C)
        yv = y.reshape(B, L, C)                               # L multiple of 8 -> free view
        xxT = jnp.einsum("blc,bld->bcd",
                         yv.astype(MATMUL_DTYPE), yv.astype(MATMUL_DTYPE),
                         preferred_element_type=jnp.float32)  # (B, C, C)
        o = jnp.einsum("blc,bcd->bld",
                       convx.reshape(B, L, C).astype(MATMUL_DTYPE),
                       xxT.astype(MATMUL_DTYPE),
                       preferred_element_type=jnp.float32)    # (B, L, C)
        out = gamma * o.reshape(BL, C) + y + sc
        return jnp.maximum(out, 0.0)

    def kernel(x_ref, p_ref, gam_ref, o_ref):
        a = x_ref[...]                                        # (B*L, Cin0) f32 slab
        for bi, blk in enumerate(cfg["blocks"]):
            res = a
            y = conv_bn(p_ref, a, blk["conv1"], relu=True)
            y = conv_bn(p_ref, y, blk["conv2"], relu=True)
            y = conv_bn(p_ref, y, blk["conv3"], relu=False)
            sc = conv_bn(p_ref, res, blk["sc"], relu=False) if "sc" in blk else res
            a = sa_residual_act(p_ref, gam_ref[bi], y, sc, blk["sa_w"])

        # Fused tail: GAP over L (tea == noop for temporal=False) + Linear.
        g = jnp.mean(a.reshape(B, L, a.shape[1]), axis=1)     # (B, C)
        o_ref[...] = _mm(g, wslice(p_ref, cfg["fc"]["w"])) + wslice(p_ref, cfg["fc"]["b"])

    return kernel


def build_resnetsa_forward(cfg, B, L, c_in, *, eps=1e-5):
    """Returns a jitted forward(x_ncl, slab, gammas) -> (B, c_out)."""
    c_out = cfg["fc"]["w"][2]
    kernel = _make_kernel(cfg, B, L, eps)

    # TODO(synk): TemporalAttentionEncoder only exists when temporal=True; here tea = noop.
    @jax.jit
    def forward(x_ncl, slab, gammas):
        # Layout glue: NCL -> lane-dense channels-last (B*L, Cin) slab (only host-side op).
        x = jnp.transpose(x_ncl, (0, 2, 1)).reshape(B * L, c_in).astype(jnp.float32)
        return pl.pallas_call(
            kernel,
            out_shape=jax.ShapeDtypeStruct((B, c_out), jnp.float32),
            grid=(1,),
            in_specs=[
                pl.BlockSpec((B * L, c_in), lambda i: (0, 0)),      # activations
                pl.BlockSpec(slab.shape, lambda i: (0, 0)),         # all weights, 1 DMA
                pl.BlockSpec(memory_space=pltpu.MemorySpace.SMEM),  # SA gammas (scalars)
            ],
            out_specs=pl.BlockSpec((B, c_out), lambda i: (0, 0)),
            compiler_params=pltpu.CompilerParams(
                dimension_semantics=("arbitrary",)),
        )(x, slab, gammas)

    return forward


# -----------------------------------------------------------------------------
# Parameter construction (deterministic, synthetic — mirrors torch __init__ shapes)
# -----------------------------------------------------------------------------
def _kaiming_conv(key, K, cin, cout):
    std = (2.0 / (cin * K)) ** 0.5
    return std * jax.random.normal(key, (K, cin, cout), jnp.float32)


def _spectral_normalize(w, key, n_iter=20):
    # w: (cout, cin). Deterministic power iteration mimicking torch spectral_norm.
    u = jax.random.normal(key, (w.shape[0],), jnp.float32)
    u = u / (jnp.linalg.norm(u) + 1e-12)
    for _ in range(n_iter):
        v = w.T @ u
        v = v / (jnp.linalg.norm(v) + 1e-12)
        u = w @ v
        u = u / (jnp.linalg.norm(u) + 1e-12)
    sigma = u @ (w @ v)
    return w / sigma


def init_resblock(key, ni, nf):
    keys = jax.random.split(key, 6)
    p = {
        "conv1_w": _kaiming_conv(keys[0], 7, ni, nf),
        "conv1_g": jnp.ones((nf,), jnp.float32), "conv1_b": jnp.zeros((nf,), jnp.float32),
        "conv2_w": _kaiming_conv(keys[1], 5, nf, nf),
        "conv2_g": jnp.ones((nf,), jnp.float32), "conv2_b": jnp.zeros((nf,), jnp.float32),
        "conv3_w": _kaiming_conv(keys[2], 3, nf, nf),
        "conv3_g": jnp.ones((nf,), jnp.float32), "conv3_b": jnp.zeros((nf,), jnp.float32),
    }
    # SimpleSelfAttention 1x1 conv (nf -> nf), kaiming init + spectral norm.
    w_sa = (2.0 / nf) ** 0.5 * jax.random.normal(keys[3], (nf, nf), jnp.float32)
    w_sa = _spectral_normalize(w_sa, keys[4])
    p["sa_w_t"] = w_sa.T                            # transposed for channels-last matmul
    p["sa_gamma"] = jnp.zeros((1,), jnp.float32)    # torch init: gamma = 0.0
    if ni != nf:
        p["sc_w"] = _kaiming_conv(keys[5], 1, ni, nf)
        p["sc_g"] = jnp.ones((nf,), jnp.float32)
        p["sc_b"] = jnp.zeros((nf,), jnp.float32)
    return p


if __name__ == "__main__":
    B, c_in, L, c_out, nf = 2, 4, 16, 3, 64

    key = jax.random.PRNGKey(0)
    k_in, k1, k2, k3, kfc = jax.random.split(key, 5)

    x = jax.random.normal(k_in, (B, c_in, L), jnp.float32)    # torch NCL layout

    params = {
        "block1": init_resblock(k1, c_in, nf),
        "block2": init_resblock(k2, nf, 2 * nf),
        "block3": init_resblock(k3, 2 * nf, 2 * nf),
    }
    kw, kb = jax.random.split(kfc)
    bound = 1.0 / (2 * nf) ** 0.5                             # torch Linear default init
    params["fc_w_t"] = jax.random.uniform(kw, (2 * nf, c_out), jnp.float32, -bound, bound)
    params["fc_b"] = jax.random.uniform(kb, (c_out,), jnp.float32, -bound, bound)

    slab, gammas, cfg = pack_resnetsa_params(params)          # one-time, host-side
    forward = build_resnetsa_forward(cfg, B, L, c_in)

    out = forward(x, slab, gammas)
    jax.block_until_ready(out)
    assert out.shape == (B, c_out), out.shape
    assert bool(jnp.all(jnp.isfinite(out)))
    print("KERNEL_OK")
</pallas_src>

<mosaic_0001>
module attributes {stable_mosaic.version = 11 : i64} {
  func.func @kernel(%arg0: i32, %arg1: memref<32x4xf32, #tpu.memory_space<vmem>>, %arg2: memref<4640x128xf32, #tpu.memory_space<vmem>>, %arg3: memref<3xf32, #tpu.memory_space<smem>>, %arg4: memref<2x3xf32, #tpu.memory_space<vmem>>) attributes {dimension_semantics = [#tpu.dimension_semantics<arbitrary>], iteration_bounds = array<i64: 1>, scalar_prefetch = 0 : i64, scratch_operands = 0 : i64, tpu.core_type = #tpu.core_type<tc>, window_params = [{pipeline_mode = #tpu.pipeline_mode<synchronous>, transform_indices = @transform_0, window_bounds = array<i64: 32, 4>}, {pipeline_mode = #tpu.pipeline_mode<synchronous>, transform_indices = @transform_1, window_bounds = array<i64: 4640, 128>}, {transform_indices = @transform_2, window_bounds = array<i64: 3>}, {pipeline_mode = #tpu.pipeline_mode<synchronous>, transform_indices = @transform_3, window_bounds = array<i64: 2, 3>}]} {
    %c0 = arith.constant 0 : index
    %c0_0 = arith.constant 0 : index
    %0 = vector.load %arg1[%c0, %c0_0] : memref<32x4xf32, #tpu.memory_space<vmem>>, vector<32x4xf32>
    %1 = tpu.iota {dimensions = array<i32: 0>} : vector<32x4xi32>
    %c16_i32 = arith.constant 16 : i32
    %c0_i32 = arith.constant 0 : i32
    %2 = arith.cmpi eq, %c16_i32, %c0_i32 : i32
    %c1_i32 = arith.constant 1 : i32
    %3 = arith.select %2, %c1_i32, %c16_i32 : i32
    %4 = vector.broadcast %3 : i32 to vector<32x4xi32>
    %5 = arith.remsi %1, %4 : vector<32x4xi32>
    %c0_i32_1 = arith.constant 0 : i32
    %6 = vector.broadcast %c0_i32_1 : i32 to vector<32x4xi32>
    %7 = arith.cmpi ne, %5, %6 : vector<32x4xi32>
    %c0_i32_2 = arith.constant 0 : i32
    %8 = vector.broadcast %c0_i32_2 : i32 to vector<32x4xi32>
    %9 = arith.cmpi slt, %5, %8 : vector<32x4xi32>
    %c0_i32_3 = arith.constant 0 : i32
    %10 = arith.cmpi slt, %3, %c0_i32_3 : i32
    %11 = vector.broadcast %10 : i1 to vector<32x4xi1>
    %12 = vector.broadcast %11 : vector<32x4xi1> to vector<32x4xi1>
    %13 = arith.xori %9, %12 : vector<32x4xi1>
    %14 = arith.andi %13, %7 : vector<32x4xi1>
    %15 = vector.broadcast %3 : i32 to vector<32x4xi32>
    %16 = arith.addi %5, %15 : vector<32x4xi32>
    %17 = arith.select %14, %16, %5 : vector<32x4xi1>, vector<32x4xi32>
    %c3_i32 = arith.constant 3 : i32
    %18 = tpu.dynamic_rotate %0 by %c3_i32 dim 0 : vector<32x4xf32>, i32 -> vector<32x4xf32>
    %c3_i32_4 = arith.constant 3 : i32
    %19 = vector.broadcast %c3_i32_4 : i32 to vector<32x4xi32>
    %20 = arith.cmpi sge, %17, %19 : vector<32x4xi32>
    %cst = arith.constant 0.000000e+00 : f32
    %21 = vector.broadcast %cst : f32 to vector<32x4xf32>
    %22 = arith.select %20, %18, %21 : vector<32x4xi1>, vector<32x4xf32>
    %c2_i32 = arith.constant 2 : i32
    %23 = tpu.dynamic_rotate %0 by %c2_i32 dim 0 : vector<32x4xf32>, i32 -> vector<32x4xf32>
    %c2_i32_5 = arith.constant 2 : i32
    %24 = vector.broadcast %c2_i32_5 : i32 to vector<32x4xi32>
    %25 = arith.cmpi sge, %17, %24 : vector<32x4xi32>
    %cst_6 = arith.constant 0.000000e+00 : f32
    %26 = vector.broadcast %cst_6 : f32 to vector<32x4xf32>
    %27 = arith.select %25, %23, %26 : vector<32x4xi1>, vector<32x4xf32>
    %c1_i32_7 = arith.constant 1 : i32
    %28 = tpu.dynamic_rotate %0 by %c1_i32_7 dim 0 : vector<32x4xf32>, i32 -> vector<32x4xf32>
    %c1_i32_8 = arith.constant 1 : i32
    %29 = vector.broadcast %c1_i32_8 : i32 to vector<32x4xi32>
    %30 = arith.cmpi sge, %17, %29 : vector<32x4xi32>
    %cst_9 = arith.constant 0.000000e+00 : f32
    %31 = vector.broadcast %cst_9 : f32 to vector<32x4xf32>
    %32 = arith.select %30, %28, %31 : vector<32x4xi1>, vector<32x4xf32>
    %c31_i32 = arith.constant 31 : i32
    %33 = tpu.dynamic_rotate %0 by %c31_i32 dim 0 : vector<32x4xf32>, i32 -> vector<32x4xf32>
    %c15_i32 = arith.constant 15 : i32
    %34 = vector.broadcast %c15_i32 : i32 to vector<32x4xi32>
    %35 = arith.cmpi slt, %17, %34 : vector<32x4xi32>
    %cst_10 = arith.constant 0.000000e+00 : f32
    %36 = vector.broadcast %cst_10 : f32 to vector<32x4xf32>
    %37 = arith.select %35, %33, %36 : vector<32x4xi1>, vector<32x4xf32>
    %c30_i32 = arith.constant 30 : i32
    %38 = tpu.dynamic_rotate %0 by %c30_i32 dim 0 : vector<32x4xf32>, i32 -> vector<32x4xf32>
    %c14_i32 = arith.constant 14 : i32
    %39 = vector.broadcast %c14_i32 : i32 to vector<32x4xi32>
    %40 = arith.cmpi slt, %17, %39 : vector<32x4xi32>
    %cst_11 = arith.constant 0.000000e+00 : f32
    %41 = vector.broadcast %cst_11 : f32 to vector<32x4xf32>
    %42 = arith.select %40, %38, %41 : vector<32x4xi1>, vector<32x4xf32>
    %c29_i32 = arith.constant 29 : i32
    %43 = tpu.dynamic_rotate %0 by %c29_i32 dim 0 : vector<32x4xf32>, i32 -> vector<32x4xf32>
    %c13_i32 = arith.constant 13 : i32
    %44 = vector.broadcast %c13_i32 : i32 to vector<32x4xi32>
    %45 = arith.cmpi slt, %17, %44 : vector<32x4xi32>
    %cst_12 = arith.constant 0.000000e+00 : f32
    %46 = vector.broadcast %cst_12 : f32 to vector<32x4xf32>
    %47 = arith.select %45, %43, %46 : vector<32x4xi1>, vector<32x4xf32>
    %48 = tpu.concatenate %22, %27, %32, %0, %37, %42, %47 in 1 : vector<32x4xf32>, vector<32x4xf32>, vector<32x4xf32>, vector<32x4xf32>, vector<32x4xf32>, vector<32x4xf32>, vector<32x4xf32> -> vector<32x28xf32>
    %c0_13 = arith.constant 0 : index
    %c0_14 = arith.constant 0 : index
    %49 = vector.load %arg2[%c0_13, %c0_14] : memref<4640x128xf32, #tpu.memory_space<vmem>>, vector<28x64xf32>
    %cst_15 = arith.constant dense<0.000000e+00> : vector<32x64xf32>
    %50 = tpu.matmul %48, %49, %cst_15 {dimension_numbers = #tpu.dot_dimension_numbers<[1], [0], [0], [1], [0, 0, 1, 1], [], []>} : vector<32x28xf32>, vector<28x64xf32>, vector<32x64xf32> -> vector<32x64xf32>
    %cst_16 = arith.constant dense<0.000000e+00> : vector<64xf32>
    %51 = vector.multi_reduction <add>, %50, %cst_16 [0] : vector<32x64xf32> to vector<64xf32>
    %52 = vector.shape_cast %51 : vector<64xf32> to vector<1x64xf32>
    %cst_17 = arith.constant 3.125000e-02 : f32
    %53 = vector.broadcast %cst_17 : f32 to vector<1x64xf32>
    %54 = arith.mulf %52, %53 : vector<1x64xf32>
    %55 = vector.broadcast %54 : vector<1x64xf32> to vector<32x64xf32>
    %56 = arith.subf %50, %55 : vector<32x64xf32>
    %57 = arith.mulf %56, %56 : vector<32x64xf32>
    %cst_18 = arith.constant dense<0.000000e+00> : vector<64xf32>
    %58 = vector.multi_reduction <add>, %57, %cst_18 [0] : vector<32x64xf32> to vector<64xf32>
    %59 = vector.shape_cast %58 : vector<64xf32> to vector<1x64xf32>
    %cst_19 = arith.constant 3.125000e-02 : f32
    %60 = vector.broadcast %cst_19 : f32 to vector<1x64xf32>
    %61 = arith.mulf %59, %60 : vector<1x64xf32>
    %cst_20 = arith.constant 9.99999974E-6 : f32
    %62 = vector.broadcast %cst_20 : f32 to vector<1x64xf32>
    %63 = arith.addf %61, %62 : vector<1x64xf32>
    %64 = math.rsqrt %63 : vector<1x64xf32>
    %c32 = arith.constant 32 : index
    %c0_21 = arith.constant 0 : index
    %65 = vector.load %arg2[%c32, %c0_21] : memref<4640x128xf32, #tpu.memory_space<vmem>>, vector<1x64xf32>
    %66 = arith.mulf %64, %65 : vector<1x64xf32>
    %67 = vector.broadcast %66 : vector<1x64xf32> to vector<32x64xf32>
    %68 = arith.mulf %56, %67 : vector<32x64xf32>
    %c40 = arith.constant 40 : index
    %c0_22 = arith.constant 0 : index
    %69 = vector.load %arg2[%c40, %c0_22] : memref<4640x128xf32, #tpu.memory_space<vmem>>, vector<1x64xf32>
    %70 = vector.broadcast %69 : vector<1x64xf32> to vector<32x64xf32>
    %71 = arith.addf %68, %70 : vector<32x64xf32>
    %cst_23 = arith.constant 0.000000e+00 : f32
    %72 = vector.broadcast %cst_23 : f32 to vector<32x64xf32>
    %73 = arith.maximumf %71, %72 : vector<32x64xf32>
    %74 = tpu.iota {dimensions = array<i32: 0>} : vector<32x64xi32>
    %c16_i32_24 = arith.constant 16 : i32
    %c0_i32_25 = arith.constant 0 : i32
    %75 = arith.cmpi eq, %c16_i32_24, %c0_i32_25 : i32
    %c1_i32_26 = arith.constant 1 : i32
    %76 = arith.select %75, %c1_i32_26, %c16_i32_24 : i32
    %77 = vector.broadcast %76 : i32 to vector<32x64xi32>
    %78 = arith.remsi %74, %77 : vector<32x64xi32>
    %c0_i32_27 = arith.constant 0 : i32
    %79 = vector.broadcast %c0_i32_27 : i32 to vector<32x64xi32>
    %80 = arith.cmpi ne, %78, %79 : vector<32x64xi32>
    %c0_i32_28 = arith.constant 0 : i32
    %81 = vector.broadcast %c0_i32_28 : i32 to vector<32x64xi32>
    %82 = arith.cmpi slt, %78, %81 : vector<32x64xi32>
    %c0_i32_29 = arith.constant 0 : i32
    %83 = arith.cmpi slt, %76, %c0_i32_29 : i32
    %84 = vector.broadcast %83 : i1 to vector<32x64xi1>
    %85 = vector.broadcast %84 : vector<32x64xi1> to vector<32x64xi1>
    %86 = arith.xori %82, %85 : vector<32x64xi1>
    %87 = arith.andi %86, %80 : vector<32x64xi1>
    %88 = vector.broadcast %76 : i32 to vector<32x64xi32>
    %89 = arith.addi %78, %88 : vector<32x64xi32>
    %90 = arith.select %87, %89, %78 : vector<32x64xi1>, vector<32x64xi32>
    %c2_i32_30 = arith.constant 2 : i32
    %91 = tpu.dynamic_rotate %73 by %c2_i32_30 dim 0 : vector<32x64xf32>, i32 -> vector<32x64xf32>
    %c2_i32_31 = arith.constant 2 : i32
    %92 = vector.broadcast %c2_i32_31 : i32 to vector<32x64xi32>
    %93 = arith.cmpi sge, %90, %92 : vector<32x64xi32>
    %cst_32 = arith.constant 0.000000e+00 : f32
    %94 = vector.broadcast %cst_32 : f32 to vector<32x64xf32>
    %95 = arith.select %93, %91, %94 : vector<32x64xi1>, vector<32x64xf32>
    %c1_i32_33 = arith.constant 1 : i32
    %96 = tpu.dynamic_rotate %73 by %c1_i32_33 dim 0 : vector<32x64xf32>, i32 -> vector<32x64xf32>
    %c1_i32_34 = arith.constant 1 : i32
    %97 = vector.broadcast %c1_i32_34 : i32 to vector<32x64xi32>
    %98 = arith.cmpi sge, %90, %97 : vector<32x64xi32>
    %cst_35 = arith.constant 0.000000e+00 : f32
    %99 = vector.broadcast %cst_35 : f32 to vector<32x64xf32>
    %100 = arith.select %98, %96, %99 : vector<32x64xi1>, vector<32x64xf32>
    %c31_i32_36 = arith.constant 31 : i32
    %101 = tpu.dynamic_rotate %73 by %c31_i32_36 dim 0 : vector<32x64xf32>, i32 -> vector<32x64xf32>
    %c15_i32_37 = arith.constant 15 : i32
    %102 = vector.broadcast %c15_i32_37 : i32 to vector<32x64xi32>
    %103 = arith.cmpi slt, %90, %102 : vector<32x64xi32>
    %cst_38 = arith.constant 0.000000e+00 : f32
    %104 = vector.broadcast %cst_38 : f32 to vector<32x64xf32>
    %105 = arith.select %103, %101, %104 : vector<32x64xi1>, vector<32x64xf32>
    %c30_i32_39 = arith.constant 30 : i32
    %106 = tpu.dynamic_rotate %73 by %c30_i32_39 dim 0 : vector<32x64xf32>, i32 -> vector<32x64xf32>
    %c14_i32_40 = arith.constant 14 : i32
    %107 = vector.broadcast %c14_i32_40 : i32 to vector<32x64xi32>
    %108 = arith.cmpi slt, %90, %107 : vector<32x64xi32>
    %cst_41 = arith.constant 0.000000e+00 : f32
    %109 = vector.broadcast %cst_41 : f32 to vector<32x64xf32>
    %110 = arith.select %108, %106, %109 : vector<32x64xi1>, vector<32x64xf32>
    %111 = tpu.concatenate %95, %100, %73, %105, %110 in 1 : vector<32x64xf32>, vector<32x64xf32>, vector<32x64xf32>, vector<32x64xf32>, vector<32x64xf32> -> vector<32x320xf32>
    %c48 = arith.constant 48 : index
    %c0_42 = arith.constant 0 : index
    %112 = vector.load %arg2[%c48, %c0_42] : memref<4640x128xf32, #tpu.memory_space<vmem>>, vector<320x64xf32>
    %cst_43 = arith.constant dense<0.000000e+00> : vector<32x64xf32>
    %113 = tpu.matmul %111, %112, %cst_43 {dimension_numbers = #tpu.dot_dimension_numbers<[1], [0], [0], [1], [0, 0, 1, 1], [], []>} : vector<32x320xf32>, vector<320x64xf32>, vector<32x64xf32> -> vector<32x64xf32>
    %cst_44 = arith.constant dense<0.000000e+00> : vector<64xf32>
    %114 = vector.multi_reduction <add>, %113, %cst_44 [0] : vector<32x64xf32> to vector<64xf32>
    %115 = vector.shape_cast %114 : vector<64xf32> to vector<1x64xf32>
    %cst_45 = arith.constant 3.125000e-02 : f32
    %116 = vector.broadcast %cst_45 : f32 to vector<1x64xf32>
    %117 = arith.mulf %115, %116 : vector<1x64xf32>
    %118 = vector.broadcast %117 : vector<1x64xf32> to vector<32x64xf32>
    %119 = arith.subf %113, %118 : vector<32x64xf32>
    %120 = arith.mulf %119, %119 : vector<32x64xf32>
    %cst_46 = arith.constant dense<0.000000e+00> : vector<64xf32>
    %121 = vector.multi_reduction <add>, %120, %cst_46 [0] : vector<32x64xf32> to vector<64xf32>
    %122 = vector.shape_cast %121 : vector<64xf32> to vector<1x64xf32>
    %cst_47 = arith.constant 3.125000e-02 : f32
    %123 = vector.broadcast %cst_47 : f32 to vector<1x64xf32>
    %124 = arith.mulf %122, %123 : vector<1x64xf32>
    %cst_48 = arith.constant 9.99999974E-6 : f32
    %125 = vector.broadcast %cst_48 : f32 to vector<1x64xf32>
    %126 = arith.addf %124, %125 : vector<1x64xf32>
    %127 = math.rsqrt %126 : vector<1x64xf32>
    %c368 = arith.constant 368 : index
    %c0_49 = arith.constant 0 : index
    %128 = vector.load %arg2[%c368, %c0_49] : memref<4640x128xf32, #tpu.memory_space<vmem>>, vector<1x64xf32>
    %129 = arith.mulf %127, %128 : vector<1x64xf32>
    %130 = vector.broadcast %129 : vector<1x64xf32> to vector<32x64xf32>
    %131 = arith.mulf %119, %130 : vector<32x64xf32>
    %c376 = arith.constant 376 : index
    %c0_50 = arith.constant 0 : index
    %132 = vector.load %arg2[%c376, %c0_50] : memref<4640x128xf32, #tpu.memory_space<vmem>>, vector<1x64xf32>
    %133 = vector.broadcast %132 : vector<1x64xf32> to vector<32x64xf32>
    %134 = arith.addf %131, %133 : vector<32x64xf32>
    %cst_51 = arith.constant 0.000000e+00 : f32
    %135 = vector.broadcast %cst_51 : f32 to vector<32x64xf32>
    %136 = arith.maximumf %134, %135 : vector<32x64xf32>
    %137 = tpu.iota {dimensions = array<i32: 0>} : vector<32x64xi32>
    %c16_i32_52 = arith.constant 16 : i32
    %c0_i32_53 = arith.constant 0 : i32
    %138 = arith.cmpi eq, %c16_i32_52, %c0_i32_53 : i32
    %c1_i32_54 = arith.constant 1 : i32
    %139 = arith.select %138, %c1_i32_54, %c16_i32_52 : i32
    %140 = vector.broadcast %139 : i32 to vector<32x64xi32>
    %141 = arith.remsi %137, %140 : vector<32x64xi32>
    %c0_i32_55 = arith.constant 0 : i32
    %142 = vector.broadcast %c0_i32_55 : i32 to vector<32x64xi32>
    %143 = arith.cmpi ne, %141, %142 : vector<32x64xi32>
    %c0_i32_56 = arith.constant 0 : i32
    %144 = vector.broadcast %c0_i32_56 : i32 to vector<32x64xi32>
    %145 = arith.cmpi slt, %141, %144 : vector<32x64xi32>
    %c0_i32_57 = arith.constant 0 : i32
    %146 = arith.cmpi slt, %139, %c0_i32_57 : i32
    %147 = vector.broadcast %146 : i1 to vector<32x64xi1>
    %148 = vector.broadcast %147 : vector<32x64xi1> to vector<32x64xi1>
    %149 = arith.xori %145, %148 : vector<32x64xi1>
    %150 = arith.andi %149, %143 : vector<32x64xi1>
    %151 = vector.broadcast %139 : i32 to vector<32x64xi32>
    %152 = arith.addi %141, %151 : vector<32x64xi32>
    %153 = arith.select %150, %152, %141 : vector<32x64xi1>, vector<32x64xi32>
    %c1_i32_58 = arith.constant 1 : i32
    %154 = tpu.dynamic_rotate %136 by %c1_i32_58 dim 0 : vector<32x64xf32>, i32 -> vector<32x64xf32>
    %c1_i32_59 = arith.constant 1 : i32
    %155 = vector.broadcast %c1_i32_59 : i32 to vector<32x64xi32>
    %156 = arith.cmpi sge, %153, %155 : vector<32x64xi32>
    %cst_60 = arith.constant 0.000000e+00 : f32
    %157 = vector.broadcast %cst_60 : f32 to vector<32x64xf32>
    %158 = arith.select %156, %154, %157 : vector<32x64xi1>, vector<32x64xf32>
    %c31_i32_61 = arith.constant 31 : i32
    %159 = tpu.dynamic_rotate %136 by %c31_i32_61 dim 0 : vector<32x64xf32>, i32 -> vector<32x64xf32>
    %c15_i32_62 = arith.constant 15 : i32
    %160 = vector.broadcast %c15_i32_62 : i32 to vector<32x64xi32>
    %161 = arith.cmpi slt, %153, %160 : vector<32x64xi32>
    %cst_63 = arith.constant 0.000000e+00 : f32
    %162 = vector.broadcast %cst_63 : f32 to vector<32x64xf32>
    %163 = arith.select %161, %159, %162 : vector<32x64xi1>, vector<32x64xf32>
    %164 = tpu.concatenate %158, %136, %163 in 1 : vector<32x64xf32>, vector<32x64xf32>, vector<32x64xf32> -> vector<32x192xf32>
    %c384 = arith.constant 384 : index
    %c0_64 = arith.constant 0 : index
    %165 = vector.load %arg2[%c384, %c0_64] : memref<4640x128xf32, #tpu.memory_space<vmem>>, vector<192x64xf32>
    %cst_65 = arith.constant dense<0.000000e+00> : vector<32x64xf32>
    %166 = tpu.matmul %164, %165, %cst_65 {dimension_numbers = #tpu.dot_dimension_numbers<[1], [0], [0], [1], [0, 0, 1, 1], [], []>} : vector<32x192xf32>, vector<192x64xf32>, vector<32x64xf32> -> vector<32x64xf32>
    %cst_66 = arith.constant dense<0.000000e+00> : vector<64xf32>
    %167 = vector.multi_reduction <add>, %166, %cst_66 [0] : vector<32x64xf32> to vector<64xf32>
    %168 = vector.shape_cast %167 : vector<64xf32> to vector<1x64xf32>
    %cst_67 = arith.constant 3.125000e-02 : f32
    %169 = vector.broadcast %cst_67 : f32 to vector<1x64xf32>
    %170 = arith.mulf %168, %169 : vector<1x64xf32>
    %171 = vector.broadcast %170 : vector<1x64xf32> to vector<32x64xf32>
    %172 = arith.subf %166, %171 : vector<32x64xf32>
    %173 = arith.mulf %172, %172 : vector<32x64xf32>
    %cst_68 = arith.constant dense<0.000000e+00> : vector<64xf32>
    %174 = vector.multi_reduction <add>, %173, %cst_68 [0] : vector<32x64xf32> to vector<64xf32>
    %175 = vector.shape_cast %174 : vector<64xf32> to vector<1x64xf32>
    %cst_69 = arith.constant 3.125000e-02 : f32
    %176 = vector.broadcast %cst_69 : f32 to vector<1x64xf32>
    %177 = arith.mulf %175, %176 : vector<1x64xf32>
    %cst_70 = arith.constant 9.99999974E-6 : f32
    %178 = vector.broadcast %cst_70 : f32 to vector<1x64xf32>
    %179 = arith.addf %177, %178 : vector<1x64xf32>
    %180 = math.rsqrt %179 : vector<1x64xf32>
    %c576 = arith.constant 576 : index
    %c0_71 = arith.constant 0 : index
    %181 = vector.load %arg2[%c576, %c0_71] : memref<4640x128xf32, #tpu.memory_space<vmem>>, vector<1x64xf32>
    %182 = arith.mulf %180, %181 : vector<1x64xf32>
    %183 = vector.broadcast %182 : vector<1x64xf32> to vector<32x64xf32>
    %184 = arith.mulf %172, %183 : vector<32x64xf32>
    %c584 = arith.constant 584 : index
    %c0_72 = arith.constant 0 : index
    %185 = vector.load %arg2[%c584, %c0_72] : memref<4640x128xf32, #tpu.memory_space<vmem>>, vector<1x64xf32>
    %186 = vector.broadcast %185 : vector<1x64xf32> to vector<32x64xf32>
    %187 = arith.addf %184, %186 : vector<32x64xf32>
    %c656 = arith.constant 656 : index
    %c0_73 = arith.constant 0 : index
    %188 = vector.load %arg2[%c656, %c0_73] : memref<4640x128xf32, #tpu.memory_space<vmem>>, vector<4x64xf32>
    %cst_74 = arith.constant dense<0.000000e+00> : vector<32x64xf32>
    %189 = tpu.matmul %0, %188, %cst_74 {dimension_numbers = #tpu.dot_dimension_numbers<[1], [0], [0], [1], [0, 0, 1, 1], [], []>} : vector<32x4xf32>, vector<4x64xf32>, vector<32x64xf32> -> vector<32x64xf32>
    %cst_75 = arith.constant dense<0.000000e+00> : vector<64xf32>
    %190 = vector.multi_reduction <add>, %189, %cst_75 [0] : vector<32x64xf32> to vector<64xf32>
    %191 = vector.shape_cast %190 : vector<64xf32> to vector<1x64xf32>
    %cst_76 = arith.constant 3.125000e-02 : f32
    %192 = vector.broadcast %cst_76 : f32 to vector<1x64xf32>
    %193 = arith.mulf %191, %192 : vector<1x64xf32>
    %194 = vector.broadcast %193 : vector<1x64xf32> to vector<32x64xf32>
    %195 = arith.subf %189, %194 : vector<32x64xf32>
    %196 = arith.mulf %195, %195 : vector<32x64xf32>
    %cst_77 = arith.constant dense<0.000000e+00> : vector<64xf32>
    %197 = vector.multi_reduction <add>, %196, %cst_77 [0] : vector<32x64xf32> to vector<64xf32>
    %198 = vector.shape_cast %197 : vector<64xf32> to vector<1x64xf32>
    %cst_78 = arith.constant 3.125000e-02 : f32
    %199 = vector.broadcast %cst_78 : f32 to vector<1x64xf32>
    %200 = arith.mulf %198, %199 : vector<1x64xf32>
    %cst_79 = arith.constant 9.99999974E-6 : f32
    %201 = vector.broadcast %cst_79 : f32 to vector<1x64xf32>
    %202 = arith.addf %200, %201 : vector<1x64xf32>
    %203 = math.rsqrt %202 : vector<1x64xf32>
    %c664 = arith.constant 664 : index
    %c0_80 = arith.constant 0 : index
    %204 = vector.load %arg2[%c664, %c0_80] : memref<4640x128xf32, #tpu.memory_space<vmem>>, vector<1x64xf32>
    %205 = arith.mulf %203, %204 : vector<1x64xf32>
    %206 = vector.broadcast %205 : vector<1x64xf32> to vector<32x64xf32>
    %207 = arith.mulf %195, %206 : vector<32x64xf32>
    %c672 = arith.constant 672 : index
    %c0_81 = arith.constant 0 : index
    %208 = vector.load %arg2[%c672, %c0_81] : memref<4640x128xf32, #tpu.memory_space<vmem>>, vector<1x64xf32>
    %209 = vector.broadcast %208 : vector<1x64xf32> to vector<32x64xf32>
    %210 = arith.addf %207, %209 : vector<32x64xf32>
    %c0_82 = arith.constant 0 : index
    %211 = memref.load %arg3[%c0_82] : memref<3xf32, #tpu.memory_space<smem>>
    %c592 = arith.constant 592 : index
    %c0_83 = arith.constant 0 : index
    %212 = vector.load %arg2[%c592, %c0_83] : memref<4640x128xf32, #tpu.memory_space<vmem>>, vector<64x64xf32>
    %cst_84 = arith.constant dense<0.000000e+00> : vector<32x64xf32>
    %213 = tpu.matmul %187, %212, %cst_84 {dimension_numbers = #tpu.dot_dimension_numbers<[1], [0], [0], [1], [0, 0, 1, 1], [], []>} : vector<32x64xf32>, vector<64x64xf32>, vector<32x64xf32> -> vector<32x64xf32>
    %214 = vector.shape_cast %187 : vector<32x64xf32> to vector<2x16x64xf32>
    "tpu.trace_start"() <{level = 10 : i32, message = "blc,bld->bcd"}> : () -> ()
    %cst_85 = arith.constant dense<0.000000e+00> : vector<2x64x64xf32>
    %215 = tpu.matmul %214, %214, %cst_85 {dimension_numbers = #tpu.dot_dimension_numbers<[1], [1], [2], [2], [0, 0, 0, 2, 1, 2], [0], [0]>} : vector<2x16x64xf32>, vector<2x16x64xf32>, vector<2x64x64xf32> -> vector<2x64x64xf32>
    "tpu.trace_stop"() : () -> ()
    %216 = vector.shape_cast %213 : vector<32x64xf32> to vector<2x16x64xf32>
    "tpu.trace_start"() <{level = 10 : i32, message = "blc,bcd->bld"}> : () -> ()
    %cst_86 = arith.constant dense<0.000000e+00> : vector<2x16x64xf32>
    %217 = tpu.matmul %216, %215, %cst_86 {dimension_numbers = #tpu.dot_dimension_numbers<[2], [1], [1], [2], [0, 0, 0, 1, 1, 2], [0], [0]>} : vector<2x16x64xf32>, vector<2x64x64xf32>, vector<2x16x64xf32> -> vector<2x16x64xf32>
    "tpu.trace_stop"() : () -> ()
    %218 = vector.shape_cast %217 : vector<2x16x64xf32> to vector<32x64xf32>
    %219 = vector.broadcast %211 : f32 to vector<32x64xf32>
    %220 = arith.mulf %219, %218 : vector<32x64xf32>
    %221 = arith.addf %220, %187 : vector<32x64xf32>
    %222 = arith.addf %221, %210 : vector<32x64xf32>
    %cst_87 = arith.constant 0.000000e+00 : f32
    %223 = vector.broadcast %cst_87 : f32 to vector<32x64xf32>
    %224 = arith.maximumf %222, %223 : vector<32x64xf32>
    %225 = tpu.iota {dimensions = array<i32: 0>} : vector<32x64xi32>
    %c16_i32_88 = arith.constant 16 : i32
    %c0_i32_89 = arith.constant 0 : i32
    %226 = arith.cmpi eq, %c16_i32_88, %c0_i32_89 : i32
    %c1_i32_90 = arith.constant 1 : i32
    %227 = arith.select %226, %c1_i32_90, %c16_i32_88 : i32
    %228 = vector.broadcast %227 : i32 to vector<32x64xi32>
    %229 = arith.remsi %225, %228 : vector<32x64xi32>
    %c0_i32_91 = arith.constant 0 : i32
    %230 = vector.broadcast %c0_i32_91 : i32 to vector<32x64xi32>
    %231 = arith.cmpi ne, %229, %230 : vector<32x64xi32>
    %c0_i32_92 = arith.constant 0 : i32
    %232 = vector.broadcast %c0_i32_92 : i32 to vector<32x64xi32>
    %233 = arith.cmpi slt, %229, %232 : vector<32x64xi32>
    %c0_i32_93 = arith.constant 0 : i32
    %234 = arith.cmpi slt, %227, %c0_i32_93 : i32
    %235 = vector.broadcast %234 : i1 to vector<32x64xi1>
    %236 = vector.broadcast %235 : vector<32x64xi1> to vector<32x64xi1>
    %237 = arith.xori %233, %236 : vector<32x64xi1>
    %238 = arith.andi %237, %231 : vector<32x64xi1>
    %239 = vector.broadcast %227 : i32 to vector<32x64xi32>
    %240 = arith.addi %229, %239 : vector<32x64xi32>
    %241 = arith.select %238, %240, %229 : vector<32x64xi1>, vector<32x64xi32>
    %c3_i32_94 = arith.constant 3 : i32
    %242 = tpu.dynamic_rotate %224 by %c3_i32_94 dim 0 : vector<32x64xf32>, i32 -> vector<32x64xf32>
    %c3_i32_95 = arith.constant 3 : i32
    %243 = vector.broadcast %c3_i32_95 : i32 to vector<32x64xi32>
    %244 = arith.cmpi sge, %241, %243 : vector<32x64xi32>
    %cst_96 = arith.constant 0.000000e+00 : f32
    %245 = vector.broadcast %cst_96 : f32 to vector<32x64xf32>
    %246 = arith.select %244, %242, %245 : vector<32x64xi1>, vector<32x64xf32>
    %c2_i32_97 = arith.constant 2 : i32
    %247 = tpu.dynamic_rotate %224 by %c2_i32_97 dim 0 : vector<32x64xf32>, i32 -> vector<32x64xf32>
    %c2_i32_98 = arith.constant 2 : i32
    %248 = vector.broadcast %c2_i32_98 : i32 to vector<32x64xi32>
    %249 = arith.cmpi sge, %241, %248 : vector<32x64xi32>
    %cst_99 = arith.constant 0.000000e+00 : f32
    %250 = vector.broadcast %cst_99 : f32 to vector<32x64xf32>
    %251 = arith.select %249, %247, %250 : vector<32x64xi1>, vector<32x64xf32>
    %c1_i32_100 = arith.constant 1 : i32
    %252 = tpu.dynamic_rotate %224 by %c1_i32_100 dim 0 : vector<32x64xf32>, i32 -> vector<32x64xf32>
    %c1_i32_101 = arith.constant 1 : i32
    %253 = vector.broadcast %c1_i32_101 : i32 to vector<32x64xi32>
    %254 = arith.cmpi sge, %241, %253 : vector<32x64xi32>
    %cst_102 = arith.constant 0.000000e+00 : f32
    %255 = vector.broadcast %cst_102 : f32 to vector<32x64xf32>
    %256 = arith.select %254, %252, %255 : vector<32x64xi1>, vector<32x64xf32>
    %c31_i32_103 = arith.constant 31 : i32
    %257 = tpu.dynamic_rotate %224 by %c31_i32_103 dim 0 : vector<32x64xf32>, i32 -> vector<32x64xf32>
    %c15_i32_104 = arith.constant 15 : i32
    %258 = vector.broadcast %c15_i32_104 : i32 to vector<32x64xi32>
    %259 = arith.cmpi slt, %241, %258 : vector<32x64xi32>
    %cst_105 = arith.constant 0.000000e+00 : f32
    %260 = vector.broadcast %cst_105 : f32 to vector<32x64xf32>
    %261 = arith.select %259, %257, %260 : vector<32x64xi1>, vector<32x64xf32>
    %c30_i32_106 = arith.constant 30 : i32
    %262 = tpu.dynamic_rotate %224 by %c30_i32_106 dim 0 : vector<32x64xf32>, i32 -> vector<32x64xf32>
    %c14_i32_107 = arith.constant 14 : i32
    %263 = vector.broadcast %c14_i32_107 : i32 to vector<32x64xi32>
    %264 = arith.cmpi slt, %241, %263 : vector<32x64xi32>
    %cst_108 = arith.constant 0.000000e+00 : f32
    %265 = vector.broadcast %cst_108 : f32 to vector<32x64xf32>
    %266 = arith.select %264, %262, %265 : vector<32x64xi1>, vector<32x64xf32>
    %c29_i32_109 = arith.constant 29 : i32
    %267 = tpu.dynamic_rotate %224 by %c29_i32_109 dim 0 : vector<32x64xf32>, i32 -> vector<32x64xf32>
    %c13_i32_110 = arith.constant 13 : i32
    %268 = vector.broadcast %c13_i32_110 : i32 to vector<32x64xi32>
    %269 = arith.cmpi slt, %241, %268 : vector<32x64xi32>
    %cst_111 = arith.constant 0.000000e+00 : f32
    %270 = vector.broadcast %cst_111 : f32 to vector<32x64xf32>
    %271 = arith.select %269, %267, %270 : vector<32x64xi1>, vector<32x64xf32>
    %272 = tpu.concatenate %246, %251, %256, %224, %261, %266, %271 in 1 : vector<32x64xf32>, vector<32x64xf32>, vector<32x64xf32>, vector<32x64xf32>, vector<32x64xf32>, vector<32x64xf32>, vector<32x64xf32> -> vector<32x448xf32>
    %c680 = arith.constant 680 : index
    %c0_112 = arith.constant 0 : index
    %273 = vector.load %arg2[%c680, %c0_112] : memref<4640x128xf32, #tpu.memory_space<vmem>>, vector<448x128xf32>
    %cst_113 = arith.constant dense<0.000000e+00> : vector<32x128xf32>
    %274 = tpu.matmul %272, %273, %cst_113 {dimension_numbers = #tpu.dot_dimension_numbers<[1], [0], [0], [1], [0, 0, 1, 1], [], []>} : vector<32x448xf32>, vector<448x128xf32>, vector<32x128xf32> -> vector<32x128xf32>
    %cst_114 = arith.constant dense<0.000000e+00> : vector<128xf32>
    %275 = vector.multi_reduction <add>, %274, %cst_114 [0] : vector<32x128xf32> to vector<128xf32>
    %276 = vector.shape_cast %275 : vector<128xf32> to vector<1x128xf32>
    %cst_115 = arith.constant 3.125000e-02 : f32
    %277 = vector.broadcast %cst_115 : f32 to vector<1x128xf32>
    %278 = arith.mulf %276, %277 : vector<1x128xf32>
    %279 = vector.broadcast %278 : vector<1x128xf32> to vector<32x128xf32>
    %280 = arith.subf %274, %279 : vector<32x128xf32>
    %281 = arith.mulf %280, %280 : vector<32x128xf32>
    %cst_116 = arith.constant dense<0.000000e+00> : vector<128xf32>
    %282 = vector.multi_reduction <add>, %281, %cst_116 [0] : vector<32x128xf32> to vector<128xf32>
    %283 = vector.shape_cast %282 : vector<128xf32> to vector<1x128xf32>
    %cst_117 = arith.constant 3.125000e-02 : f32
    %284 = vector.broadcast %cst_117 : f32 to vector<1x128xf32>
    %285 = arith.mulf %283, %284 : vector<1x128xf32>
    %cst_118 = arith.constant 9.99999974E-6 : f32
    %286 = vector.broadcast %cst_118 : f32 to vector<1x128xf32>
    %287 = arith.addf %285, %286 : vector<1x128xf32>
    %288 = math.rsqrt %287 : vector<1x128xf32>
    %c1128 = arith.constant 1128 : index
    %c0_119 = arith.constant 0 : index
    %289 = vector.load %arg2[%c1128, %c0_119] : memref<4640x128xf32, #tpu.memory_space<vmem>>, vector<1x128xf32>
    %290 = arith.mulf %288, %289 : vector<1x128xf32>
    %291 = vector.broadcast %290 : vector<1x128xf32> to vector<32x128xf32>
    %292 = arith.mulf %280, %291 : vector<32x128xf32>
    %c1136 = arith.constant 1136 : index
    %c0_120 = arith.constant 0 : index
    %293 = vector.load %arg2[%c1136, %c0_120] : memref<4640x128xf32, #tpu.memory_space<vmem>>, vector<1x128xf32>
    %294 = vector.broadcast %293 : vector<1x128xf32> to vector<32x128xf32>
    %295 = arith.addf %292, %294 : vector<32x128xf32>
    %cst_121 = arith.constant 0.000000e+00 : f32
    %296 = vector.broadcast %cst_121 : f32 to vector<32x128xf32>
    %297 = arith.maximumf %295, %296 : vector<32x128xf32>
    %298 = tpu.iota {dimensions = array<i32: 0>} : vector<32x128xi32>
    %c16_i32_122 = arith.constant 16 : i32
    %c0_i32_123 = arith.constant 0 : i32
    %299 = arith.cmpi eq, %c16_i32_122, %c0_i32_123 : i32
    %c1_i32_124 = arith.constant 1 : i32
    %300 = arith.select %299, %c1_i32_124, %c16_i32_122 : i32
    %301 = vector.broadcast %300 : i32 to vector<32x128xi32>
    %302 = arith.remsi %298, %301 : vector<32x128xi32>
    %c0_i32_125 = arith.constant 0 : i32
    %303 = vector.broadcast %c0_i32_125 : i32 to vector<32x128xi32>
    %304 = arith.cmpi ne, %302, %303 : vector<32x128xi32>
    %c0_i32_126 = arith.constant 0 : i32
    %305 = vector.broadcast %c0_i32_126 : i32 to vector<32x128xi32>
    %306 = arith.cmpi slt, %302, %305 : vector<32x128xi32>
    %c0_i32_127 = arith.constant 0 : i32
    %307 = arith.cmpi slt, %300, %c0_i32_127 : i32
    %308 = vector.broadcast %307 : i1 to vector<32x128xi1>
    %309 = vector.broadcast %308 : vector<32x128xi1> to vector<32x128xi1>
    %310 = arith.xori %306, %309 : vector<32x128xi1>
    %311 = arith.andi %310, %304 : vector<32x128xi1>
    %312 = vector.broadcast %300 : i32 to vector<32x128xi32>
    %313 = arith.addi %302, %312 : vector<32x128xi32>
    %314 = arith.select %311, %313, %302 : vector<32x128xi1>, vector<32x128xi32>
    %c2_i32_128 = arith.constant 2 : i32
    %315 = tpu.dynamic_rotate %297 by %c2_i32_128 dim 0 : vector<32x128xf32>, i32 -> vector<32x128xf32>
    %c2_i32_129 = arith.constant 2 : i32
    %316 = vector.broadcast %c2_i32_129 : i32 to vector<32x128xi32>
    %317 = arith.cmpi sge, %314, %316 : vector<32x128xi32>
    %cst_130 = arith.constant 0.000000e+00 : f32
    %318 = vector.broadcast %cst_130 : f32 to vector<32x128xf32>
    %319 = arith.select %317, %315, %318 : vector<32x128xi1>, vector<32x128xf32>
    %c1_i32_131 = arith.constant 1 : i32
    %320 = tpu.dynamic_rotate %297 by %c1_i32_131 dim 0 : vector<32x128xf32>, i32 -> vector<32x128xf32>
    %c1_i32_132 = arith.constant 1 : i32
    %321 = vector.broadcast %c1_i32_132 : i32 to vector<32x128xi32>
    %322 = arith.cmpi sge, %314, %321 : vector<32x128xi32>
    %cst_133 = arith.constant 0.000000e+00 : f32
    %323 = vector.broadcast %cst_133 : f32 to vector<32x128xf32>
    %324 = arith.select %322, %320, %323 : vector<32x128xi1>, vector<32x128xf32>
    %c31_i32_134 = arith.constant 31 : i32
    %325 = tpu.dynamic_rotate %297 by %c31_i32_134 dim 0 : vector<32x128xf32>, i32 -> vector<32x128xf32>
    %c15_i32_135 = arith.constant 15 : i32
    %326 = vector.broadcast %c15_i32_135 : i32 to vector<32x128xi32>
    %327 = arith.cmpi slt, %314, %326 : vector<32x128xi32>
    %cst_136 = arith.constant 0.000000e+00 : f32
    %328 = vector.broadcast %cst_136 : f32 to vector<32x128xf32>
    %329 = arith.select %327, %325, %328 : vector<32x128xi1>, vector<32x128xf32>
    %c30_i32_137 = arith.constant 30 : i32
    %330 = tpu.dynamic_rotate %297 by %c30_i32_137 dim 0 : vector<32x128xf32>, i32 -> vector<32x128xf32>
    %c14_i32_138 = arith.constant 14 : i32
    %331 = vector.broadcast %c14_i32_138 : i32 to vector<32x128xi32>
    %332 = arith.cmpi slt, %314, %331 : vector<32x128xi32>
    %cst_139 = arith.constant 0.000000e+00 : f32
    %333 = vector.broadcast %cst_139 : f32 to vector<32x128xf32>
    %334 = arith.select %332, %330, %333 : vector<32x128xi1>, vector<32x128xf32>
    %335 = tpu.concatenate %319, %324, %297, %329, %334 in 1 : vector<32x128xf32>, vector<32x128xf32>, vector<32x128xf32>, vector<32x128xf32>, vector<32x128xf32> -> vector<32x640xf32>
    %c1144 = arith.constant 1144 : index
    %c0_140 = arith.constant 0 : index
    %336 = vector.load %arg2[%c1144, %c0_140] : memref<4640x128xf32, #tpu.memory_space<vmem>>, vector<640x128xf32>
    %cst_141 = arith.constant dense<0.000000e+00> : vector<32x128xf32>
    %337 = tpu.matmul %335, %336, %cst_141 {dimension_numbers = #tpu.dot_dimension_numbers<[1], [0], [0], [1], [0, 0, 1, 1], [], []>} : vector<32x640xf32>, vector<640x128xf32>, vector<32x128xf32> -> vector<32x128xf32>
    %cst_142 = arith.constant dense<0.000000e+00> : vector<128xf32>
    %338 = vector.multi_reduction <add>, %337, %cst_142 [0] : vector<32x128xf32> to vector<128xf32>
    %339 = vector.shape_cast %338 : vector<128xf32> to vector<1x128xf32>
    %cst_143 = arith.constant 3.125000e-02 : f32
    %340 = vector.broadcast %cst_143 : f32 to vector<1x128xf32>
    %341 = arith.mulf %339, %340 : vector<1x128xf32>
    %342 = vector.broadcast %341 : vector<1x128xf32> to vector<32x128xf32>
    %343 = arith.subf %337, %342 : vector<32x128xf32>
    %344 = arith.mulf %343, %343 : vector<32x128xf32>
    %cst_144 = arith.constant dense<0.000000e+00> : vector<128xf32>
    %345 = vector.multi_reduction <add>, %344, %cst_144 [0] : vector<32x128xf32> to vector<128xf32>
    %346 = vector.shape_cast %345 : vector<128xf32> to vector<1x128xf32>
    %cst_145 = arith.constant 3.125000e-02 : f32
    %347 = vector.broadcast %cst_145 : f32 to vector<1x128xf32>
    %348 = arith.mulf %346, %347 : vector<1x128xf32>
    %cst_146 = arith.constant 9.99999974E-6 : f32
    %349 = vector.broadcast %cst_146 : f32 to vector<1x128xf32>
    %350 = arith.addf %348, %349 : vector<1x128xf32>
    %351 = math.rsqrt %350 : vector<1x128xf32>
    %c1784 = arith.constant 1784 : index
    %c0_147 = arith.constant 0 : index
    %352 = vector.load %arg2[%c1784, %c0_147] : memref<4640x128xf32, #tpu.memory_space<vmem>>, vector<1x128xf32>
    %353 = arith.mulf %351, %352 : vector<1x128xf32>
    %354 = vector.broadcast %353 : vector<1x128xf32> to vector<32x128xf32>
    %355 = arith.mulf %343, %354 : vector<32x128xf32>
    %c1792 = arith.constant 1792 : index
    %c0_148 = arith.constant 0 : index
    %356 = vector.load %arg2[%c1792, %c0_148] : memref<4640x128xf32, #tpu.memory_space<vmem>>, vector<1x128xf32>
    %357 = vector.broadcast %356 : vector<1x128xf32> to vector<32x128xf32>
    %358 = arith.addf %355, %357 : vector<32x128xf32>
    %cst_149 = arith.constant 0.000000e+00 : f32
    %359 = vector.broadcast %cst_149 : f32 to vector<32x128xf32>
    %360 = arith.maximumf %358, %359 : vector<32x128xf32>
    %361 = tpu.iota {dimensions = array<i32: 0>} : vector<32x128xi32>
    %c16_i32_150 = arith.constant 16 : i32
    %c0_i32_151 = arith.constant 0 : i32
    %362 = arith.cmpi eq, %c16_i32_150, %c0_i32_151 : i32
    %c1_i32_152 = arith.constant 1 : i32
    %363 = arith.select %362, %c1_i32_152, %c16_i32_150 : i32
    %364 = vector.broadcast %363 : i32 to vector<32x128xi32>
    %365 = arith.remsi %361, %364 : vector<32x128xi32>
    %c0_i32_153 = arith.constant 0 : i32
    %366 = vector.broadcast %c0_i32_153 : i32 to vector<32x128xi32>
    %367 = arith.cmpi ne, %365, %366 : vector<32x128xi32>
    %c0_i32_154 = arith.constant 0 : i32
    %368 = vector.broadcast %c0_i32_154 : i32 to vector<32x128xi32>
    %369 = arith.cmpi slt, %365, %368 : vector<32x128xi32>
    %c0_i32_155 = arith.constant 0 : i32
    %370 = arith.cmpi slt, %363, %c0_i32_155 : i32
    %371 = vector.broadcast %370 : i1 to vector<32x128xi1>
    %372 = vector.broadcast %371 : vector<32x128xi1> to vector<32x128xi1>
    %373 = arith.xori %369, %372 : vector<32x128xi1>
    %374 = arith.andi %373, %367 : vector<32x128xi1>
    %375 = vector.broadcast %363 : i32 to vector<32x128xi32>
    %376 = arith.addi %365, %375 : vector<32x128xi32>
    %377 = arith.select %374, %376, %365 : vector<32x128xi1>, vector<32x128xi32>
    %c1_i32_156 = arith.constant 1 : i32
    %378 = tpu.dynamic_rotate %360 by %c1_i32_156 dim 0 : vector<32x128xf32>, i32 -> vector<32x128xf32>
    %c1_i32_157 = arith.constant 1 : i32
    %379 = vector.broadcast %c1_i32_157 : i32 to vector<32x128xi32>
    %380 = arith.cmpi sge, %377, %379 : vector<32x128xi32>
    %cst_158 = arith.constant 0.000000e+00 : f32
    %381 = vector.broadcast %cst_158 : f32 to vector<32x128xf32>
    %382 = arith.select %380, %378, %381 : vector<32x128xi1>, vector<32x128xf32>
    %c31_i32_159 = arith.constant 31 : i32
    %383 = tpu.dynamic_rotate %360 by %c31_i32_159 dim 0 : vector<32x128xf32>, i32 -> vector<32x128xf32>
    %c15_i32_160 = arith.constant 15 : i32
    %384 = vector.broadcast %c15_i32_160 : i32 to vector<32x128xi32>
    %385 = arith.cmpi slt, %377, %384 : vector<32x128xi32>
    %cst_161 = arith.constant 0.000000e+00 : f32
    %386 = vector.broadcast %cst_161 : f32 to vector<32x128xf32>
    %387 = arith.select %385, %383, %386 : vector<32x128xi1>, vector<32x128xf32>
    %388 = tpu.concatenate %382, %360, %387 in 1 : vector<32x128xf32>, vector<32x128xf32>, vector<32x128xf32> -> vector<32x384xf32>
    %c1800 = arith.constant 1800 : index
    %c0_162 = arith.constant 0 : index
    %389 = vector.load %arg2[%c1800, %c0_162] : memref<4640x128xf32, #tpu.memory_space<vmem>>, vector<384x128xf32>
    %cst_163 = arith.constant dense<0.000000e+00> : vector<32x128xf32>
    %390 = tpu.matmul %388, %389, %cst_163 {dimension_numbers = #tpu.dot_dimension_numbers<[1], [0], [0], [1], [0, 0, 1, 1], [], []>} : vector<32x384xf32>, vector<384x128xf32>, vector<32x128xf32> -> vector<32x128xf32>
    %cst_164 = arith.constant dense<0.000000e+00> : vector<128xf32>
    %391 = vector.multi_reduction <add>, %390, %cst_164 [0] : vector<32x128xf32> to vector<128xf32>
    %392 = vector.shape_cast %391 : vector<128xf32> to vector<1x128xf32>
    %cst_165 = arith.constant 3.125000e-02 : f32
    %393 = vector.broadcast %cst_165 : f32 to vector<1x128xf32>
    %394 = arith.mulf %392, %393 : vector<1x128xf32>
    %395 = vector.broadcast %394 : vector<1x128xf32> to vector<32x128xf32>
    %396 = arith.subf %390, %395 : vector<32x128xf32>
    %397 = arith.mulf %396, %396 : vector<32x128xf32>
    %cst_166 = arith.constant dense<0.000000e+00> : vector<128xf32>
    %398 = vector.multi_reduction <add>, %397, %cst_166 [0] : vector<32x128xf32> to vector<128xf32>
    %399 = vector.shape_cast %398 : vector<128xf32> to vector<1x128xf32>
    %cst_167 = arith.constant 3.125000e-02 : f32
    %400 = vector.broadcast %cst_167 : f32 to vector<1x128xf32>
    %401 = arith.mulf %399, %400 : vector<1x128xf32>
    %cst_168 = arith.constant 9.99999974E-6 : f32
    %402 = vector.broadcast %cst_168 : f32 to vector<1x128xf32>
    %403 = arith.addf %401, %402 : vector<1x128xf32>
    %404 = math.rsqrt %403 : vector<1x128xf32>
    %c2184 = arith.constant 2184 : index
    %c0_169 = arith.constant 0 : index
    %405 = vector.load %arg2[%c2184, %c0_169] : memref<4640x128xf32, #tpu.memory_space<vmem>>, vector<1x128xf32>
    %406 = arith.mulf %404, %405 : vector<1x128xf32>
    %407 = vector.broadcast %406 : vector<1x128xf32> to vector<32x128xf32>
    %408 = arith.mulf %396, %407 : vector<32x128xf32>
    %c2192 = arith.constant 2192 : index
    %c0_170 = arith.constant 0 : index
    %409 = vector.load %arg2[%c2192, %c0_170] : memref<4640x128xf32, #tpu.memory_space<vmem>>, vector<1x128xf32>
    %410 = vector.broadcast %409 : vector<1x128xf32> to vector<32x128xf32>
    %411 = arith.addf %408, %410 : vector<32x128xf32>
    %c2328 = arith.constant 2328 : index
    %c0_171 = arith.constant 0 : index
    %412 = vector.load %arg2[%c2328, %c0_171] : memref<4640x128xf32, #tpu.memory_space<vmem>>, vector<64x128xf32>
    %cst_172 = arith.constant dense<0.000000e+00> : vector<32x128xf32>
    %413 = tpu.matmul %224, %412, %cst_172 {dimension_numbers = #tpu.dot_dimension_numbers<[1], [0], [0], [1], [0, 0, 1, 1], [], []>} : vector<32x64xf32>, vector<64x128xf32>, vector<32x128xf32> -> vector<32x128xf32>
    %cst_173 = arith.constant dense<0.000000e+00> : vector<128xf32>
    %414 = vector.multi_reduction <add>, %413, %cst_173 [0] : vector<32x128xf32> to vector<128xf32>
    %415 = vector.shape_cast %414 : vector<128xf32> to vector<1x128xf32>
    %cst_174 = arith.constant 3.125000e-02 : f32
    %416 = vector.broadcast %cst_174 : f32 to vector<1x128xf32>
    %417 = arith.mulf %415, %416 : vector<1x128xf32>
    %418 = vector.broadcast %417 : vector<1x128xf32> to vector<32x128xf32>
    %419 = arith.subf %413, %418 : vector<32x128xf32>
    %420 = arith.mulf %419, %419 : vector<32x128xf32>
    %cst_175 = arith.constant dense<0.000000e+00> : vector<128xf32>
    %421 = vector.multi_reduction <add>, %420, %cst_175 [0] : vector<32x128xf32> to vector<128xf32>
    %422 = vector.shape_cast %421 : vector<128xf32> to vector<1x128xf32>
    %cst_176 = arith.constant 3.125000e-02 : f32
    %423 = vector.broadcast %cst_176 : f32 to vector<1x128xf32>
    %424 = arith.mulf %422, %423 : vector<1x128xf32>
    %cst_177 = arith.constant 9.99999974E-6 : f32
    %425 = vector.broadcast %cst_177 : f32 to vector<1x128xf32>
    %426 = arith.addf %424, %425 : vector<1x128xf32>
    %427 = math.rsqrt %426 : vector<1x128xf32>
    %c2392 = arith.constant 2392 : index
    %c0_178 = arith.constant 0 : index
    %428 = vector.load %arg2[%c2392, %c0_178] : memref<4640x128xf32, #tpu.memory_space<vmem>>, vector<1x128xf32>
    %429 = arith.mulf %427, %428 : vector<1x128xf32>
    %430 = vector.broadcast %429 : vector<1x128xf32> to vector<32x128xf32>
    %431 = arith.mulf %419, %430 : vector<32x128xf32>
    %c2400 = arith.constant 2400 : index
    %c0_179 = arith.constant 0 : index
    %432 = vector.load %arg2[%c2400, %c0_179] : memref<4640x128xf32, #tpu.memory_space<vmem>>, vector<1x128xf32>
    %433 = vector.broadcast %432 : vector<1x128xf32> to vector<32x128xf32>
    %434 = arith.addf %431, %433 : vector<32x128xf32>
    %c1 = arith.constant 1 : index
    %435 = memref.load %arg3[%c1] : memref<3xf32, #tpu.memory_space<smem>>
    %c2200 = arith.constant 2200 : index
    %c0_180 = arith.constant 0 : index
    %436 = vector.load %arg2[%c2200, %c0_180] : memref<4640x128xf32, #tpu.memory_space<vmem>>, vector<128x128xf32>
    %cst_181 = arith.constant dense<0.000000e+00> : vector<32x128xf32>
    %437 = tpu.matmul %411, %436, %cst_181 {dimension_numbers = #tpu.dot_dimension_numbers<[1], [0], [0], [1], [0, 0, 1, 1], [], []>} : vector<32x128xf32>, vector<128x128xf32>, vector<32x128xf32> -> vector<32x128xf32>
    %438 = vector.shape_cast %411 : vector<32x128xf32> to vector<2x16x128xf32>
    "tpu.trace_start"() <{level = 10 : i32, message = "blc,bld->bcd"}> : () -> ()
    %cst_182 = arith.constant dense<0.000000e+00> : vector<2x128x128xf32>
    %439 = tpu.matmul %438, %438, %cst_182 {dimension_numbers = #tpu.dot_dimension_numbers<[1], [1], [2], [2], [0, 0, 0, 2, 1, 2], [0], [0]>} : vector<2x16x128xf32>, vector<2x16x128xf32>, vector<2x128x128xf32> -> vector<2x128x128xf32>
    "tpu.trace_stop"() : () -> ()
    %440 = vector.shape_cast %437 : vector<32x128xf32> to vector<2x16x128xf32>
    "tpu.trace_start"() <{level = 10 : i32, message = "blc,bcd->bld"}> : () -> ()
    %cst_183 = arith.constant dense<0.000000e+00> : vector<2x16x128xf32>
    %441 = tpu.matmul %440, %439, %cst_183 {dimension_numbers = #tpu.dot_dimension_numbers<[2], [1], [1], [2], [0, 0, 0, 1, 1, 2], [0], [0]>} : vector<2x16x128xf32>, vector<2x128x128xf32>, vector<2x16x128xf32> -> vector<2x16x128xf32>
    "tpu.trace_stop"() : () -> ()
    %442 = vector.shape_cast %441 : vector<2x16x128xf32> to vector<32x128xf32>
    %443 = vector.broadcast %435 : f32 to vector<32x128xf32>
    %444 = arith.mulf %443, %442 : vector<32x128xf32>
    %445 = arith.addf %444, %411 : vector<32x128xf32>
    %446 = arith.addf %445, %434 : vector<32x128xf32>
    %cst_184 = arith.constant 0.000000e+00 : f32
    %447 = vector.broadcast %cst_184 : f32 to vector<32x128xf32>
    %448 = arith.maximumf %446, %447 : vector<32x128xf32>
    %449 = tpu.iota {dimensions = array<i32: 0>} : vector<32x128xi32>
    %c16_i32_185 = arith.constant 16 : i32
    %c0_i32_186 = arith.constant 0 : i32
    %450 = arith.cmpi eq, %c16_i32_185, %c0_i32_186 : i32
    %c1_i32_187 = arith.constant 1 : i32
    %451 = arith.select %450, %c1_i32_187, %c16_i32_185 : i32
    %452 = vector.broadcast %451 : i32 to vector<32x128xi32>
    %453 = arith.remsi %449, %452 : vector<32x128xi32>
    %c0_i32_188 = arith.constant 0 : i32
    %454 = vector.broadcast %c0_i32_188 : i32 to vector<32x128xi32>
    %455 = arith.cmpi ne, %453, %454 : vector<32x128xi32>
    %c0_i32_189 = arith.constant 0 : i32
    %456 = vector.broadcast %c0_i32_189 : i32 to vector<32x128xi32>
    %457 = arith.cmpi slt, %453, %456 : vector<32x128xi32>
    %c0_i32_190 = arith.constant 0 : i32
    %458 = arith.cmpi slt, %451, %c0_i32_190 : i32
    %459 = vector.broadcast %458 : i1 to vector<32x128xi1>
    %460 = vector.broadcast %459 : vector<32x128xi1> to vector<32x128xi1>
    %461 = arith.xori %457, %460 : vector<32x128xi1>
    %462 = arith.andi %461, %455 : vector<32x128xi1>
    %463 = vector.broadcast %451 : i32 to vector<32x128xi32>
    %464 = arith.addi %453, %463 : vector<32x128xi32>
    %465 = arith.select %462, %464, %453 : vector<32x128xi1>, vector<32x128xi32>
    %c3_i32_191 = arith.constant 3 : i32
    %466 = tpu.dynamic_rotate %448 by %c3_i32_191 dim 0 : vector<32x128xf32>, i32 -> vector<32x128xf32>
    %c3_i32_192 = arith.constant 3 : i32
    %467 = vector.broadcast %c3_i32_192 : i32 to vector<32x128xi32>
    %468 = arith.cmpi sge, %465, %467 : vector<32x128xi32>
    %cst_193 = arith.constant 0.000000e+00 : f32
    %469 = vector.broadcast %cst_193 : f32 to vector<32x128xf32>
    %470 = arith.select %468, %466, %469 : vector<32x128xi1>, vector<32x128xf32>
    %c2_i32_194 = arith.constant 2 : i32
    %471 = tpu.dynamic_rotate %448 by %c2_i32_194 dim 0 : vector<32x128xf32>, i32 -> vector<32x128xf32>
    %c2_i32_195 = arith.constant 2 : i32
    %472 = vector.broadcast %c2_i32_195 : i32 to vector<32x128xi32>
    %473 = arith.cmpi sge, %465, %472 : vector<32x128xi32>
    %cst_196 = arith.constant 0.000000e+00 : f32
    %474 = vector.broadcast %cst_196 : f32 to vector<32x128xf32>
    %475 = arith.select %473, %471, %474 : vector<32x128xi1>, vector<32x128xf32>
    %c1_i32_197 = arith.constant 1 : i32
    %476 = tpu.dynamic_rotate %448 by %c1_i32_197 dim 0 : vector<32x128xf32>, i32 -> vector<32x128xf32>
    %c1_i32_198 = arith.constant 1 : i32
    %477 = vector.broadcast %c1_i32_198 : i32 to vector<32x128xi32>
    %478 = arith.cmpi sge, %465, %477 : vector<32x128xi32>
    %cst_199 = arith.constant 0.000000e+00 : f32
    %479 = vector.broadcast %cst_199 : f32 to vector<32x128xf32>
    %480 = arith.select %478, %476, %479 : vector<32x128xi1>, vector<32x128xf32>
    %c31_i32_200 = arith.constant 31 : i32
    %481 = tpu.dynamic_rotate %448 by %c31_i32_200 dim 0 : vector<32x128xf32>, i32 -> vector<32x128xf32>
    %c15_i32_201 = arith.constant 15 : i32
    %482 = vector.broadcast %c15_i32_201 : i32 to vector<32x128xi32>
    %483 = arith.cmpi slt, %465, %482 : vector<32x128xi32>
    %cst_202 = arith.constant 0.000000e+00 : f32
    %484 = vector.broadcast %cst_202 : f32 to vector<32x128xf32>
    %485 = arith.select %483, %481, %484 : vector<32x128xi1>, vector<32x128xf32>
    %c30_i32_203 = arith.constant 30 : i32
    %486 = tpu.dynamic_rotate %448 by %c30_i32_203 dim 0 : vector<32x128xf32>, i32 -> vector<32x128xf32>
    %c14_i32_204 = arith.constant 14 : i32
    %487 = vector.broadcast %c14_i32_204 : i32 to vector<32x128xi32>
    %488 = arith.cmpi slt, %465, %487 : vector<32x128xi32>
    %cst_205 = arith.constant 0.000000e+00 : f32
    %489 = vector.broadcast %cst_205 : f32 to vector<32x128xf32>
    %490 = arith.select %488, %486, %489 : vector<32x128xi1>, vector<32x128xf32>
    %c29_i32_206 = arith.constant 29 : i32
    %491 = tpu.dynamic_rotate %448 by %c29_i32_206 dim 0 : vector<32x128xf32>, i32 -> vector<32x128xf32>
    %c13_i32_207 = arith.constant 13 : i32
    %492 = vector.broadcast %c13_i32_207 : i32 to vector<32x128xi32>
    %493 = arith.cmpi slt, %465, %492 : vector<32x128xi32>
    %cst_208 = arith.constant 0.000000e+00 : f32
    %494 = vector.broadcast %cst_208 : f32 to vector<32x128xf32>
    %495 = arith.select %493, %491, %494 : vector<32x128xi1>, vector<32x128xf32>
    %496 = tpu.concatenate %470, %475, %480, %448, %485, %490, %495 in 1 : vector<32x128xf32>, vector<32x128xf32>, vector<32x128xf32>, vector<32x128xf32>, vector<32x128xf32>, vector<32x128xf32>, vector<32x128xf32> -> vector<32x896xf32>
    %c2408 = arith.constant 2408 : index
    %c0_209 = arith.constant 0 : index
    %497 = vector.load %arg2[%c2408, %c0_209] : memref<4640x128xf32, #tpu.memory_space<vmem>>, vector<896x128xf32>
    %cst_210 = arith.constant dense<0.000000e+00> : vector<32x128xf32>
    %498 = tpu.matmul %496, %497, %cst_210 {dimension_numbers = #tpu.dot_dimension_numbers<[1], [0], [0], [1], [0, 0, 1, 1], [], []>} : vector<32x896xf32>, vector<896x128xf32>, vector<32x128xf32> -> vector<32x128xf32>
    %cst_211 = arith.constant dense<0.000000e+00> : vector<128xf32>
    %499 = vector.multi_reduction <add>, %498, %cst_211 [0] : vector<32x128xf32> to vector<128xf32>
    %500 = vector.shape_cast %499 : vector<128xf32> to vector<1x128xf32>
    %cst_212 = arith.constant 3.125000e-02 : f32
    %501 = vector.broadcast %cst_212 : f32 to vector<1x128xf32>
    %502 = arith.mulf %500, %501 : vector<1x128xf32>
    %503 = vector.broadcast %502 : vector<1x128xf32> to vector<32x128xf32>
    %504 = arith.subf %498, %503 : vector<32x128xf32>
    %505 = arith.mulf %504, %504 : vector<32x128xf32>
    %cst_213 = arith.constant dense<0.000000e+00> : vector<128xf32>
    %506 = vector.multi_reduction <add>, %505, %cst_213 [0] : vector<32x128xf32> to vector<128xf32>
    %507 = vector.shape_cast %506 : vector<128xf32> to vector<1x128xf32>
    %cst_214 = arith.constant 3.125000e-02 : f32
    %508 = vector.broadcast %cst_214 : f32 to vector<1x128xf32>
    %509 = arith.mulf %507, %508 : vector<1x128xf32>
    %cst_215 = arith.constant 9.99999974E-6 : f32
    %510 = vector.broadcast %cst_215 : f32 to vector<1x128xf32>
    %511 = arith.addf %509, %510 : vector<1x128xf32>
    %512 = math.rsqrt %511 : vector<1x128xf32>
    %c3304 = arith.constant 3304 : index
    %c0_216 = arith.constant 0 : index
    %513 = vector.load %arg2[%c3304, %c0_216] : memref<4640x128xf32, #tpu.memory_space<vmem>>, vector<1x128xf32>
    %514 = arith.mulf %512, %513 : vector<1x128xf32>
    %515 = vector.broadcast %514 : vector<1x128xf32> to vector<32x128xf32>
    %516 = arith.mulf %504, %515 : vector<32x128xf32>
    %c3312 = arith.constant 3312 : index
    %c0_217 = arith.constant 0 : index
    %517 = vector.load %arg2[%c3312, %c0_217] : memref<4640x128xf32, #tpu.memory_space<vmem>>, vector<1x128xf32>
    %518 = vector.broadcast %517 : vector<1x128xf32> to vector<32x128xf32>
    %519 = arith.addf %516, %518 : vector<32x128xf32>
    %cst_218 = arith.constant 0.000000e+00 : f32
    %520 = vector.broadcast %cst_218 : f32 to vector<32x128xf32>
    %521 = arith.maximumf %519, %520 : vector<32x128xf32>
    %522 = tpu.iota {dimensions = array<i32: 0>} : vector<32x128xi32>
    %c16_i32_219 = arith.constant 16 : i32
    %c0_i32_220 = arith.constant 0 : i32
    %523 = arith.cmpi eq, %c16_i32_219, %c0_i32_220 : i32
    %c1_i32_221 = arith.constant 1 : i32
    %524 = arith.select %523, %c1_i32_221, %c16_i32_219 : i32
    %525 = vector.broadcast %524 : i32 to vector<32x128xi32>
    %526 = arith.remsi %522, %525 : vector<32x128xi32>
    %c0_i32_222 = arith.constant 0 : i32
    %527 = vector.broadcast %c0_i32_222 : i32 to vector<32x128xi32>
    %528 = arith.cmpi ne, %526, %527 : vector<32x128xi32>
    %c0_i32_223 = arith.constant 0 : i32
    %529 = vector.broadcast %c0_i32_223 : i32 to vector<32x128xi32>
    %530 = arith.cmpi slt, %526, %529 : vector<32x128xi32>
    %c0_i32_224 = arith.constant 0 : i32
    %531 = arith.cmpi slt, %524, %c0_i32_224 : i32
    %532 = vector.broadcast %531 : i1 to vector<32x128xi1>
    %533 = vector.broadcast %532 : vector<32x128xi1> to vector<32x128xi1>
    %534 = arith.xori %530, %533 : vector<32x128xi1>
    %535 = arith.andi %534, %528 : vector<32x128xi1>
    %536 = vector.broadcast %524 : i32 to vector<32x128xi32>
    %537 = arith.addi %526, %536 : vector<32x128xi32>
    %538 = arith.select %535, %537, %526 : vector<32x128xi1>, vector<32x128xi32>
    %c2_i32_225 = arith.constant 2 : i32
    %539 = tpu.dynamic_rotate %521 by %c2_i32_225 dim 0 : vector<32x128xf32>, i32 -> vector<32x128xf32>
    %c2_i32_226 = arith.constant 2 : i32
    %540 = vector.broadcast %c2_i32_226 : i32 to vector<32x128xi32>
    %541 = arith.cmpi sge, %538, %540 : vector<32x128xi32>
    %cst_227 = arith.constant 0.000000e+00 : f32
    %542 = vector.broadcast %cst_227 : f32 to vector<32x128xf32>
    %543 = arith.select %541, %539, %542 : vector<32x128xi1>, vector<32x128xf32>
    %c1_i32_228 = arith.constant 1 : i32
    %544 = tpu.dynamic_rotate %521 by %c1_i32_228 dim 0 : vector<32x128xf32>, i32 -> vector<32x128xf32>
    %c1_i32_229 = arith.constant 1 : i32
    %545 = vector.broadcast %c1_i32_229 : i32 to vector<32x128xi32>
    %546 = arith.cmpi sge, %538, %545 : vector<32x128xi32>
    %cst_230 = arith.constant 0.000000e+00 : f32
    %547 = vector.broadcast %cst_230 : f32 to vector<32x128xf32>
    %548 = arith.select %546, %544, %547 : vector<32x128xi1>, vector<32x128xf32>
    %c31_i32_231 = arith.constant 31 : i32
    %549 = tpu.dynamic_rotate %521 by %c31_i32_231 dim 0 : vector<32x128xf32>, i32 -> vector<32x128xf32>
    %c15_i32_232 = arith.constant 15 : i32
    %550 = vector.broadcast %c15_i32_232 : i32 to vector<32x128xi32>
    %551 = arith.cmpi slt, %538, %550 : vector<32x128xi32>
    %cst_233 = arith.constant 0.000000e+00 : f32
    %552 = vector.broadcast %cst_233 : f32 to vector<32x128xf32>
    %553 = arith.select %551, %549, %552 : vector<32x128xi1>, vector<32x128xf32>
    %c30_i32_234 = arith.constant 30 : i32
    %554 = tpu.dynamic_rotate %521 by %c30_i32_234 dim 0 : vector<32x128xf32>, i32 -> vector<32x128xf32>
    %c14_i32_235 = arith.constant 14 : i32
    %555 = vector.broadcast %c14_i32_235 : i32 to vector<32x128xi32>
    %556 = arith.cmpi slt, %538, %555 : vector<32x128xi32>
    %cst_236 = arith.constant 0.000000e+00 : f32
    %557 = vector.broadcast %cst_236 : f32 to vector<32x128xf32>
    %558 = arith.select %556, %554, %557 : vector<32x128xi1>, vector<32x128xf32>
    %559 = tpu.concatenate %543, %548, %521, %553, %558 in 1 : vector<32x128xf32>, vector<32x128xf32>, vector<32x128xf32>, vector<32x128xf32>, vector<32x128xf32> -> vector<32x640xf32>
    %c3320 = arith.constant 3320 : index
    %c0_237 = arith.constant 0 : index
    %560 = vector.load %arg2[%c3320, %c0_237] : memref<4640x128xf32, #tpu.memory_space<vmem>>, vector<640x128xf32>
    %cst_238 = arith.constant dense<0.000000e+00> : vector<32x128xf32>
    %561 = tpu.matmul %559, %560, %cst_238 {dimension_numbers = #tpu.dot_dimension_numbers<[1], [0], [0], [1], [0, 0, 1, 1], [], []>} : vector<32x640xf32>, vector<640x128xf32>, vector<32x128xf32> -> vector<32x128xf32>
    %cst_239 = arith.constant dense<0.000000e+00> : vector<128xf32>
    %562 = vector.multi_reduction <add>, %561, %cst_239 [0] : vector<32x128xf32> to vector<128xf32>
    %563 = vector.shape_cast %562 : vector<128xf32> to vector<1x128xf32>
    %cst_240 = arith.constant 3.125000e-02 : f32
    %564 = vector.broadcast %cst_240 : f32 to vector<1x128xf32>
    %565 = arith.mulf %563, %564 : vector<1x128xf32>
    %566 = vector.broadcast %565 : vector<1x128xf32> to vector<32x128xf32>
    %567 = arith.subf %561, %566 : vector<32x128xf32>
    %568 = arith.mulf %567, %567 : vector<32x128xf32>
    %cst_241 = arith.constant dense<0.000000e+00> : vector<128xf32>
    %569 = vector.multi_reduction <add>, %568, %cst_241 [0] : vector<32x128xf32> to vector<128xf32>
    %570 = vector.shape_cast %569 : vector<128xf32> to vector<1x128xf32>
    %cst_242 = arith.constant 3.125000e-02 : f32
    %571 = vector.broadcast %cst_242 : f32 to vector<1x128xf32>
    %572 = arith.mulf %570, %571 : vector<1x128xf32>
    %cst_243 = arith.constant 9.99999974E-6 : f32
    %573 = vector.broadcast %cst_243 : f32 to vector<1x128xf32>
    %574 = arith.addf %572, %573 : vector<1x128xf32>
    %575 = math.rsqrt %574 : vector<1x128xf32>
    %c3960 = arith.constant 3960 : index
    %c0_244 = arith.constant 0 : index
    %576 = vector.load %arg2[%c3960, %c0_244] : memref<4640x128xf32, #tpu.memory_space<vmem>>, vector<1x128xf32>
    %577 = arith.mulf %575, %576 : vector<1x128xf32>
    %578 = vector.broadcast %577 : vector<1x128xf32> to vector<32x128xf32>
    %579 = arith.mulf %567, %578 : vector<32x128xf32>
    %c3968 = arith.constant 3968 : index
    %c0_245 = arith.constant 0 : index
    %580 = vector.load %arg2[%c3968, %c0_245] : memref<4640x128xf32, #tpu.memory_space<vmem>>, vector<1x128xf32>
    %581 = vector.broadcast %580 : vector<1x128xf32> to vector<32x128xf32>
    %582 = arith.addf %579, %581 : vector<32x128xf32>
    %cst_246 = arith.constant 0.000000e+00 : f32
    %583 = vector.broadcast %cst_246 : f32 to vector<32x128xf32>
    %584 = arith.maximumf %582, %583 : vector<32x128xf32>
    %585 = tpu.iota {dimensions = array<i32: 0>} : vector<32x128xi32>
    %c16_i32_247 = arith.constant 16 : i32
    %c0_i32_248 = arith.constant 0 : i32
    %586 = arith.cmpi eq, %c16_i32_247, %c0_i32_248 : i32
    %c1_i32_249 = arith.constant 1 : i32
    %587 = arith.select %586, %c1_i32_249, %c16_i32_247 : i32
    %588 = vector.broadcast %587 : i32 to vector<32x128xi32>
    %589 = arith.remsi %585, %588 : vector<32x128xi32>
    %c0_i32_250 = arith.constant 0 : i32
    %590 = vector.broadcast %c0_i32_250 : i32 to vector<32x128xi32>
    %591 = arith.cmpi ne, %589, %590 : vector<32x128xi32>
    %c0_i32_251 = arith.constant 0 : i32
    %592 = vector.broadcast %c0_i32_251 : i32 to vector<32x128xi32>
    %593 = arith.cmpi slt, %589, %592 : vector<32x128xi32>
    %c0_i32_252 = arith.constant 0 : i32
    %594 = arith.cmpi slt, %587, %c0_i32_252 : i32
    %595 = vector.broadcast %594 : i1 to vector<32x128xi1>
    %596 = vector.broadcast %595 : vector<32x128xi1> to vector<32x128xi1>
    %597 = arith.xori %593, %596 : vector<32x128xi1>
    %598 = arith.andi %597, %591 : vector<32x128xi1>
    %599 = vector.broadcast %587 : i32 to vector<32x128xi32>
    %600 = arith.addi %589, %599 : vector<32x128xi32>
    %601 = arith.select %598, %600, %589 : vector<32x128xi1>, vector<32x128xi32>
    %c1_i32_253 = arith.constant 1 : i32
    %602 = tpu.dynamic_rotate %584 by %c1_i32_253 dim 0 : vector<32x128xf32>, i32 -> vector<32x128xf32>
    %c1_i32_254 = arith.constant 1 : i32
    %603 = vector.broadcast %c1_i32_254 : i32 to vector<32x128xi32>
    %604 = arith.cmpi sge, %601, %603 : vector<32x128xi32>
    %cst_255 = arith.constant 0.000000e+00 : f32
    %605 = vector.broadcast %cst_255 : f32 to vector<32x128xf32>
    %606 = arith.select %604, %602, %605 : vector<32x128xi1>, vector<32x128xf32>
    %c31_i32_256 = arith.constant 31 : i32
    %607 = tpu.dynamic_rotate %584 by %c31_i32_256 dim 0 : vector<32x128xf32>, i32 -> vector<32x128xf32>
    %c15_i32_257 = arith.constant 15 : i32
    %608 = vector.broadcast %c15_i32_257 : i32 to vector<32x128xi32>
    %609 = arith.cmpi slt, %601, %608 : vector<32x128xi32>
    %cst_258 = arith.constant 0.000000e+00 : f32
    %610 = vector.broadcast %cst_258 : f32 to vector<32x128xf32>
    %611 = arith.select %609, %607, %610 : vector<32x128xi1>, vector<32x128xf32>
    %612 = tpu.concatenate %606, %584, %611 in 1 : vector<32x128xf32>, vector<32x128xf32>, vector<32x128xf32> -> vector<32x384xf32>
    %c3976 = arith.constant 3976 : index
    %c0_259 = arith.constant 0 : index
    %613 = vector.load %arg2[%c3976, %c0_259] : memref<4640x128xf32, #tpu.memory_space<vmem>>, vector<384x128xf32>
    %cst_260 = arith.constant dense<0.000000e+00> : vector<32x128xf32>
    %614 = tpu.matmul %612, %613, %cst_260 {dimension_numbers = #tpu.dot_dimension_numbers<[1], [0], [0], [1], [0, 0, 1, 1], [], []>} : vector<32x384xf32>, vector<384x128xf32>, vector<32x128xf32> -> vector<32x128xf32>
    %cst_261 = arith.constant dense<0.000000e+00> : vector<128xf32>
    %615 = vector.multi_reduction <add>, %614, %cst_261 [0] : vector<32x128xf32> to vector<128xf32>
    %616 = vector.shape_cast %615 : vector<128xf32> to vector<1x128xf32>
    %cst_262 = arith.constant 3.125000e-02 : f32
    %617 = vector.broadcast %cst_262 : f32 to vector<1x128xf32>
    %618 = arith.mulf %616, %617 : vector<1x128xf32>
    %619 = vector.broadcast %618 : vector<1x128xf32> to vector<32x128xf32>
    %620 = arith.subf %614, %619 : vector<32x128xf32>
    %621 = arith.mulf %620, %620 : vector<32x128xf32>
    %cst_263 = arith.constant dense<0.000000e+00> : vector<128xf32>
    %622 = vector.multi_reduction <add>, %621, %cst_263 [0] : vector<32x128xf32> to vector<128xf32>
    %623 = vector.shape_cast %622 : vector<128xf32> to vector<1x128xf32>
    %cst_264 = arith.constant 3.125000e-02 : f32
    %624 = vector.broadcast %cst_264 : f32 to vector<1x128xf32>
    %625 = arith.mulf %623, %624 : vector<1x128xf32>
    %cst_265 = arith.constant 9.99999974E-6 : f32
    %626 = vector.broadcast %cst_265 : f32 to vector<1x128xf32>
    %627 = arith.addf %625, %626 : vector<1x128xf32>
    %628 = math.rsqrt %627 : vector<1x128xf32>
    %c4360 = arith.constant 4360 : index
    %c0_266 = arith.constant 0 : index
    %629 = vector.load %arg2[%c4360, %c0_266] : memref<4640x128xf32, #tpu.memory_space<vmem>>, vector<1x128xf32>
    %630 = arith.mulf %628, %629 : vector<1x128xf32>
    %631 = vector.broadcast %630 : vector<1x128xf32> to vector<32x128xf32>
    %632 = arith.mulf %620, %631 : vector<32x128xf32>
    %c4368 = arith.constant 4368 : index
    %c0_267 = arith.constant 0 : index
    %633 = vector.load %arg2[%c4368, %c0_267] : memref<4640x128xf32, #tpu.memory_space<vmem>>, vector<1x128xf32>
    %634 = vector.broadcast %633 : vector<1x128xf32> to vector<32x128xf32>
    %635 = arith.addf %632, %634 : vector<32x128xf32>
    %c2 = arith.constant 2 : index
    %636 = memref.load %arg3[%c2] : memref<3xf32, #tpu.memory_space<smem>>
    %c4376 = arith.constant 4376 : index
    %c0_268 = arith.constant 0 : index
    %637 = vector.load %arg2[%c4376, %c0_268] : memref<4640x128xf32, #tpu.memory_space<vmem>>, vector<128x128xf32>
    %cst_269 = arith.constant dense<0.000000e+00> : vector<32x128xf32>
    %638 = tpu.matmul %635, %637, %cst_269 {dimension_numbers = #tpu.dot_dimension_numbers<[1], [0], [0], [1], [0, 0, 1, 1], [], []>} : vector<32x128xf32>, vector<128x128xf32>, vector<32x128xf32> -> vector<32x128xf32>
    %639 = vector.shape_cast %635 : vector<32x128xf32> to vector<2x16x128xf32>
    "tpu.trace_start"() <{level = 10 : i32, message = "blc,bld->bcd"}> : () -> ()
    %cst_270 = arith.constant dense<0.000000e+00> : vector<2x128x128xf32>
    %640 = tpu.matmul %639, %639, %cst_270 {dimension_numbers = #tpu.dot_dimension_numbers<[1], [1], [2], [2], [0, 0, 0, 2, 1, 2], [0], [0]>} : vector<2x16x128xf32>, vector<2x16x128xf32>, vector<2x128x128xf32> -> vector<2x128x128xf32>
    "tpu.trace_stop"() : () -> ()
    %641 = vector.shape_cast %638 : vector<32x128xf32> to vector<2x16x128xf32>
    "tpu.trace_start"() <{level = 10 : i32, message = "blc,bcd->bld"}> : () -> ()
    %cst_271 = arith.constant dense<0.000000e+00> : vector<2x16x128xf32>
    %642 = tpu.matmul %641, %640, %cst_271 {dimension_numbers = #tpu.dot_dimension_numbers<[2], [1], [1], [2], [0, 0, 0, 1, 1, 2], [0], [0]>} : vector<2x16x128xf32>, vector<2x128x128xf32>, vector<2x16x128xf32> -> vector<2x16x128xf32>
    "tpu.trace_stop"() : () -> ()
    %643 = vector.shape_cast %642 : vector<2x16x128xf32> to vector<32x128xf32>
    %644 = vector.broadcast %636 : f32 to vector<32x128xf32>
    %645 = arith.mulf %644, %643 : vector<32x128xf32>
    %646 = arith.addf %645, %635 : vector<32x128xf32>
    %647 = arith.addf %646, %448 : vector<32x128xf32>
    %cst_272 = arith.constant 0.000000e+00 : f32
    %648 = vector.broadcast %cst_272 : f32 to vector<32x128xf32>
    %649 = arith.maximumf %647, %648 : vector<32x128xf32>
    %650 = vector.shape_cast %649 : vector<32x128xf32> to vector<2x16x128xf32>
    %cst_273 = arith.constant dense<0.000000e+00> : vector<2x128xf32>
    %651 = vector.multi_reduction <add>, %650, %cst_273 [1] : vector<2x16x128xf32> to vector<2x128xf32>
    %cst_274 = arith.constant 1.600000e+01 : f32
    %652 = vector.broadcast %cst_274 : f32 to vector<2x128xf32>
    %653 = arith.divf %651, %652 : vector<2x128xf32>
    %c4504 = arith.constant 4504 : index
    %c0_275 = arith.constant 0 : index
    %654 = vector.load %arg2[%c4504, %c0_275] : memref<4640x128xf32, #tpu.memory_space<vmem>>, vector<128x3xf32>
    %cst_276 = arith.constant dense<0.000000e+00> : vector<2x3xf32>
    %655 = tpu.matmul %653, %654, %cst_276 {dimension_numbers = #tpu.dot_dimension_numbers<[1], [0], [0], [1], [0, 0, 1, 1], [], []>} : vector<2x128xf32>, vector<128x3xf32>, vector<2x3xf32> -> vector<2x3xf32>
    %c4632 = arith.constant 4632 : index
    %c0_277 = arith.constant 0 : index
    %656 = vector.load %arg2[%c4632, %c0_277] : memref<4640x128xf32, #tpu.memory_space<vmem>>, vector<1x3xf32>
    %657 = vector.broadcast %656 : vector<1x3xf32> to vector<2x3xf32>
    %658 = arith.addf %655, %657 : vector<2x3xf32>
    %c0_278 = arith.constant 0 : index
    %c0_279 = arith.constant 0 : index
    %659 = vector.load %arg4[%c0_278, %c0_279] : memref<2x3xf32, #tpu.memory_space<vmem>>, vector<2x3xf32>
    tpu.vector_store %arg4[%c0_278, %c0_279], %658 {strides = array<i32>} : memref<2x3xf32, #tpu.memory_space<vmem>>, vector<2x3xf32>,
    return
  }
  func.func @transform_0(%arg0: i32) -> (i32, i32) {
    %c0_i32 = arith.constant 0 : i32
    %c0_i32_0 = arith.constant 0 : i32
    %c0_i32_1 = arith.constant 0 : i32
    return %c0_i32, %c0_i32_0 : i32, i32
  }
  func.func @transform_1(%arg0: i32) -> (i32, i32) {
    %c0_i32 = arith.constant 0 : i32
    %c0_i32_0 = arith.constant 0 : i32
    %c0_i32_1 = arith.constant 0 : i32
    return %c0_i32, %c0_i32_0 : i32, i32
  }
  func.func @transform_2(%arg0: i32) -> i32 {
    %c0_i32 = arith.constant 0 : i32
    %c0_i32_0 = arith.constant 0 : i32
    return %c0_i32 : i32
  }
  func.func @transform_3(%arg0: i32) -> (i32, i32) {
    %c0_i32 = arith.constant 0 : i32
    %c0_i32_0 = arith.constant 0 : i32
    %c0_i32_1 = arith.constant 0 : i32
    return %c0_i32, %c0_i32_0 : i32, i32
  }
}

</mosaic_0001>

<bundles_post_ra>
// kernel: forward.1
= control target key start
LH: loop header
LB: loop body
LE: loop exit
PB: predicated region body
PF: predicated region fallthrough
CT: control target
= control target key end

     0   :  { %8 = vsyncpa [#allocation3], 0  ;;  %s5825_s0 = inlined_call_operand.vmem [shape: f32[32,4], index: 0, kind: input, shape index: {}]   ;;  %s5826_s1 = inlined_call_operand.hbm [shape: f32[4640,128], index: 1, kind: input, shape index: {}]   ;;  %s5827_s2 = inlined_call_operand.hbm [shape: f32[3], index: 2, kind: input, shape index: {}]   ;;  %s5828_s3 = inlined_call_operand.hbm [shape: f32[2,3], index: 3, kind: output, shape index: {}]  }
   0x1   :  { %9 = vsyncpa [#allocation5], 0 }
   0x2   :  { %10 = vsyncpa [#allocation4], 0  ;;  %s17_s14 = sshll.u32 %s5826_s1, 4  ;;  %s4554_s15 = smov [#allocation2]   ;;  %s18_s14 = int_to_ptr.hbm [resolvable:$true] %s17_s14 }
   0x3   :  { %s19_s16 = sshll.u32 %s4554_s15, 4  ;;  %s31_s19 = sshll.u32 %s5827_s2, 4  ;;  %s20_s16 = int_to_ptr.vmem [resolvable:$true] %s19_s16  ;;  %s32_s19 = int_to_ptr.hbm [resolvable:$true] %s31_s19 }
   0x4   :  { %s4555_s20 = smov 128   ;;  %s4556_s21 = smov 8  }
   0x5   :  { %25 = dma.hbm_to_vmem [thread:$0]  %s18_s14, 74240, %s20_s16, [#allocation3], %s4555_s20, %s4555_s20, %s4556_s21  }
   0x6   :  { %s4557_s22 = smov [#allocation6]  }
   0x7   :  { %34 = dma.hbm_to_smem %s32_s19, 16, %s4557_s22, [#allocation5]  }
   0x8   :  { %4548 = dma.done.wait [#allocation3], 74240  }
   0x9   :  { %4549 = vsyncadd [#allocation3], 4294893056 }
   0xa   :  { %4550 = dma.done.wait [#allocation5], 16  }
   0xb   :  { %4551 = vsyncadd [#allocation5], 4294967280 }
   0xc   :  { %43 = sfence }
   0xd   :  { %v4596_v0 = vld [vmem:[%s5825_s0] sm:$0xff]  ;;  %v4601_v1 = vld [vmem:[%s5825_s0 + $0x18] sm:$0xff]  ;;  %v48_v2 = vlaneseq  ;;  %v4606_v3 = vld [vmem:[%s5825_s0 + $0x8] sm:$0xff]  ;;  %s4558_s27 = smov 12   ;;  %s4559_s28 = smov 4   ;;  %vm5832_vm15 = vcmask 1043456  }
   0xe   :  { %v118_v4 = vrot.slane %v4596_v0, 6  ;;  %v121_v5 = vrot.slane %v4601_v1, 6  ;;  %239 = vrot.lane.b32.xlu1 %v4596_v0, %s4558_s27  ;;  %v152_v7 = vrot.slane %v4596_v0, 1  ;;  %v153_v8 = vrot.slane %v4606_v3, 1  ;;  %s4560_s29 = smov 16   ;;  %s4561_s30 = smov 20  }
   0xf   :  { %v4612_v6 = vshrl.u32 %v48_v2, 7  ;;  %v135_v11 = vrot.slane %v4596_v0, 7  ;;  %v138_v12 = vrot.slane %v4601_v1, 7  ;;  %v170_v15 = vrot.slane %v4606_v3, 2  ;;  %v4655_v21 = vld [vmem:[%s5825_s0 + $0x10] sm:$0xff]  ;;  %s4562_s6 = smov 24  }
  0x10   :  { %v169_v16 = vrot.slane %v4596_v0, 2  ;;  %v136_v18 = vrot.slane %v4606_v3, 7  ;;  %v186_v22 = vrot.slane %v4596_v0, 3  ;;  %v187_v23 = vrot.slane %v4606_v3, 3  ;;  %v332_v63 = vld [vmem:[#allocation2 + $0x18] sm:$0xf] }
  0x11   :  { %v4617_v9 = vand.u32 15, %v4612_v6  ;;  %vm122_vm0 = vcmp.lt.s32.totalorder %v4612_v6, 2  ;;  %vm156_vm1 = vcmp.lt.s32.totalorder %v4612_v6, 7  ;;  %vm139_vm3 = vcmp.lt.s32.totalorder %v4612_v6, 1  ;;  %4229 = vmatpush.msk.msra.mxu0 %vm5832_vm15, %v332_v63  ;;  %v331_v2 = vld [vmem:[#allocation2 + $0x10] sm:$0xff]  ;;  %s4563_s7 = smov 64  }
  0x12   :  { %v126_v10 = vsel %vm122_vm0, %v121_v5, %v118_v4  ;;  %v159_v13 = vsel %vm156_vm1, %v152_v7, %v153_v8  ;;  %vm5835_vm4 = vcmp.lt.s32.totalorder %v4612_v6, 6  ;;  %v143_v17 = vsel %vm139_vm3, %v138_v12, %v135_v11  ;;  %s4291_s16 = sld [smem:[#allocation6 + $0x1]]  ;;  %s4565_s18 = smov [#allocation7]  }
  0x13   :  { %vm5837_vm2 = vcmp.ge.s32.totalorder %v4617_v9, 2  ;;  %vm144_vm5 = vcmp.ge.s32.totalorder %v4617_v9, 1  ;;  %v176_v19 = vsel %vm5835_vm4, %v169_v16, %v170_v15  ;;  %v50_v20 = vadd.s32 8, %v4612_v6  ;;  %363 = vmatpush.msra.mxu0 %v331_v2  ;;  %s4348_s17 = sld [smem:[#allocation6 + $0x2]]  ;;  %s4216_s19 = sshll.u32 %s4565_s18, 4  ;;  %s4217_s19 = int_to_ptr.vmem [resolvable:$true] %s4216_s19 }
  0x14   :  { %v131_v14 = vsel %vm5837_vm2, %v126_v10, 0.0  ;;  %271 = vrot.lane.b32.xlu2 %v176_v19, %s4561_s30  ;;  %v148_v24 = vsel %vm144_vm5, %v143_v17, 0.0  ;;  %vm5831_vm6 = vcmp.lt.s32.totalorder %v4612_v6, 5  ;;  %v142_v25 = vsel %vm139_vm3, %v135_v11, %v136_v18  ;;  %s4218_s22 = sshll.u32 %s5828_s3, 4  ;;  %s4219_s22 = int_to_ptr.hbm [resolvable:$true] %s4218_s22 }
  0x15   :  { %207 = vrot.lane.b32.xlu0 %v131_v14, %s4559_s28  ;;  %v4664_v26 = vand.u32 15, %v50_v20  ;;  %v171_v27 = vrot.slane %v4655_v21, 2  ;;  %v193_v28 = vsel %vm5831_vm6, %v186_v22, %v187_v23  ;;  %v119_v29 = vrot.slane %v4606_v3, 6 }
  0x16   :  { %255 = vrot.lane.b32.xlu1 %v159_v13, %s4560_s29  ;;  %v51_v31 = vadd.s32 16, %v4612_v6  ;;  %v154_v33 = vrot.slane %v4655_v21, 1  ;;  %v137_v36 = vrot.slane %v4655_v21, 7  ;;  %v188_v37 = vrot.slane %v4655_v21, 3 }
  0x17   :  { %v175_v30 = vsel %vm5835_vm4, %v170_v15, %v171_v27  ;;  %vm5834_vm7 = vcmp.lt.s32.totalorder %v4664_v26, 14  ;;  %v125_v32 = vsel %vm122_vm0, %v118_v4, %v119_v29  ;;  %vm162_vm8 = vcmp.lt.s32.totalorder %v4664_v26, 15  ;;  %v330_v4 = vld [vmem:[#allocation2 + $0x8] sm:$0xff] }
  0x18   :  { %v183_v34 = vsel %vm5834_vm7, %v175_v30, 0.0  ;;  %v4684_v35 = vand.u32 15, %v51_v31  ;;  %v158_v38 = vsel %vm156_vm1, %v153_v8, %v154_v33  ;;  %v141_v39 = vsel %vm139_vm3, %v136_v18, %v137_v36  ;;  %364 = vmatpush.msra.mxu0 %v330_v4 }
  0x19   :  { %v166_v40 = vsel %vm162_vm8, %v158_v38, 0.0  ;;  %v192_v41 = vsel %vm5831_vm6, %v187_v23, %v188_v37  ;;  %vm5830_vm10 = vcmp.lt.s32.totalorder %v4664_v26, 13  ;;  %v120_v42 = vrot.slane %v4655_v21, 6 }
  0x1a   :  { %vm146_vm9 = vcmp.ge.s32.totalorder %v4684_v35, 1  ;;  %v200_v44 = vsel %vm5830_vm10, %v192_v41, 0.0  ;;  %vm5836_vm11 = vcmp.ge.s32.totalorder %v4684_v35, 2  ;;  %v172_v46 = vrot.slane %v4601_v1, 2 }
  0x1b   :  { %v150_v43 = vsel %vm146_vm9, %v141_v39, 0.0  ;;  %v124_v45 = vsel %vm122_vm0, %v119_v29, %v120_v42  ;;  %v155_v49 = vrot.slane %v4601_v1, 1  ;;  %v52_v50 = vadd.s32 24, %v4612_v6 }
  0x1c   :  { %287 = vrot.lane.b32.xlu2 %v193_v28, %s4562_s6  ;;  %v133_v47 = vsel %vm5836_vm11, %v124_v45, 0.0  ;;  %v174_v48 = vsel %vm5835_vm4, %v171_v27, %v172_v46  ;;  %v189_v51 = vrot.slane %v4601_v1, 3  ;;  %v140_v53 = vsel %vm139_vm3, %v137_v36, %v138_v12 }
  0x1d   :  { %223 = vrot.lane.b32.xlu0 %v148_v24, %s4556_s21  ;;  %v157_v52 = vsel %vm156_vm1, %v154_v33, %v155_v49  ;;  %v4732_v54 = vand.u32 15, %v52_v50  ;;  %v177_v56 = vsel %vm5835_vm4, %v172_v46, %v169_v16  ;;  %v123_v57 = vsel %vm122_vm0, %v120_v42, %v121_v5  ;;  %v329_v5 = vld [vmem:[#allocation2] sm:$0xff] }
  0x1e   :  { %225 = vrot.lane.b32.xlu1 %v142_v25, %s4556_s21  ;;  %v191_v55 = vsel %vm5831_vm6, %v188_v37, %v189_v51  ;;  %v160_v59 = vsel %vm156_vm1, %v155_v49, %v152_v7  ;;  %v194_v61 = vsel %vm5831_vm6, %v189_v51, %v186_v22  ;;  %365 = vmatpush.msra.mxu0 %v329_v5  ;;  %v104_v11 = vrot.slane %v4601_v1, 5 }
  0x1f   :  { %vm5833_vm12 = vcmp.lt.s32.totalorder %v4732_v54, 14  ;;  %vm164_vm13 = vcmp.lt.s32.totalorder %v4732_v54, 15  ;;  %vm5829_vm14 = vcmp.lt.s32.totalorder %v4732_v54, 13  ;;  %v101_v12 = vrot.slane %v4596_v0, 5 }
  0x20   :  { %v185_v58 = vsel %vm5833_vm12, %v177_v56, 0.0  ;;  %v168_v60 = vsel %vm164_vm13, %v160_v59, 0.0  ;;  %v202_v62 = vsel %vm5829_vm14, %v194_v61, 0.0  ;;  %vm105_vm14 = vcmp.lt.s32.totalorder %v4612_v6, 3 }
  0x21   :  { %vm5838_vm10 = vcmp.ge.s32.totalorder %v4617_v9, 3  ;;  %v109_v15 = vsel %vm105_vm14, %v104_v11, %v101_v12  ;;  %vm299_vm6 = vcmask 31744   ;;  %vm304_vm15 = vcmask 64512  }
  0x22   :  { %v114_v16 = vsel %vm5838_vm10, %v109_v15, 0.0  ;;  %vm309_vm12 = vcmask 97280   ;;  %vm314_vm7 = vcmask 130048   ;;  %vm319_vm4 = vcmask 162816  }
  0x23   :  { %vm324_vm11 = vcmask 195584   ;;  %vm333_vm2 = vcmask 228352   ;;  %v102_v23 = vrot.slane %v4606_v3, 5  ;;  %vm5839_vm10 = vcmp.ge.s32.totalorder %v4684_v35, 3 }
  0x24   :  { %241 = vrot.lane.b32.xlu2 %v4606_v3, %s4558_s27  ;;  %v103_v3 = vrot.slane %v4655_v21, 5 }
  0x25   :  { %209 = vrot.lane.b32.xlu0 %v125_v32, %s4559_s28  ;;  %v108_v27 = vsel %vm105_vm14, %v101_v12, %v102_v23 }
  0x26   :  { %273 = vrot.lane.b32.xlu1 %v183_v34, %s4561_s30  ;;  %v107_v41 = vsel %vm105_vm14, %v102_v23, %v103_v3 }
  0x27   :  { %v116_v42 = vsel %vm5839_vm10, %v107_v41, 0.0  ;;  %vm379_vm10 = vcmask 523264  }
  0x2c   :  { %289 = vrot.lane.b32.xlu2 %v200_v44, %s4562_s6 }
  0x2d   :  { %257 = vrot.lane.b32.xlu0 %v166_v40, %s4560_s29 }
  0x2e   :  { %227 = vrot.lane.b32.xlu1 %v150_v43, %s4556_s21 }
  0x34   :  { %243 = vrot.lane.b32.xlu2 %v4655_v21, %s4558_s27 }
  0x35   :  { %211 = vrot.lane.b32.xlu0 %v133_v47, %s4559_s28 }
  0x36   :  { %275 = vrot.lane.b32.xlu1 %v174_v48, %s4561_s30 }
  0x3c   :  { %291 = vrot.lane.b32.xlu2 %v191_v55, %s4562_s6  ;;  %v106_v55 = vsel %vm105_vm14, %v103_v3, %v104_v11 }
  0x3d   :  { %259 = vrot.lane.b32.xlu0 %v157_v52, %s4560_s29 }
  0x3e   :  { %229 = vrot.lane.b32.xlu1 %v140_v53, %s4556_s21 }
  0x44   :  { %245 = vrot.lane.b32.xlu2 %v4601_v1, %s4558_s27 }
  0x45   :  { %213 = vrot.lane.b32.xlu0 %v123_v57, %s4559_s28 }
  0x46   :  { %277 = vrot.lane.b32.xlu1 %v185_v58, %s4561_s30 }
  0x4c   :  { %293 = vrot.lane.b32.xlu2 %v202_v62, %s4562_s6 }
  0x4d   :  { %261 = vrot.lane.b32.xlu0 %v168_v60, %s4560_s29 }
  0x6e   :  { %v272_v7 = vpop.permute.xlu2 %271 }
  0x76   :  { %v288_v10 = vpop.permute.xlu2 %287 }
  0x7e   :  { %v242_v17 = vpop.permute.xlu2 %241 }
  0x80   :  { %v240_v8 = vpop.permute.xlu1 %239 }
  0x86   :  { %v290_v29 = vpop.permute.xlu2 %289 }
  0x87   :  { %v208_v13 = vpop.permute.xlu0 %207 }
  0x88   :  { %v256_v14 = vpop.permute.xlu1 %255  ;;  %v300_v1 = vsel %vm299_vm6, %v114_v16, %v208_v13 }
  0x8e   :  { %v244_v39 = vpop.permute.xlu2 %243 }
  0x8f   :  { %v224_v18 = vpop.permute.xlu0 %223 }
  0x90   :  { %v305_v0 = vsel %vm304_vm15, %v300_v1, %v224_v18  ;;  %v226_v19 = vpop.permute.xlu1 %225 }
  0x91   :  { %v310_v20 = vsel %vm309_vm12, %v305_v0, %v240_v8 }
  0x92   :  { %v315_v22 = vsel %vm314_vm7, %v310_v20, %v256_v14 }
  0x93   :  { %v320_v24 = vsel %vm319_vm4, %v315_v22, %v272_v7 }
  0x94   :  { %v325_v25 = vsel %vm324_vm11, %v320_v24, %v288_v10 }
  0x95   :  { %4230 = vmatmul.msk.f32.vlgmr.msra.gmra.mxu0 %vm333_vm2, %v325_v25 }
  0x96   :  { %v292_v45 = vpop.permute.xlu2 %291 }
  0x97   :  { %v210_v28 = vpop.permute.xlu0 %209 }
  0x98   :  { %v274_v30 = vpop.permute.xlu1 %273  ;;  %v301_v31 = vsel %vm299_vm6, %v108_v27, %v210_v28 }
  0x99   :  { %v306_v32 = vsel %vm304_vm15, %v301_v31, %v226_v19 }
  0x9a   :  { %v311_v33 = vsel %vm309_vm12, %v306_v32, %v242_v17 }
  0x9e   :  { %v246_v53 = vpop.permute.xlu2 %245 }
  0x9f   :  { %v258_v34 = vpop.permute.xlu0 %257 }
  0xa0   :  { %v316_v36 = vsel %vm314_vm7, %v311_v33, %v258_v34  ;;  %v228_v37 = vpop.permute.xlu1 %227 }
  0xa1   :  { %v321_v38 = vsel %vm319_vm4, %v316_v36, %v274_v30 }
  0xa2   :  { %v326_v40 = vsel %vm324_vm11, %v321_v38, %v290_v29 }
  0xa3   :  { %4231 = vmatmul.msk.f32.gmra.mxu0 %vm333_vm2, %v326_v40 }
  0xa6   :  { %v294_v62 = vpop.permute.xlu2 %293 }
  0xa7   :  { %v212_v43 = vpop.permute.xlu0 %211 }
  0xa8   :  { %v302_v21 = vsel %vm299_vm6, %v116_v42, %v212_v43  ;;  %v276_v44 = vpop.permute.xlu1 %275 }
  0xa9   :  { %v307_v46 = vsel %vm304_vm15, %v302_v21, %v228_v37 }
  0xaa   :  { %v312_v47 = vsel %vm309_vm12, %v307_v46, %v244_v39 }
  0xaf   :  { %v260_v48 = vpop.permute.xlu0 %259 }
  0xb0   :  { %v317_v49 = vsel %vm314_vm7, %v312_v47, %v260_v48  ;;  %v230_v52 = vpop.permute.xlu1 %229 }
  0xb1   :  { %v322_v50 = vsel %vm319_vm4, %v317_v49, %v276_v44 }
  0xb2   :  { %v327_v51 = vsel %vm324_vm11, %v322_v50, %v292_v45 }
  0xb3   :  { %4232 = vmatmul.msk.f32.gmra.mxu0 %vm333_vm2, %v327_v51 }
  0xb7   :  { %v214_v56 = vpop.permute.xlu0 %213 }
  0xb8   :  { %v303_v57 = vsel %vm299_vm6, %v106_v55, %v214_v56  ;;  %v278_v59 = vpop.permute.xlu1 %277  ;;  %v547_v55 = vld [vmem:[#allocation2 + $0xa8] sm:$0xff]  ;;  %v546_v56 = vld [vmem:[#allocation2 + $0xa0] sm:$0xff] }
  0xb9   :  { %v308_v58 = vsel %vm304_vm15, %v303_v57, %v230_v52  ;;  %584 = vmatpush.msra.mxu3 %v547_v55  ;;  %v534_v55 = vld [vmem:[#allocation2 + $0x40] sm:$0xff]  ;;  %vm5841_vm15 = vcmp.ge.s32.totalorder %v4684_v35, 2 }
  0xba   :  { %v313_v60 = vsel %vm309_vm12, %v308_v58, %v246_v53  ;;  %v427_v53 = vld [vmem:[#allocation2 + $0x20] sm:$0x1]  ;;  %vm5840_vm12 = vcmp.ge.s32.totalorder %v4617_v9, 2 }
  0xbb   :  { %585 = vmatpush.msra.mxu3 %v546_v56  ;;  %v553_v56 = vld [vmem:[#allocation2 + $0xd8] sm:$0xff] }
  0xbf   :  { %v262_v61 = vpop.permute.xlu0 %261 }
  0xc0   :  { %v318_v63 = vsel %vm314_vm7, %v313_v60, %v262_v61  ;;  %v4448_v61 = vld [vmem:[#allocation2 + $0x28] ss:$0 sm:$0xff] }
  0xc1   :  { %v323_v2 = vsel %vm319_vm4, %v318_v63, %v278_v59  ;;  %v545_v59 = vld [vmem:[#allocation2 + $0x98] sm:$0xff] }
  0xc2   :  { %v328_v4 = vsel %vm324_vm11, %v323_v2, %v294_v62  ;;  %586 = vmatpush.msra.mxu3 %v545_v59  ;;  %v532_v59 = vld [vmem:[#allocation2 + $0x30] sm:$0xff] }
  0xc3   :  { %4233 = vmatmul.msk.f32.gmra.mxu0 %vm333_vm2, %v328_v4 }
 0x112   :  { %v367_v5 = vpop.f32.mrf.mxu0 }
 0x113   :  { %v380_v11 = vsel %vm379_vm10, %v367_v5, 0.0 }
 0x120   :  { %v370_v7 = vpop.f32.mrf.mxu0 }
 0x121   :  { %v381_v10 = vsel %vm379_vm10, %v370_v7, 0.0 }
 0x122   :  { %v382_v13 = vadd.f32 %v381_v10, %v380_v11 }
 0x130   :  { %v373_v8 = vpop.f32.mrf.mxu0 }
 0x131   :  { %v383_v12 = vsel %vm379_vm10, %v373_v8, 0.0 }
 0x132   :  { %v384_v14 = vadd.f32 %v383_v12, %v382_v13 }
 0x140   :  { %v376_v15 = vpop.f32.mrf.mxu0 }
 0x141   :  { %v385_v16 = vsel %vm379_vm10, %v376_v15, 0.0 }
 0x142   :  { %v386_v17 = vadd.f32 %v385_v16, %v384_v14 }
 0x144   :  { %v387_v1 = vrot.slane %v386_v17, 4 }
 0x146   :  { %v388_v18 = vadd.f32 %v387_v1, %v386_v17 }
 0x148   :  { %v389_v0 = vrot.slane %v388_v18, 2 }
 0x14a   :  { %v390_v19 = vadd.f32 %v389_v0, %v388_v18 }
 0x14c   :  { %v391_v20 = vrot.slane %v390_v19, 1 }
 0x14e   :  { %v392_v22 = vadd.f32 %v391_v20, %v390_v19 }
 0x150   :  { %v393_v23 = vmul.f32 0.03125, %v392_v22 }
 0x152   :  { %v394_v24 = vsub.f32 %v367_v5, %v393_v23  ;;  %v395_v25 = vsub.f32 %v370_v7, %v393_v23  ;;  %v396_v27 = vsub.f32 %v373_v8, %v393_v23  ;;  %v397_v28 = vsub.f32 %v376_v15, %v393_v23 }
 0x154   :  { %v398_v29 = vmul.f32 %v394_v24, %v394_v24  ;;  %v399_v30 = vmul.f32 %v395_v25, %v395_v25  ;;  %v400_v31 = vmul.f32 %v396_v27, %v396_v27  ;;  %v401_v32 = vmul.f32 %v397_v28, %v397_v28 }
 0x156   :  { %v402_v33 = vsel %vm379_vm10, %v398_v29, 0.0  ;;  %v403_v34 = vsel %vm379_vm10, %v399_v30, 0.0  ;;  %v405_v36 = vsel %vm379_vm10, %v400_v31, 0.0  ;;  %v407_v38 = vsel %vm379_vm10, %v401_v32, 0.0 }
 0x157   :  { %v404_v3 = vadd.f32 %v403_v34, %v402_v33 }
 0x159   :  { %v406_v37 = vadd.f32 %v405_v36, %v404_v3  ;;  %v544_v3 = vld [vmem:[#allocation2 + $0x90] sm:$0xff]  ;;  %v563_v36 = vld [vmem:[#allocation2 + $0x128] sm:$0xff] }
 0x15a   :  { %587 = vmatpush.msra.mxu3 %v544_v3  ;;  %613 = vmatpush.msrb.mxu0 %v563_v36 }
 0x15b   :  { %v408_v39 = vadd.f32 %v407_v38, %v406_v37  ;;  %v543_v37 = vld [vmem:[#allocation2 + $0x88] sm:$0xff]  ;;  %v562_v38 = vld [vmem:[#allocation2 + $0x120] sm:$0xff] }
 0x15c   :  { %588 = vmatpush.msra.mxu3 %v543_v37  ;;  %614 = vmatpush.msrb.mxu0 %v562_v38 }
 0x15d   :  { %v409_v40 = vrot.slane %v408_v39, 4 }
 0x15f   :  { %v410_v41 = vadd.f32 %v409_v40, %v408_v39  ;;  %v542_v39 = vld [vmem:[#allocation2 + $0x80] sm:$0xff]  ;;  %v561_v40 = vld [vmem:[#allocation2 + $0x118] sm:$0xff] }
 0x160   :  { %589 = vmatpush.msra.mxu3 %v542_v39  ;;  %615 = vmatpush.msrb.mxu0 %v561_v40 }
 0x161   :  { %v411_v42 = vrot.slane %v410_v41, 2 }
 0x163   :  { %v412_v43 = vadd.f32 %v411_v42, %v410_v41  ;;  %v541_v41 = vld [vmem:[#allocation2 + $0x78] sm:$0xff]  ;;  %v560_v42 = vld [vmem:[#allocation2 + $0x110] sm:$0xff] }
 0x164   :  { %590 = vmatpush.msra.mxu3 %v541_v41  ;;  %616 = vmatpush.msrb.mxu0 %v560_v42 }
 0x165   :  { %v413_v21 = vrot.slane %v412_v43, 1 }
 0x167   :  { %v414_v44 = vadd.f32 %v413_v21, %v412_v43  ;;  %v540_v43 = vld [vmem:[#allocation2 + $0x70] sm:$0xff]  ;;  %v559_v21 = vld [vmem:[#allocation2 + $0x108] sm:$0xff] }
 0x168   :  { %591 = vmatpush.msra.mxu3 %v540_v43  ;;  %617 = vmatpush.msrb.mxu0 %v559_v21 }
 0x169   :  { %v415_v45 = vmul.f32 0.03125, %v414_v44  ;;  %v539_v44 = vld [vmem:[#allocation2 + $0x68] sm:$0xff] }
 0x16a   :  { %592 = vmatpush.msra.mxu3 %v539_v44 }
 0x16b   :  { %v416_v46 = vadd.f32 1e-05, %v415_v45  ;;  %v558_v45 = vld [vmem:[#allocation2 + $0x100] sm:$0xff] }
 0x16c   :  { %618 = vmatpush.msrb.mxu0 %v558_v45 }
 0x16d   :  { %4460 = vrsqrt.f32 %v416_v46  ;;  %vm423_vm4 = vweird.f32 %v416_v46 }
 0x173   :  { %v4461_v47 = vpop.eup %4460 }
 0x174   :  { %v418_v48 = vmul.f32 %v4461_v47, %v416_v46  ;;  %vm424_vm2 = vweird.f32 %v4461_v47  ;;  %v538_v46 = vld [vmem:[#allocation2 + $0x60] sm:$0xff] }
 0x175   :  { %vm425_vm11 = vmor %vm423_vm4, %vm424_vm2  ;;  %593 = vmatpush.msra.mxu3 %v538_v46  ;;  %vm5842_vm2 = vcmp.lt.s32.totalorder %v4612_v6, 6 }
 0x176   :  { %v419_v49 = vmul.f32 %v4461_v47, %v418_v48  ;;  %v537_v48 = vld [vmem:[#allocation2 + $0x58] sm:$0xff]  ;;  %vm5843_vm4 = vmmov %vm5842_vm2 }
 0x177   :  { %594 = vmatpush.msra.mxu3 %v537_v48 }
 0x178   :  { %v420_v50 = vmul.f32 0.5, %v419_v49  ;;  %v556_v49 = vld [vmem:[#allocation2 + $0xf0] sm:$0xff] }
 0x17a   :  { %v421_v51 = vsub.f32 1.5, %v420_v50  ;;  %v536_v50 = vld [vmem:[#allocation2 + $0x50] sm:$0xff] }
 0x17b   :  { %595 = vmatpush.msra.mxu3 %v536_v50 }
 0x17c   :  { %v422_v52 = vmul.f32 %v4461_v47, %v421_v51  ;;  %v555_v51 = vld [vmem:[#allocation2 + $0xe8] sm:$0xff] }
 0x17e   :  { %v426_v57 = vsel %vm425_vm11, %v4461_v47, %v422_v52  ;;  %v557_v47 = vld [vmem:[#allocation2 + $0xf8] sm:$0xff]  ;;  %v535_v52 = vld [vmem:[#allocation2 + $0x48] sm:$0xff]  ;;  %vm5844_vm11 = vcmp.lt.s32.totalorder %v4664_v26, 14 }
 0x17f   :  { %v428_v58 = vmul.f32 %v427_v53, %v426_v57  ;;  %619 = vmatpush.msrb.mxu0 %v557_v47  ;;  %v554_v53 = vld [vmem:[#allocation2 + $0xe0] sm:$0xff]  ;;  %596 = vmatpush.msra.mxu3 %v535_v52  ;;  %v533_v57 = vld [vmem:[#allocation2 + $0x38] sm:$0xff] }
 0x181   :  { %v429_v60 = vperm.slane %v428_v58, 0  ;;  %620 = vmatpush.msrb.mxu0 %v556_v49  ;;  %597 = vmatpush.msra.mxu3 %v534_v55  ;;  %v552_v58 = vld [vmem:[#allocation2 + $0xd0] sm:$0xff] }
 0x183   :  { %v430_v62 = vmul.f32 %v429_v60, %v394_v24  ;;  %v431_v63 = vmul.f32 %v429_v60, %v395_v25  ;;  %v432_v2 = vmul.f32 %v429_v60, %v396_v27  ;;  %v433_v4 = vmul.f32 %v429_v60, %v397_v28  ;;  %621 = vmatpush.msrb.mxu0 %v555_v51  ;;  %v551_v60 = vld [vmem:[#allocation2 + $0xc8] sm:$0xff] }
 0x184   :  { %598 = vmatpush.msra.mxu3 %v533_v57 }
 0x185   :  { %v438_v5 = vadd.f32 %v4448_v61, %v432_v2  ;;  %v439_v7 = vadd.f32 %v4448_v61, %v433_v4  ;;  %v436_v8 = vadd.f32 %v4448_v61, %v430_v62  ;;  %v437_v10 = vadd.f32 %v4448_v61, %v431_v63  ;;  %622 = vmatpush.msrb.mxu0 %v554_v53  ;;  %v550_v61 = vld [vmem:[#allocation2 + $0xc0] sm:$0xff]  ;;  %v549_v62 = vld [vmem:[#allocation2 + $0xb8] sm:$0xff]  ;;  %v548_v63 = vld [vmem:[#allocation2 + $0xb0] sm:$0xff] }
 0x186   :  { %599 = vmatpush.msra.mxu3 %v532_v59  ;;  %v571_v2 = vld [vmem:[#allocation2 + $0x168] sm:$0xff]  ;;  %v570_v4 = vld [vmem:[#allocation2 + $0x160] sm:$0xff] }
 0x187   :  { %v4826_v11 = vmax.f32 %v439_v7, 0.0  ;;  %v4828_v12 = vmax.f32 %v436_v8, 0.0  ;;  %v4830_v13 = vmax.f32 %v437_v10, 0.0  ;;  %v4832_v14 = vmax.f32 %v438_v5, 0.0  ;;  %623 = vmatpush.msrb.mxu0 %v553_v56  ;;  %v569_v5 = vld [vmem:[#allocation2 + $0x158] sm:$0xff]  ;;  %v568_v10 = vld [vmem:[#allocation2 + $0x150] sm:$0xff] }
 0x188   :  { %650 = vmatpush.msrb.mxu3 %v571_v2 }
 0x189   :  { %v456_v15 = vrot.slane %v4828_v12, 7  ;;  %v457_v16 = vrot.slane %v4830_v13, 7  ;;  %v458_v17 = vrot.slane %v4832_v14, 7  ;;  %v459_v1 = vrot.slane %v4826_v11, 7  ;;  %624 = vmatpush.msrb.mxu0 %v552_v58 }
 0x18a   :  { %v469_v23 = vrot.slane %v4830_v13, 1  ;;  %v470_v24 = vrot.slane %v4832_v14, 1  ;;  %v468_v25 = vrot.slane %v4828_v12, 1  ;;  %v471_v31 = vrot.slane %v4826_v11, 1  ;;  %651 = vmatpush.msrb.mxu3 %v570_v4 }
 0x18b   :  { %v462_v18 = vsel %vm139_vm3, %v456_v15, %v457_v16  ;;  %v461_v0 = vsel %vm139_vm3, %v457_v16, %v458_v17  ;;  %v463_v19 = vsel %vm139_vm3, %v459_v1, %v456_v15  ;;  %v460_v30 = vsel %vm139_vm3, %v458_v17, %v459_v1  ;;  %625 = vmatpush.msrb.mxu0 %v551_v60  ;;  %v567_v15 = vld [vmem:[#allocation2 + $0x148] sm:$0xff]  ;;  %v566_v16 = vld [vmem:[#allocation2 + $0x140] sm:$0xff]  ;;  %v565_v1 = vld [vmem:[#allocation2 + $0x138] sm:$0xff] }
 0x18c   :  { %498 = vrot.lane.b32.xlu1 %v462_v18, %s4563_s7  ;;  %v466_v20 = vsel %vm146_vm9, %v461_v0, 0.0  ;;  %v464_v22 = vsel %vm144_vm5, %v463_v19, 0.0  ;;  %v473_v27 = vsel %vm156_vm1, %v469_v23, %v470_v24  ;;  %v474_v28 = vsel %vm156_vm1, %v468_v25, %v469_v23  ;;  %652 = vmatpush.msrb.mxu3 %v569_v5 }
 0x18d   :  { %500 = vrot.lane.b32.xlu2 %v466_v20, %s4563_s7  ;;  %496 = vrot.lane.b32.xlu0 %v464_v22, %s4563_s7  ;;  %v477_v29 = vsel %vm162_vm8, %v473_v27, 0.0  ;;  %v475_v32 = vsel %vm156_vm1, %v471_v31, %v468_v25  ;;  %v472_v34 = vsel %vm156_vm1, %v470_v24, %v471_v31  ;;  %v444_v7 = vrot.slane %v4828_v12, 6  ;;  %v564_v22 = vld [vmem:[#allocation2 + $0x130] sm:$0xff] }
 0x18e   :  { %v479_v33 = vsel %vm164_vm13, %v475_v32, 0.0  ;;  %626 = vmatpush.msrb.mxu0 %v550_v61  ;;  %v447_v8 = vrot.slane %v4826_v11, 6  ;;  %653 = vmatpush.msrb.mxu3 %v568_v10  ;;  %v445_v24 = vrot.slane %v4830_v13, 6  ;;  %v480_v42 = vrot.slane %v4828_v12, 2 }
 0x18f   :  { %v481_v43 = vrot.slane %v4830_v13, 2  ;;  %v482_v45 = vrot.slane %v4832_v14, 2 }
 0x190   :  { %627 = vmatpush.msrb.mxu0 %v549_v62  ;;  %654 = vmatpush.msrb.mxu3 %v567_v15  ;;  %v451_v17 = vsel %vm122_vm0, %v447_v8, %v444_v7 }
 0x191   :  { %v452_v19 = vsel %vm5840_vm12, %v451_v17, 0.0  ;;  %v486_v44 = vsel %vm5842_vm2, %v480_v42, %v481_v43  ;;  %v485_v46 = vsel %vm5843_vm4, %v481_v43, %v482_v45  ;;  %vm5845_vm12 = vmmov %vm5842_vm2 }
 0x192   :  { %628 = vmatpush.msrb.mxu0 %v548_v63  ;;  %655 = vmatpush.msrb.mxu3 %v566_v16  ;;  %v489_v47 = vsel %vm5844_vm11, %v485_v46, 0.0  ;;  %v802_v46 = vld [vmem:[#allocation2 + $0x238] sm:$0xff] }
 0x194   :  { %512 = vrot.lane.b32.xlu1 %v474_v28, %s4563_s7  ;;  %656 = vmatpush.msrb.mxu3 %v565_v1  ;;  %v450_v28 = vsel %vm122_vm0, %v444_v7, %v445_v24 }
 0x195   :  { %514 = vrot.lane.b32.xlu2 %v477_v29, %s4563_s7  ;;  %502 = vrot.lane.b32.xlu0 %v460_v30, %s4563_s7  ;;  %v446_v30 = vrot.slane %v4832_v14, 6 }
 0x196   :  { %657 = vmatpush.msrb.mxu3 %v564_v22 }
 0x197   :  { %v448_v39 = vsel %vm122_vm0, %v446_v30, %v447_v8 }
 0x19c   :  { %518 = vrot.lane.b32.xlu1 %v479_v33, %s4563_s7  ;;  %v449_v33 = vsel %vm122_vm0, %v445_v24, %v446_v30 }
 0x19d   :  { %516 = vrot.lane.b32.xlu0 %v472_v34, %s4563_s7  ;;  %v454_v3 = vsel %vm5841_vm15, %v449_v33, 0.0  ;;  %vm5846_vm15 = vmmov %vm5842_vm2  ;;  %vm5847_vm2 = vcmp.lt.s32.totalorder %v4732_v54, 14 }
 0x1e7   :  { %v501_v23 = vpop.permute.xlu2 %500 }
 0x1e8   :  { %v526_v36 = vsel %vm379_vm10, %v454_v3, %v501_v23 }
 0x1ef   :  { %v515_v32 = vpop.permute.xlu2 %514 }
 0x1f0   :  { %v529_v34 = vsel %vm379_vm10, %v4830_v13, %v515_v32 }
 0x1fe   :  { %v499_v18 = vpop.permute.xlu1 %498 }
 0x1ff   :  { %v497_v0 = vpop.permute.xlu0 %496  ;;  %v525_v29 = vsel %vm379_vm10, %v450_v28, %v499_v18 }
 0x200   :  { %v524_v20 = vsel %vm379_vm10, %v452_v19, %v497_v0 }
 0x201   :  { %600 = vmatmul.f32.vlgmr.msra.gmra.mxu3 %v524_v20 }
 0x202   :  { %852 = vmatpush.msra.mxu3 %v802_v46 }
 0x206   :  { %v513_v25 = vpop.permute.xlu1 %512 }
 0x207   :  { %v528_v27 = vsel %vm379_vm10, %v4828_v12, %v513_v25  ;;  %v503_v31 = vpop.permute.xlu0 %502  ;;  %v483_v12 = vrot.slane %v4826_v11, 2 }
 0x208   :  { %629 = vmatmul.f32.vlgmr.msrb.gmra.mxu0 %v528_v27  ;;  %v527_v40 = vsel %vm379_vm10, %v448_v39, %v503_v31 }
 0x209   :  { %603 = vmatmul.f32.gmra.mxu3 %v525_v29  ;;  %v484_v13 = vsel %vm5845_vm12, %v482_v45, %v483_v12  ;;  %v487_v48 = vsel %vm5846_vm15, %v483_v12, %v480_v42 }
 0x20e   :  { %v519_v41 = vpop.permute.xlu1 %518 }
 0x20f   :  { %v517_v37 = vpop.permute.xlu0 %516  ;;  %v531_v21 = vsel %vm379_vm10, %v4826_v11, %v519_v41 }
 0x210   :  { %632 = vmatmul.f32.gmra.mxu0 %v529_v34  ;;  %v530_v38 = vsel %vm379_vm10, %v4832_v14, %v517_v37  ;;  %v491_v14 = vsel %vm5847_vm2, %v487_v48, 0.0 }
 0x211   :  { %606 = vmatmul.f32.gmra.mxu3 %v526_v36 }
 0x218   :  { %635 = vmatmul.f32.gmra.mxu0 %v530_v38 }
 0x219   :  { %609 = vmatmul.f32.gmra.mxu3 %v527_v40 }
 0x220   :  { %638 = vmatmul.f32.gmra.mxu0 %v531_v21 }
 0x221   :  { %4234 = vmatmul.msk.f32.vlgmr.msrb.gmra.mxu3 %vm379_vm10, %v486_v44 }
 0x229   :  { %4235 = vmatmul.msk.f32.gmra.mxu3 %vm379_vm10, %v489_v47  ;;  %v801_v47 = vld [vmem:[#allocation2 + $0x230] sm:$0xff] }
 0x22a   :  { %853 = vmatpush.msra.mxu3 %v801_v47  ;;  %v784_v47 = vld [vmem:[#allocation2 + $0x1a8] sm:$0xff] }
 0x231   :  { %4236 = vmatmul.msk.f32.gmra.mxu3 %vm379_vm10, %v484_v13  ;;  %v800_v13 = vld [vmem:[#allocation2 + $0x228] sm:$0xff] }
 0x232   :  { %854 = vmatpush.msra.mxu3 %v800_v13 }
 0x239   :  { %4237 = vmatmul.msk.f32.gmra.mxu3 %vm379_vm10, %v491_v14  ;;  %v799_v14 = vld [vmem:[#allocation2 + $0x220] sm:$0xff] }
 0x23a   :  { %855 = vmatpush.msra.mxu3 %v799_v14  ;;  %v781_v14 = vld [vmem:[#allocation2 + $0x190] sm:$0xff] }
 0x284   :  { %v601_v49 = vpop.f32.mrf.mxu3 }
 0x285   :  { %v630_v52 = vpop.f32.mrf.mxu0 }
 0x286   :  { %v631_v60 = vadd.f32 %v630_v52, %v601_v49  ;;  %v797_v52 = vld [vmem:[#allocation2 + $0x210] sm:$0xff] }
 0x28c   :  { %v604_v50 = vpop.f32.mrf.mxu3 }
 0x28d   :  { %v633_v55 = vpop.f32.mrf.mxu0 }
 0x28e   :  { %v634_v58 = vadd.f32 %v633_v55, %v604_v50  ;;  %v798_v50 = vld [vmem:[#allocation2 + $0x218] sm:$0xff]  ;;  %v795_v55 = vld [vmem:[#allocation2 + $0x200] sm:$0xff] }
 0x28f   :  { %856 = vmatpush.msra.mxu3 %v798_v50 }
 0x291   :  { %857 = vmatpush.msra.mxu3 %v797_v52  ;;  %v779_v52 = vld [vmem:[#allocation2 + $0x180] sm:$0xff] }
 0x294   :  { %v607_v51 = vpop.f32.mrf.mxu3 }
 0x295   :  { %v636_v57 = vpop.f32.mrf.mxu0 }
 0x296   :  { %v637_v61 = vadd.f32 %v636_v57, %v607_v51 }
 0x29c   :  { %v610_v53 = vpop.f32.mrf.mxu3 }
 0x29d   :  { %v639_v4 = vpop.f32.mrf.mxu0 }
 0x29e   :  { %v640_v7 = vadd.f32 %v639_v4, %v610_v53  ;;  %v796_v53 = vld [vmem:[#allocation2 + $0x208] sm:$0xff]  ;;  %v4449_v4 = vld [vmem:[#allocation2 + $0x178] ss:$0 sm:$0xff] }
 0x29f   :  { %858 = vmatpush.msra.mxu3 %v796_v53 }
 0x2a1   :  { %859 = vmatpush.msra.mxu3 %v795_v55 }
 0x2a4   :  { %v659_v11 = vpop.f32.mrf.mxu3 }
 0x2a5   :  { %v660_v63 = vadd.f32 %v659_v11, %v631_v60 }
 0x2a7   :  { %v671_v8 = vsel %vm379_vm10, %v660_v63, 0.0 }
 0x2ac   :  { %v662_v56 = vpop.f32.mrf.mxu3 }
 0x2ad   :  { %v663_v62 = vadd.f32 %v662_v56, %v634_v58 }
 0x2af   :  { %v672_v5 = vsel %vm379_vm10, %v663_v62, 0.0 }
 0x2b0   :  { %v673_v15 = vadd.f32 %v672_v5, %v671_v8 }
 0x2b4   :  { %v665_v59 = vpop.f32.mrf.mxu3 }
 0x2b5   :  { %v666_v2 = vadd.f32 %v665_v59, %v637_v61  ;;  %v718_v61 = vld [vmem:[#allocation2 + $0x170] sm:$0x1] }
 0x2b7   :  { %v674_v10 = vsel %vm379_vm10, %v666_v2, 0.0 }
 0x2b8   :  { %v675_v1 = vadd.f32 %v674_v10, %v673_v15  ;;  %v794_v15 = vld [vmem:[#allocation2 + $0x1f8] sm:$0xff] }
 0x2b9   :  { %815 = vmatpush.msra.mxu0 %v794_v15 }
 0x2bc   :  { %v668_v16 = vpop.f32.mrf.mxu3 }
 0x2bd   :  { %v669_v17 = vadd.f32 %v668_v16, %v640_v7  ;;  %v793_v16 = vld [vmem:[#allocation2 + $0x1f0] sm:$0xff] }
 0x2be   :  { %816 = vmatpush.msra.mxu0 %v793_v16 }
 0x2bf   :  { %v676_v18 = vsel %vm379_vm10, %v669_v17, 0.0 }
 0x2c0   :  { %v677_v0 = vadd.f32 %v676_v18, %v675_v1 }
 0x2c2   :  { %v678_v19 = vrot.slane %v677_v0, 4 }
 0x2c4   :  { %v679_v20 = vadd.f32 %v678_v19, %v677_v0 }
 0x2c6   :  { %v680_v22 = vrot.slane %v679_v20, 2 }
 0x2c8   :  { %v681_v23 = vadd.f32 %v680_v22, %v679_v20 }
 0x2ca   :  { %v682_v24 = vrot.slane %v681_v23, 1 }
 0x2cc   :  { %v683_v25 = vadd.f32 %v682_v24, %v681_v23  ;;  %v792_v24 = vld [vmem:[#allocation2 + $0x1e8] sm:$0xff] }
 0x2cd   :  { %817 = vmatpush.msra.mxu0 %v792_v24 }
 0x2ce   :  { %v684_v27 = vmul.f32 0.03125, %v683_v25 }
 0x2d0   :  { %v685_v28 = vsub.f32 %v660_v63, %v684_v27  ;;  %v686_v29 = vsub.f32 %v663_v62, %v684_v27  ;;  %v687_v30 = vsub.f32 %v666_v2, %v684_v27  ;;  %v688_v31 = vsub.f32 %v669_v17, %v684_v27 }
 0x2d2   :  { %v689_v32 = vmul.f32 %v685_v28, %v685_v28  ;;  %v690_v33 = vmul.f32 %v686_v29, %v686_v29  ;;  %v691_v34 = vmul.f32 %v687_v30, %v687_v30  ;;  %v692_v3 = vmul.f32 %v688_v31, %v688_v31 }
 0x2d4   :  { %v693_v36 = vsel %vm379_vm10, %v689_v32, 0.0  ;;  %v694_v37 = vsel %vm379_vm10, %v690_v33, 0.0  ;;  %v696_v39 = vsel %vm379_vm10, %v691_v34, 0.0  ;;  %v698_v41 = vsel %vm379_vm10, %v692_v3, 0.0  ;;  %v790_v34 = vld [vmem:[#allocation2 + $0x1d8] sm:$0xff] }
 0x2d5   :  { %v695_v38 = vadd.f32 %v694_v37, %v693_v36  ;;  %v789_v37 = vld [vmem:[#allocation2 + $0x1d0] sm:$0xff] }
 0x2d7   :  { %v697_v40 = vadd.f32 %v696_v39, %v695_v38 }
 0x2d9   :  { %v699_v42 = vadd.f32 %v698_v41, %v697_v40  ;;  %v788_v41 = vld [vmem:[#allocation2 + $0x1c8] sm:$0xff] }
 0x2db   :  { %v700_v43 = vrot.slane %v699_v42, 4 }
 0x2dd   :  { %v701_v21 = vadd.f32 %v700_v43, %v699_v42  ;;  %v787_v43 = vld [vmem:[#allocation2 + $0x1c0] sm:$0xff] }
 0x2df   :  { %v702_v44 = vrot.slane %v701_v21, 2 }
 0x2e1   :  { %v703_v45 = vadd.f32 %v702_v44, %v701_v21  ;;  %v786_v44 = vld [vmem:[#allocation2 + $0x1b8] sm:$0xff] }
 0x2e3   :  { %v704_v12 = vrot.slane %v703_v45, 1 }
 0x2e5   :  { %v705_v48 = vadd.f32 %v704_v12, %v703_v45  ;;  %v785_v45 = vld [vmem:[#allocation2 + $0x1b0] sm:$0xff]  ;;  %v783_v12 = vld [vmem:[#allocation2 + $0x1a0] sm:$0xff] }
 0x2e7   :  { %v706_v49 = vmul.f32 0.03125, %v705_v48  ;;  %v782_v48 = vld [vmem:[#allocation2 + $0x198] sm:$0xff] }
 0x2e9   :  { %v707_v51 = vadd.f32 1e-05, %v706_v49  ;;  %v780_v49 = vld [vmem:[#allocation2 + $0x188] sm:$0xff] }
 0x2eb   :  { %4462 = vrsqrt.f32 %v707_v51  ;;  %vm714_vm11 = vweird.f32 %v707_v51 }
 0x2f1   :  { %v4463_v11 = vpop.eup %4462 }
 0x2f2   :  { %v709_v56 = vmul.f32 %v4463_v11, %v707_v51  ;;  %vm715_vm4 = vweird.f32 %v4463_v11 }
 0x2f3   :  { %vm716_vm12 = vmor %vm714_vm11, %vm715_vm4  ;;  %vm5848_vm11 = vcmask 1043456  }
 0x2f4   :  { %v710_v57 = vmul.f32 %v4463_v11, %v709_v56 }
 0x2f6   :  { %v711_v58 = vmul.f32 0.5, %v710_v57 }
 0x2f8   :  { %v712_v59 = vsub.f32 1.5, %v711_v58 }
 0x2fa   :  { %v713_v60 = vmul.f32 %v4463_v11, %v712_v59 }
 0x2fc   :  { %v717_v62 = vsel %vm716_vm12, %v4463_v11, %v713_v60 }
 0x2fd   :  { %v719_v63 = vmul.f32 %v718_v61, %v717_v62 }
 0x2ff   :  { %v720_v2 = vperm.slane %v719_v63, 0 }
 0x301   :  { %v724_v5 = vmul.f32 %v720_v2, %v688_v31  ;;  %v723_v7 = vmul.f32 %v720_v2, %v687_v30  ;;  %v722_v8 = vmul.f32 %v720_v2, %v686_v29  ;;  %v721_v10 = vmul.f32 %v720_v2, %v685_v28  ;;  %v791_v30 = vld [vmem:[#allocation2 + $0x1e0] sm:$0xff] }
 0x302   :  { %818 = vmatpush.msra.mxu0 %v791_v30 }
 0x303   :  { %v729_v17 = vadd.f32 %v4449_v4, %v723_v7  ;;  %v728_v1 = vadd.f32 %v4449_v4, %v722_v8  ;;  %v727_v18 = vadd.f32 %v4449_v4, %v721_v10  ;;  %v730_v0 = vadd.f32 %v4449_v4, %v724_v5 }
 0x304   :  { %819 = vmatpush.msra.mxu0 %v790_v34 }
 0x305   :  { %v733_v19 = vmax.f32 %v729_v17, 0.0  ;;  %v732_v20 = vmax.f32 %v728_v1, 0.0  ;;  %v731_v22 = vmax.f32 %v727_v18, 0.0  ;;  %v734_v23 = vmax.f32 %v730_v0, 0.0 }
 0x306   :  { %820 = vmatpush.msra.mxu0 %v789_v37 }
 0x307   :  { %767 = vrot.lane.b32.xlu1 %v733_v19, %s4563_s7  ;;  %765 = vrot.lane.b32.xlu0 %v732_v20, %s4563_s7  ;;  %v748_v25 = vrot.slane %v732_v20, 1  ;;  %v735_v27 = vrot.slane %v731_v22, 7  ;;  %v747_v28 = vrot.slane %v731_v22, 1  ;;  %v738_v29 = vrot.slane %v734_v23, 7 }
 0x308   :  { %763 = vrot.lane.b32.xlu2 %v731_v22, %s4563_s7  ;;  %v736_v31 = vrot.slane %v732_v20, 7  ;;  %v737_v32 = vrot.slane %v733_v19, 7  ;;  %v749_v36 = vrot.slane %v733_v19, 1  ;;  %821 = vmatpush.msra.mxu0 %v788_v41  ;;  %v750_v46 = vrot.slane %v734_v23, 1 }
 0x309   :  { %v753_v33 = vsel %vm156_vm1, %v747_v28, %v748_v25  ;;  %v742_v3 = vsel %vm139_vm3, %v738_v29, %v735_v27 }
 0x30a   :  { %4238 = vmatmul.msk.f32.vlgmr.msra.gmra.mxu3 %vm379_vm10, %v753_v33  ;;  %v741_v38 = vsel %vm139_vm3, %v735_v27, %v736_v31  ;;  %v740_v39 = vsel %vm139_vm3, %v736_v31, %v737_v32  ;;  %v739_v40 = vsel %vm139_vm3, %v737_v32, %v738_v29  ;;  %v752_v42 = vsel %vm156_vm1, %v748_v25, %v749_v36 }
 0x30b   :  { %v756_v21 = vsel %vm162_vm8, %v752_v42, 0.0  ;;  %822 = vmatpush.msra.mxu0 %v787_v43  ;;  %v751_v13 = vsel %vm156_vm1, %v749_v36, %v750_v46  ;;  %v754_v50 = vsel %vm156_vm1, %v750_v46, %v747_v28  ;;  %v743_v55 = vsel %vm144_vm5, %v742_v3, 0.0 }
 0x30c   :  { %v758_v51 = vsel %vm164_vm13, %v754_v50, 0.0  ;;  %v745_v59 = vsel %vm146_vm9, %v740_v39, 0.0  ;;  %v1040_v50 = vld [vmem:[#allocation2 + $0x278] sm:$0xff] }
 0x30d   :  { %823 = vmatpush.msra.mxu0 %v786_v44 }
 0x30f   :  { %824 = vmatpush.msra.mxu0 %v785_v45 }
 0x310   :  { %769 = vrot.lane.b32.xlu2 %v734_v23, %s4563_s7 }
 0x311   :  { %825 = vmatpush.msra.mxu0 %v784_v47 }
 0x312   :  { %4239 = vmatmul.msk.f32.gmra.mxu3 %vm379_vm10, %v756_v21 }
 0x313   :  { %826 = vmatpush.msra.mxu0 %v783_v12 }
 0x315   :  { %827 = vmatpush.msra.mxu0 %v782_v48 }
 0x317   :  { %828 = vmatpush.msra.mxu0 %v781_v14  ;;  %v1041_v14 = vld [vmem:[#allocation2 + $0x280] sm:$0xff] }
 0x319   :  { %829 = vmatpush.msra.mxu0 %v780_v49 }
 0x31a   :  { %4240 = vmatmul.msk.f32.gmra.mxu3 %vm379_vm10, %v751_v13  ;;  %v1042_v13 = vld [vmem:[#allocation2 + $0x288] sm:$0xff] }
 0x31b   :  { %830 = vmatpush.msra.mxu0 %v779_v52  ;;  %4381 = vmatpush.msra.mxu2 %v1042_v13  ;;  %v1039_v52 = vld [vmem:[#allocation2 + $0x270] sm:$0xff] }
 0x31d   :  { %1063 = vmatpush.msrb.mxu0 %v1042_v13  ;;  %4382 = vmatpush.msra.mxu2 %v1041_v14 }
 0x31f   :  { %1064 = vmatpush.msrb.mxu0 %v1041_v14  ;;  %4383 = vmatpush.msra.mxu2 %v1040_v50 }
 0x321   :  { %1065 = vmatpush.msrb.mxu0 %v1040_v50  ;;  %4384 = vmatpush.msra.mxu2 %v1039_v52 }
 0x322   :  { %4241 = vmatmul.msk.f32.gmra.mxu3 %vm379_vm10, %v758_v51 }
 0x323   :  { %1066 = vmatpush.msrb.mxu0 %v1039_v52 }
 0x362   :  { %v764_v53 = vpop.permute.xlu2 %763 }
 0x363   :  { %v775_v11 = vsel %vm379_vm10, %v743_v55, %v764_v53  ;;  %v1038_v53 = vld [vmem:[#allocation2 + $0x268] sm:$0xff] }
 0x364   :  { %831 = vmatmul.f32.vlgmr.msra.gmra.mxu0 %v775_v11  ;;  %v1037_v11 = vld [vmem:[#allocation2 + $0x260] sm:$0xff]  ;;  %4385 = vmatpush.msra.mxu2 %v1038_v53 }
 0x365   :  { %1067 = vmatpush.msrb.mxu0 %v1038_v53 }
 0x366   :  { %4386 = vmatpush.msra.mxu2 %v1037_v11 }
 0x367   :  { %1068 = vmatpush.msrb.mxu0 %v1037_v11 }
 0x36a   :  { %v770_v61 = vpop.permute.xlu2 %769 }
 0x36b   :  { %v778_v62 = vsel %vm379_vm10, %v739_v40, %v770_v61 }
 0x379   :  { %v766_v56 = vpop.permute.xlu0 %765  ;;  %v768_v58 = vpop.permute.xlu1 %767 }
 0x37a   :  { %v776_v57 = vsel %vm379_vm10, %v741_v38, %v766_v56  ;;  %v777_v60 = vsel %vm379_vm10, %v745_v59, %v768_v58  ;;  %v1035_v59 = vld [vmem:[#allocation2 + $0x250] sm:$0xff] }
 0x37b   :  { %834 = vmatmul.f32.gmra.mxu0 %v776_v57  ;;  %v1036_v57 = vld [vmem:[#allocation2 + $0x258] sm:$0xff] }
 0x37c   :  { %1069 = vmatpush.msrb.mxu0 %v1036_v57  ;;  %4387 = vmatpush.msra.mxu2 %v1036_v57 }
 0x37e   :  { %1070 = vmatpush.msrb.mxu0 %v1035_v59  ;;  %4388 = vmatpush.msra.mxu2 %v1035_v59 }
 0x383   :  { %837 = vmatmul.f32.gmra.mxu0 %v777_v60 }
 0x38b   :  { %840 = vmatmul.f32.gmra.mxu0 %v778_v62 }
 0x38d   :  { %v861_v63 = vpop.f32.mrf.mxu3 }
 0x395   :  { %v864_v4 = vpop.f32.mrf.mxu3 }
 0x39d   :  { %v867_v7 = vpop.f32.mrf.mxu3 }
 0x3a5   :  { %v870_v0 = vpop.f32.mrf.mxu3 }
 0x3e1   :  { %v832_v2 = vpop.f32.mrf.mxu0 }
 0x3e2   :  { %v862_v15 = vadd.f32 %v861_v63, %v832_v2 }
 0x3e4   :  { %v873_v1 = vsel %vm379_vm10, %v862_v15, 0.0 }
 0x3f8   :  { %v835_v5 = vpop.f32.mrf.mxu0 }
 0x3f9   :  { %v865_v10 = vadd.f32 %v864_v4, %v835_v5 }
 0x3fb   :  { %v874_v17 = vsel %vm379_vm10, %v865_v10, 0.0 }
 0x3fc   :  { %v875_v19 = vadd.f32 %v874_v17, %v873_v1 }
 0x400   :  { %v838_v8 = vpop.f32.mrf.mxu0 }
 0x401   :  { %v868_v16 = vadd.f32 %v867_v7, %v838_v8  ;;  %v920_v7 = vld [vmem:[#allocation2 + $0x240] sm:$0x1] }
 0x403   :  { %v876_v18 = vsel %vm379_vm10, %v868_v16, 0.0 }
 0x404   :  { %v877_v23 = vadd.f32 %v876_v18, %v875_v19 }
 0x408   :  { %v841_v20 = vpop.f32.mrf.mxu0 }
 0x409   :  { %v871_v22 = vadd.f32 %v870_v0, %v841_v20 }
 0x40b   :  { %v878_v24 = vsel %vm379_vm10, %v871_v22, 0.0 }
 0x40c   :  { %v879_v25 = vadd.f32 %v878_v24, %v877_v23  ;;  %v933_v24 = vld [vmem:[#allocation2 + $0x290] sm:$0xf] }
 0x40d   :  { %4242 = vmatpush.msk.msra.mxu1 %vm5848_vm11, %v933_v24 }
 0x40e   :  { %v880_v27 = vrot.slane %v879_v25, 4 }
 0x410   :  { %v881_v28 = vadd.f32 %v880_v27, %v879_v25  ;;  %v4484_v25 = vld [vmem:[%s5825_s0] sm:$0xff] }
 0x411   :  { %4243 = vmatmul.msk.f32.vlgmr.msra.gmra.mxu1 %vm299_vm6, %v4484_v25 }
 0x412   :  { %v882_v29 = vrot.slane %v881_v28, 2 }
 0x414   :  { %v883_v30 = vadd.f32 %v882_v29, %v881_v28  ;;  %v4485_v29 = vld [vmem:[%s5825_s0 + $0x8] sm:$0xff] }
 0x416   :  { %v884_v31 = vrot.slane %v883_v30, 1 }
 0x418   :  { %v885_v32 = vadd.f32 %v884_v31, %v883_v30 }
 0x419   :  { %4244 = vmatmul.msk.f32.gmra.mxu1 %vm299_vm6, %v4485_v29 }
 0x41a   :  { %v886_v33 = vmul.f32 0.03125, %v885_v32  ;;  %v4486_v32 = vld [vmem:[%s5825_s0 + $0x10] sm:$0xff] }
 0x41c   :  { %v4970_v34 = vsub.f32 %v862_v15, %v886_v33  ;;  %v4972_v3 = vsub.f32 %v865_v10, %v886_v33  ;;  %v889_v36 = vsub.f32 %v868_v16, %v886_v33  ;;  %v890_v37 = vsub.f32 %v871_v22, %v886_v33  ;;  %v4450_v16 = vld [vmem:[#allocation2 + $0x248] ss:$0 sm:$0xff] }
 0x41e   :  { %v891_v38 = vmul.f32 %v4970_v34, %v4970_v34  ;;  %v892_v39 = vmul.f32 %v4972_v3, %v4972_v3  ;;  %v893_v40 = vmul.f32 %v889_v36, %v889_v36  ;;  %v894_v41 = vmul.f32 %v890_v37, %v890_v37 }
 0x420   :  { %v895_v42 = vsel %vm379_vm10, %v891_v38, 0.0  ;;  %v896_v43 = vsel %vm379_vm10, %v892_v39, 0.0  ;;  %v898_v44 = vsel %vm379_vm10, %v893_v40, 0.0  ;;  %v900_v46 = vsel %vm379_vm10, %v894_v41, 0.0 }
 0x421   :  { %v897_v21 = vadd.f32 %v896_v43, %v895_v42  ;;  %4245 = vmatmul.msk.f32.gmra.mxu1 %vm299_vm6, %v4486_v32 }
 0x423   :  { %v899_v45 = vadd.f32 %v898_v44, %v897_v21 }
 0x425   :  { %v901_v47 = vadd.f32 %v900_v46, %v899_v45 }
 0x427   :  { %v902_v12 = vrot.slane %v901_v47, 4 }
 0x429   :  { %v903_v48 = vadd.f32 %v902_v12, %v901_v47 }
 0x42b   :  { %v904_v49 = vrot.slane %v903_v48, 2 }
 0x42d   :  { %v905_v51 = vadd.f32 %v904_v49, %v903_v48 }
 0x42f   :  { %v906_v55 = vrot.slane %v905_v51, 1 }
 0x431   :  { %v907_v56 = vadd.f32 %v906_v55, %v905_v51 }
 0x433   :  { %v908_v58 = vmul.f32 0.03125, %v907_v56 }
 0x435   :  { %v909_v60 = vadd.f32 1e-05, %v908_v58 }
 0x437   :  { %4464 = vrsqrt.f32 %v909_v60  ;;  %vm916_vm2 = vweird.f32 %v909_v60 }
 0x43d   :  { %v4465_v61 = vpop.eup %4464 }
 0x43e   :  { %v911_v62 = vmul.f32 %v4465_v61, %v909_v60  ;;  %vm917_vm15 = vweird.f32 %v4465_v61 }
 0x43f   :  { %vm918_vm4 = vmor %vm916_vm2, %vm917_vm15  ;;  %vm5849_vm2 = vcmp.lt.s32.totalorder %v4612_v6, 5 }
 0x440   :  { %v912_v63 = vmul.f32 %v4465_v61, %v911_v62  ;;  %vm5851_vm11 = vmmov %vm5849_vm2 }
 0x442   :  { %v913_v2 = vmul.f32 0.5, %v912_v63 }
 0x444   :  { %v914_v4 = vsub.f32 1.5, %v913_v2 }
 0x446   :  { %v915_v5 = vmul.f32 %v4465_v61, %v914_v4 }
 0x448   :  { %v919_v8 = vsel %vm918_vm4, %v4465_v61, %v915_v5  ;;  %vm5850_vm4 = vcmp.lt.s32.totalorder %v4612_v6, 6 }
 0x449   :  { %v921_v10 = vmul.f32 %v920_v7, %v919_v8 }
 0x44b   :  { %v922_v15 = vperm.slane %v921_v10, 0 }
 0x44d   :  { %v926_v17 = vmul.f32 %v922_v15, %v890_v37  ;;  %v925_v1 = vmul.f32 %v922_v15, %v889_v36  ;;  %v924_v18 = vmul.f32 %v922_v15, %v4972_v3  ;;  %v923_v0 = vmul.f32 %v922_v15, %v4970_v34  ;;  %v4487_v3 = vld [vmem:[%s5825_s0 + $0x18] sm:$0xff]  ;;  %s1034_s0 = sld [smem:[#allocation6]] }
 0x44e   :  { %4246 = vmatmul.msk.f32.gmra.mxu1 %vm299_vm6, %v4487_v3 }
 0x44f   :  { %v4984_v19 = vadd.f32 %v4450_v16, %v926_v17  ;;  %v4986_v20 = vadd.f32 %v4450_v16, %v925_v1  ;;  %v4988_v22 = vadd.f32 %v4450_v16, %v924_v18  ;;  %v4990_v23 = vadd.f32 %v4450_v16, %v923_v0 }
 0x451   :  { %1251 = vmatpush.msrb.mxu3 %v4984_v19  ;;  %1181 = vxpose.xlu0.b32.start [1/2] (short) (narrow) %v4986_v20, 64 }
 0x452   :  { %4249 = vmatmul.msk.f32.vlgmr.msra.gmra.mxu2 %vm379_vm10, %v4986_v20  ;;  %1154 = vmatpush.msra.mxu0 %v4988_v22 }
 0x453   :  { %1084 = vxpose.xlu1.b32.start [1/2] (short) (narrow) %v4990_v23, 64  ;;  %4247 = vmatmul.msk.f32.vlgmr.msrb.gmra.mxu0 %vm379_vm10, %v4990_v23 }
 0x454   :  { %1155 = vmatpush.msra.mxu0 %v4990_v23  ;;  %1252 = vmatpush.msrb.mxu3 %v4986_v20 }
 0x459   :  { %1182 = vxpose.xlu0.b32.end [2/2] (short) (narrow) %v4984_v19, 64 }
 0x45a   :  { %4250 = vmatmul.msk.f32.gmra.mxu2 %vm379_vm10, %v4984_v19 }
 0x45b   :  { %1085 = vxpose.xlu1.b32.end [2/2] (short) (narrow) %v4988_v22, 64  ;;  %4248 = vmatmul.msk.f32.gmra.mxu0 %vm379_vm10, %v4988_v22 }
 0x48e   :  { %v962_v53 = vpop.f32.mrf.mxu1 }
 0x48f   :  { %v974_v63 = vsel %vm379_vm10, %v962_v53, 0.0 }
 0x496   :  { %v965_v57 = vpop.f32.mrf.mxu1 }
 0x497   :  { %v975_v2 = vsel %vm379_vm10, %v965_v57, 0.0 }
 0x498   :  { %v976_v4 = vadd.f32 %v975_v2, %v974_v63  ;;  %v1021_v63 = vld [vmem:[#allocation2 + $0x298] sm:$0x1] }
 0x49e   :  { %v968_v60 = vpop.f32.mrf.mxu1 }
 0x49f   :  { %v977_v5 = vsel %vm379_vm10, %v968_v60, 0.0 }
 0x4a0   :  { %v978_v8 = vadd.f32 %v977_v5, %v976_v4  ;;  %v1336_v5 = vstv %s1034_s0 }
 0x4cb   :  { %v971_v7 = vpop.f32.mrf.mxu1 }
 0x4cc   :  { %v979_v10 = vsel %vm379_vm10, %v971_v7, 0.0 }
 0x4cd   :  { %v980_v15 = vadd.f32 %v979_v10, %v978_v8  ;;  %v4451_v10 = vld [vmem:[#allocation2 + $0x2a0] ss:$0 sm:$0xff] }
 0x4cf   :  { %v981_v17 = vrot.slane %v980_v15, 4 }
 0x4d0   :  { %v1072_v45 = vpop.f32.mrf.mxu0 }
 0x4d1   :  { %v982_v1 = vadd.f32 %v981_v17, %v980_v15 }
 0x4d3   :  { %v983_v0 = vrot.slane %v982_v1, 2 }
 0x4d5   :  { %v1078_v16 = vpop.f32.mrf.mxu2  ;;  %v984_v24 = vadd.f32 %v983_v0, %v982_v1 }
 0x4d7   :  { %v985_v25 = vrot.slane %v984_v24, 1 }
 0x4d8   :  { %v1075_v46 = vpop.f32.mrf.mxu0 }
 0x4dd   :  { %v1081_v18 = vpop.f32.mrf.mxu2 }
 0x4f5   :  { %v1197_v27 = vpop.trf.xlu0 }
 0x4f6   :  { %4259 = vmatmul.msk.f32.vlgmr.msrb.gmra.mxu3 %vm314_vm7, %v1197_v27  ;;  %v986_v27 = vadd.f32 %v985_v25, %v984_v24 }
 0x4f7   :  { %v1100_v28 = vpop.trf.xlu1 }
 0x4f8   :  { %4251 = vmatmul.msk.f32.vlgmr.msra.gmra.mxu0 %vm314_vm7, %v1100_v28  ;;  %v987_v28 = vmul.f32 0.03125, %v986_v27 }
 0x4fa   :  { %v988_v29 = vsub.f32 %v962_v53, %v987_v28 }
 0x4fc   :  { %v992_v32 = vmul.f32 %v988_v29, %v988_v29 }
 0x4fd   :  { %v1198_v30 = vpop.trf.xlu0 }
 0x4fe   :  { %4260 = vmatmul.msk.f32.gmra.mxu3 %vm314_vm7, %v1198_v30  ;;  %v989_v30 = vsub.f32 %v965_v57, %v987_v28  ;;  %v1536_v57 = vld [vmem:[#allocation2 + $0x440] sm:$0xff] }
 0x4ff   :  { %v1101_v31 = vpop.trf.xlu1 }
 0x500   :  { %4252 = vmatmul.msk.f32.gmra.mxu0 %vm314_vm7, %v1101_v31  ;;  %v5049_v31 = vsub.f32 %v968_v60, %v987_v28  ;;  %v1534_v60 = vld [vmem:[#allocation2 + $0x430] sm:$0xff] }
 0x502   :  { %v994_v3 = vmul.f32 %v5049_v31, %v5049_v31 }
 0x505   :  { %v1199_v33 = vpop.trf.xlu0 }
 0x506   :  { %4261 = vmatmul.msk.f32.gmra.mxu3 %vm314_vm7, %v1199_v33  ;;  %v993_v33 = vmul.f32 %v989_v30, %v989_v30 }
 0x507   :  { %v1102_v34 = vpop.trf.xlu1 }
 0x508   :  { %4253 = vmatmul.msk.f32.gmra.mxu0 %vm314_vm7, %v1102_v34  ;;  %v5051_v34 = vsub.f32 %v971_v7, %v987_v28 }
 0x50d   :  { %v1200_v36 = vpop.trf.xlu0 }
 0x50e   :  { %4262 = vmatmul.msk.f32.gmra.mxu3 %vm314_vm7, %v1200_v36  ;;  %v996_v36 = vsel %vm379_vm10, %v992_v32, 0.0 }
 0x50f   :  { %v1103_v37 = vpop.trf.xlu1 }
 0x510   :  { %4254 = vmatmul.msk.f32.gmra.mxu0 %vm314_vm7, %v1103_v37  ;;  %v997_v37 = vsel %vm379_vm10, %v993_v33, 0.0 }
 0x515   :  { %v1201_v38 = vpop.trf.xlu0 }
 0x516   :  { %4263 = vmatmul.msk.f32.gmra.mxu3 %vm314_vm7, %v1201_v38  ;;  %v998_v38 = vadd.f32 %v997_v37, %v996_v36 }
 0x517   :  { %v1104_v39 = vpop.trf.xlu1 }
 0x518   :  { %4255 = vmatmul.msk.f32.gmra.mxu0 %vm314_vm7, %v1104_v39  ;;  %v995_v39 = vmul.f32 %v5051_v34, %v5051_v34 }
 0x51d   :  { %v1202_v40 = vpop.trf.xlu0 }
 0x51e   :  { %4264 = vmatmul.msk.f32.gmra.mxu3 %vm314_vm7, %v1202_v40  ;;  %v999_v40 = vsel %vm379_vm10, %v994_v3, 0.0 }
 0x51f   :  { %v1105_v41 = vpop.trf.xlu1 }
 0x520   :  { %4256 = vmatmul.msk.f32.gmra.mxu0 %vm314_vm7, %v1105_v41  ;;  %v1000_v41 = vadd.f32 %v999_v40, %v998_v38 }
 0x525   :  { %v1203_v42 = vpop.trf.xlu0 }
 0x526   :  { %4265 = vmatmul.msk.f32.gmra.mxu3 %vm314_vm7, %v1203_v42  ;;  %v1001_v42 = vsel %vm379_vm10, %v995_v39, 0.0 }
 0x527   :  { %v1106_v43 = vpop.trf.xlu1 }
 0x528   :  { %4257 = vmatmul.msk.f32.gmra.mxu0 %vm314_vm7, %v1106_v43  ;;  %v1002_v43 = vadd.f32 %v1001_v42, %v1000_v41 }
 0x52d   :  { %v1204_v21 = vpop.trf.xlu0 }
 0x52e   :  { %4266 = vmatmul.msk.f32.gmra.mxu3 %vm314_vm7, %v1204_v21  ;;  %v1003_v21 = vrot.slane %v1002_v43, 4 }
 0x52f   :  { %v1107_v44 = vpop.trf.xlu1 }
 0x530   :  { %4258 = vmatmul.msk.f32.gmra.mxu0 %vm314_vm7, %v1107_v44  ;;  %v1004_v44 = vadd.f32 %v1003_v21, %v1002_v43 }
 0x575   :  { %v1157_v47 = vpop.f32.mrf.mxu0 }
 0x579   :  { %v1254_v12 = vpop.f32.mrf.mxu3 }
 0x57d   :  { %v1160_v13 = vpop.f32.mrf.mxu0 }
 0x581   :  { %v1257_v48 = vpop.f32.mrf.mxu3 }
 0x585   :  { %v1163_v14 = vpop.f32.mrf.mxu0 }
 0x589   :  { %v1260_v49 = vpop.f32.mrf.mxu3 }
 0x58d   :  { %v1166_v50 = vpop.f32.mrf.mxu0 }
 0x591   :  { %v1263_v51 = vpop.f32.mrf.mxu3 }
 0x595   :  { %v1169_v52 = vpop.f32.mrf.mxu0 }
 0x599   :  { %v1266_v55 = vpop.f32.mrf.mxu3 }
 0x59d   :  { %v1172_v11 = vpop.f32.mrf.mxu0 }
 0x5a1   :  { %v1269_v56 = vpop.f32.mrf.mxu3 }
 0x5a5   :  { %v1175_v58 = vpop.f32.mrf.mxu0 }
 0x5a9   :  { %v1272_v59 = vpop.f32.mrf.mxu3 }
 0x5ad   :  { %v1178_v61 = vpop.f32.mrf.mxu0 }
 0x5ae   :  { %1292 = vmatpush.msrb.mxu1 %v1178_v61  ;;  %v1533_v61 = vld [vmem:[#allocation2 + $0x428] sm:$0xff] }
 0x5b0   :  { %1293 = vmatpush.msrb.mxu1 %v1175_v58  ;;  %v1535_v58 = vld [vmem:[#allocation2 + $0x438] sm:$0xff] }
 0x5b1   :  { %v1275_v62 = vpop.f32.mrf.mxu3 }
 0x5b2   :  { %1294 = vmatpush.msrb.mxu1 %v1172_v11  ;;  %1321 = vmatpush.msrb.mxu2 %v1275_v62 }
 0x5b4   :  { %1295 = vmatpush.msrb.mxu1 %v1169_v52  ;;  %1322 = vmatpush.msrb.mxu2 %v1272_v59  ;;  %v1539_v52 = vld [vmem:[#allocation2 + $0x458] sm:$0xff] }
 0x5b6   :  { %1296 = vmatpush.msrb.mxu1 %v1166_v50  ;;  %1323 = vmatpush.msrb.mxu2 %v1269_v56  ;;  %v1537_v56 = vld [vmem:[#allocation2 + $0x448] sm:$0xff] }
 0x5b8   :  { %1297 = vmatpush.msrb.mxu1 %v1163_v14  ;;  %1324 = vmatpush.msrb.mxu2 %v1266_v55  ;;  %v1538_v55 = vld [vmem:[#allocation2 + $0x450] sm:$0xff] }
 0x5ba   :  { %1298 = vmatpush.msrb.mxu1 %v1160_v13  ;;  %1325 = vmatpush.msrb.mxu2 %v1263_v51  ;;  %v1540_v51 = vld [vmem:[#allocation2 + $0x460] sm:$0xff] }
 0x5bb   :  { %1648 = vmatpush.msra.mxu3 %v1540_v51 }
 0x5bc   :  { %1299 = vmatpush.msrb.mxu1 %v1157_v47  ;;  %1326 = vmatpush.msrb.mxu2 %v1260_v49 }
 0x5bd   :  { %4267 = vmatmul.msk.f32.vlgmr.msrb.gmra.mxu1 %vm379_vm10, %v1072_v45  ;;  %v1005_v45 = vrot.slane %v1004_v44, 2  ;;  %1649 = vmatpush.msra.mxu3 %v1539_v52 }
 0x5be   :  { %1327 = vmatpush.msrb.mxu2 %v1257_v48 }
 0x5bf   :  { %1650 = vmatpush.msra.mxu3 %v1538_v55  ;;  %v1532_v55 = vld [vmem:[#allocation2 + $0x420] sm:$0xff] }
 0x5c0   :  { %1328 = vmatpush.msrb.mxu2 %v1254_v12  ;;  %1611 = vmatpush.msrb.mxu0 %v1532_v55  ;;  %v1507_v55 = vld [vmem:[#allocation2 + $0x358] sm:$0xff] }
 0x5c1   :  { %4269 = vmatmul.msk.f32.vlgmr.msrb.gmra.mxu2 %vm379_vm10, %v1078_v16  ;;  %1651 = vmatpush.msra.mxu3 %v1537_v56 }
 0x5c3   :  { %1652 = vmatpush.msra.mxu3 %v1536_v57  ;;  %v1530_v57 = vld [vmem:[#allocation2 + $0x410] sm:$0xff] }
 0x5c5   :  { %4268 = vmatmul.msk.f32.gmra.mxu1 %vm379_vm10, %v1075_v46  ;;  %v1006_v46 = vadd.f32 %v1005_v45, %v1004_v44  ;;  %1653 = vmatpush.msra.mxu3 %v1535_v58  ;;  %v1500_v58 = vld [vmem:[#allocation2 + $0x320] sm:$0xff] }
 0x5c6   :  { %1553 = vmatpush.msra.mxu1 %v1500_v58  ;;  %v1488_v58 = vld [vmem:[#allocation2 + $0x2c0] sm:$0xff] }
 0x5c7   :  { %v1007_v47 = vrot.slane %v1006_v46, 1  ;;  %1654 = vmatpush.msra.mxu3 %v1534_v60 }
 0x5c9   :  { %4270 = vmatmul.msk.f32.gmra.mxu2 %vm379_vm10, %v1081_v18  ;;  %v1008_v12 = vadd.f32 %v1007_v47, %v1006_v46  ;;  %1655 = vmatpush.msra.mxu3 %v1533_v61  ;;  %v1499_v61 = vld [vmem:[#allocation2 + $0x318] sm:$0xff] }
 0x5ca   :  { %1554 = vmatpush.msra.mxu1 %v1499_v61  ;;  %v1503_v61 = vld [vmem:[#allocation2 + $0x338] sm:$0xff] }
 0x5cb   :  { %v1009_v13 = vmul.f32 0.03125, %v1008_v12 }
 0x5cd   :  { %v1010_v48 = vadd.f32 1e-05, %v1009_v13 }
 0x5cf   :  { %4466 = vrsqrt.f32 %v1010_v48  ;;  %vm1017_vm6 = vweird.f32 %v1010_v48 }
 0x5d5   :  { %v4467_v14 = vpop.eup %4466 }
 0x5d6   :  { %v1012_v49 = vmul.f32 %v4467_v14, %v1010_v48  ;;  %vm1018_vm12 = vweird.f32 %v4467_v14 }
 0x5d7   :  { %vm1019_vm15 = vmor %vm1017_vm6, %vm1018_vm12  ;;  %vm5852_vm6 = vcmp.lt.s32.totalorder %v4664_v26, 13  ;;  %vm5853_vm12 = vcmp.ge.s32.totalorder %v4617_v9, 2 }
 0x5d8   :  { %v1013_v50 = vmul.f32 %v4467_v14, %v1012_v49 }
 0x5da   :  { %v1014_v53 = vmul.f32 0.5, %v1013_v50 }
 0x5dc   :  { %v1015_v11 = vsub.f32 1.5, %v1014_v53 }
 0x5de   :  { %v1016_v59 = vmul.f32 %v4467_v14, %v1015_v11  ;;  %v1531_v11 = vld [vmem:[#allocation2 + $0x418] sm:$0xff] }
 0x5df   :  { %1612 = vmatpush.msrb.mxu0 %v1531_v11  ;;  %v1490_v11 = vld [vmem:[#allocation2 + $0x2d0] sm:$0xff] }
 0x5e0   :  { %v1020_v62 = vsel %vm1019_vm15, %v4467_v14, %v1016_v59  ;;  %vm5854_vm15 = vmmov %vm5849_vm2  ;;  %v1516_v59 = vld [vmem:[#allocation2 + $0x3a0] sm:$0xff] }
 0x5e1   :  { %v1022_v2 = vmul.f32 %v1021_v63, %v1020_v62  ;;  %v1515_v62 = vld [vmem:[#allocation2 + $0x398] sm:$0xff]  ;;  %1582 = vmatpush.msra.mxu2 %v1516_v59  ;;  %1613 = vmatpush.msrb.mxu0 %v1530_v57  ;;  %v1505_v57 = vld [vmem:[#allocation2 + $0x348] sm:$0xff]  ;;  %v1504_v59 = vld [vmem:[#allocation2 + $0x340] sm:$0xff] }
 0x5e3   :  { %v1023_v4 = vperm.slane %v1022_v2, 0  ;;  %1583 = vmatpush.msra.mxu2 %v1515_v62  ;;  %v1486_v62 = vld [vmem:[#allocation2 + $0x2b0] sm:$0xff] }
 0x5e5   :  { %v1024_v15 = vmul.f32 %v1023_v4, %v988_v29  ;;  %v1025_v1 = vmul.f32 %v1023_v4, %v989_v30  ;;  %v1026_v25 = vmul.f32 %v1023_v4, %v5049_v31  ;;  %v1027_v30 = vmul.f32 %v1023_v4, %v5051_v34  ;;  %v1529_v4 = vld [vmem:[#allocation2 + $0x408] sm:$0xff] }
 0x5e6   :  { %1614 = vmatpush.msrb.mxu0 %v1529_v4  ;;  %v1501_v4 = vld [vmem:[#allocation2 + $0x328] sm:$0xff] }
 0x5e7   :  { %v1030_v17 = vadd.f32 %v4451_v10, %v1024_v15  ;;  %v1031_v28 = vadd.f32 %v4451_v10, %v1025_v1  ;;  %v1032_v37 = vadd.f32 %v4451_v10, %v1026_v25  ;;  %v1033_v45 = vadd.f32 %v4451_v10, %v1027_v30  ;;  %v1514_v10 = vld [vmem:[#allocation2 + $0x390] sm:$0xff]  ;;  %v1524_v30 = vld [vmem:[#allocation2 + $0x3e0] sm:$0xff] }
 0x5e8   :  { %1584 = vmatpush.msra.mxu2 %v1514_v10 }
 0x63a   :  { %v1301_v7 = vpop.f32.mrf.mxu1 }
 0x63b   :  { %v1337_v8 = vmul.f32 %v1336_v5, %v1301_v7 }
 0x63d   :  { %v1341_v16 = vadd.f32 %v1337_v8, %v4990_v23  ;;  %v1528_v8 = vld [vmem:[#allocation2 + $0x400] sm:$0xff] }
 0x63e   :  { %1615 = vmatpush.msrb.mxu0 %v1528_v8 }
 0x63f   :  { %v1345_v18 = vadd.f32 %v1341_v16, %v1030_v17  ;;  %v1497_v16 = vld [vmem:[#allocation2 + $0x308] sm:$0xff] }
 0x641   :  { %v5064_v3 = vmax.f32 %v1345_v18, 0.0  ;;  %v1527_v18 = vld [vmem:[#allocation2 + $0x3f8] sm:$0xff] }
 0x642   :  { %v1304_v0 = vpop.f32.mrf.mxu1  ;;  %1616 = vmatpush.msrb.mxu0 %v1527_v18 }
 0x643   :  { %v1338_v24 = vmul.f32 %v1336_v5, %v1304_v0  ;;  %v1413_v39 = vrot.slane %v5064_v3, 3  ;;  %v1365_v14 = vrot.slane %v5064_v3, 6  ;;  %v1513_v0 = vld [vmem:[#allocation2 + $0x388] sm:$0xff]  ;;  %v1389_v8 = vrot.slane %v5064_v3, 1 }
 0x644   :  { %v1330_v27 = vpop.f32.mrf.mxu2  ;;  %1585 = vmatpush.msra.mxu2 %v1513_v0  ;;  %v1353_v18 = vrot.slane %v5064_v3, 5  ;;  %v1377_v0 = vrot.slane %v5064_v3, 7 }
 0x645   :  { %v1342_v32 = vadd.f32 %v1338_v24, %v4988_v22  ;;  %v1339_v33 = vmul.f32 %v1336_v5, %v1330_v27  ;;  %v1401_v22 = vrot.slane %v5064_v3, 2  ;;  %v1496_v24 = vld [vmem:[#allocation2 + $0x300] sm:$0xff]  ;;  %v1526_v27 = vld [vmem:[#allocation2 + $0x3f0] sm:$0xff] }
 0x646   :  { %1617 = vmatpush.msrb.mxu0 %v1526_v27 }
 0x647   :  { %v1346_v36 = vadd.f32 %v1342_v32, %v1031_v28  ;;  %v1343_v29 = vadd.f32 %v1339_v33, %v4986_v20  ;;  %v1512_v33 = vld [vmem:[#allocation2 + $0x380] sm:$0xff] }
 0x648   :  { %1586 = vmatpush.msra.mxu2 %v1512_v33 }
 0x649   :  { %v5067_v38 = vmax.f32 %v1346_v36, 0.0  ;;  %v1347_v23 = vadd.f32 %v1343_v29, %v1032_v37  ;;  %v1495_v36 = vld [vmem:[#allocation2 + $0x2f8] sm:$0xff]  ;;  %v1525_v37 = vld [vmem:[#allocation2 + $0x3e8] sm:$0xff] }
 0x64a   :  { %v1511_v29 = vld [vmem:[#allocation2 + $0x378] sm:$0xff]  ;;  %1618 = vmatpush.msrb.mxu0 %v1525_v37 }
 0x64b   :  { %v5071_v40 = vmax.f32 %v1347_v23, 0.0  ;;  %v1414_v31 = vrot.slane %v5067_v38, 3  ;;  %v1402_v41 = vrot.slane %v5067_v38, 2  ;;  %v1366_v53 = vrot.slane %v5067_v38, 6  ;;  %1587 = vmatpush.msra.mxu2 %v1511_v29 }
 0x64c   :  { %v1333_v42 = vpop.f32.mrf.mxu2  ;;  %1619 = vmatpush.msrb.mxu0 %v1524_v30  ;;  %v1378_v30 = vrot.slane %v5067_v38, 7 }
 0x64d   :  { %v1340_v43 = vmul.f32 %v1336_v5, %v1333_v42  ;;  %v1419_v20 = vsel %vm5849_vm2, %v1413_v39, %v1414_v31  ;;  %v1407_v34 = vsel %vm5850_vm4, %v1401_v22, %v1402_v41  ;;  %v1415_v44 = vrot.slane %v5071_v40, 3  ;;  %v1498_v5 = vld [vmem:[#allocation2 + $0x310] sm:$0xff]  ;;  %v1523_v42 = vld [vmem:[#allocation2 + $0x3d8] sm:$0xff] }
 0x64e   :  { %4271 = vmatmul.msk.f32.vlgmr.msra.gmra.mxu3 %vm379_vm10, %v1419_v20  ;;  %v4418_v21 = vpack.i.bf16 %v1407_v34, %v5067_v38  ;;  %v1371_v60 = vsel %vm122_vm0, %v1365_v14, %v1366_v53  ;;  %v1367_v63 = vrot.slane %v5071_v40, 6  ;;  %v1403_v2 = vrot.slane %v5071_v40, 2  ;;  %1555 = vmatpush.msra.mxu1 %v1498_v5  ;;  %v1509_v20 = vld [vmem:[#allocation2 + $0x368] sm:$0xff]  ;;  %v1522_v34 = vld [vmem:[#allocation2 + $0x3d0] sm:$0xff] }
 0x64f   :  { %v1344_v46 = vadd.f32 %v1340_v43, %v4984_v19  ;;  %v1418_v12 = vsel %vm5851_vm11, %v1414_v31, %v1415_v44  ;;  %v4428_v7 = vpack.i.bf16 %v5071_v40, %v1371_v60  ;;  %vm5855_vm11 = vcmp.lt.s32.totalorder %v4732_v54, 13  ;;  %v1493_v43 = vld [vmem:[#allocation2 + $0x2e8] sm:$0xff]  ;;  %1620 = vmatpush.msrb.mxu0 %v1523_v42  ;;  %v1487_v60 = vld [vmem:[#allocation2 + $0x2b8] sm:$0xff] }
 0x650   :  { %4419 = vrot.lane.b32.xlu2 %v4418_v21, %s4563_s7  ;;  %v1422_v48 = vsel %vm5852_vm6, %v1418_v12, 0.0  ;;  %v1370_v17 = vsel %vm122_vm0, %v1366_v53, %v1367_v63  ;;  %v1406_v1 = vsel %vm5850_vm4, %v1402_v41, %v1403_v2  ;;  %1556 = vmatpush.msra.mxu1 %v1497_v16  ;;  %vm5856_vm6 = vcmp.ge.s32.totalorder %v4684_v35, 2  ;;  %v1510_v41 = vld [vmem:[#allocation2 + $0x370] sm:$0xff]  ;;  %v1519_v12 = vld [vmem:[#allocation2 + $0x3b8] sm:$0xff] }
 0x651   :  { %v1348_v47 = vadd.f32 %v1344_v46, %v1033_v45  ;;  %v1375_v28 = vsel %vm5856_vm6, %v1370_v17, 0.0  ;;  %1588 = vmatpush.msra.mxu2 %v1510_v41  ;;  %1621 = vmatpush.msrb.mxu0 %v1522_v34  ;;  %v1520_v46 = vld [vmem:[#allocation2 + $0x3c0] sm:$0xff]  ;;  %v1491_v53 = vld [vmem:[#allocation2 + $0x2d8] sm:$0xff]  ;;  %v1390_v5 = vrot.slane %v5067_v38, 1  ;;  %vm5862_vm6 = vcmp.ge.s32.totalorder %v4684_v35, 3 }
 0x652   :  { %1557 = vmatpush.msra.mxu1 %v1496_v24 }
 0x653   :  { %v5089_v13 = vmax.f32 %v1348_v47, 0.0  ;;  %1589 = vmatpush.msra.mxu2 %v1509_v20  ;;  %v1355_v20 = vrot.slane %v5071_v40, 5 }
 0x654   :  { %1558 = vmatpush.msra.mxu1 %v1495_v36 }
 0x655   :  { %v1368_v49 = vrot.slane %v5089_v13, 6  ;;  %v1416_v52 = vrot.slane %v5089_v13, 3  ;;  %v1404_v31 = vrot.slane %v5089_v13, 2  ;;  %v1356_v17 = vrot.slane %v5089_v13, 5 }
 0x656   :  { %4272 = vmatmul.msk.f32.gmra.mxu3 %vm379_vm10, %v1422_v48 }
 0x657   :  { %v1372_v19 = vsel %vm122_vm0, %v1368_v49, %v1365_v14  ;;  %v1417_v56 = vsel %vm5854_vm15, %v1415_v44, %v1416_v52  ;;  %v1420_v15 = vsel %vm5849_vm2, %v1416_v52, %v1413_v39  ;;  %v1494_v39 = vld [vmem:[#allocation2 + $0x2f0] sm:$0xff]  ;;  %vm5858_vm15 = vmmov %vm5850_vm4  ;;  %v1521_v44 = vld [vmem:[#allocation2 + $0x3c8] sm:$0xff]  ;;  %v1369_v48 = vsel %vm122_vm0, %v1367_v63, %v1368_v49 }
 0x658   :  { %v1373_v50 = vsel %vm5853_vm12, %v1372_v19, 0.0  ;;  %v1424_v25 = vsel %vm5855_vm11, %v1420_v15, 0.0  ;;  %vm5857_vm12 = vcmp.lt.s32.totalorder %v4664_v26, 14  ;;  %1559 = vmatpush.msra.mxu1 %v1494_v39  ;;  %v1405_v21 = vsel %vm5858_vm15, %v1403_v2, %v1404_v31  ;;  %1622 = vmatpush.msrb.mxu0 %v1521_v44  ;;  %vm5859_vm2 = vmmov %vm5850_vm4  ;;  %v1508_v52 = vld [vmem:[#allocation2 + $0x360] sm:$0xff]  ;;  %v1506_v49 = vld [vmem:[#allocation2 + $0x350] sm:$0xff] }
 0x659   :  { %v4423_v51 = vpack.i.bf16 %v1373_v50, %v5064_v3  ;;  %v1410_v32 = vsel %vm5857_vm12, %v1406_v1, 0.0  ;;  %v4438_v45 = vpack.i.bf16 %v1405_v21, %v5089_v13  ;;  %v1408_v47 = vsel %vm5859_vm2, %v1404_v31, %v1401_v22  ;;  %v1518_v50 = vld [vmem:[#allocation2 + $0x3b0] sm:$0xff]  ;;  %v1517_v22 = vld [vmem:[#allocation2 + $0x3a8] sm:$0xff]  ;;  %1590 = vmatpush.msra.mxu2 %v1508_v52 }
 0x65a   :  { %v4433_v23 = vpack.i.bf16 %v1375_v28, %v1410_v32  ;;  %1560 = vmatpush.msra.mxu1 %v1493_v43  ;;  %1623 = vmatpush.msrb.mxu0 %v1520_v46  ;;  %vm5860_vm4 = vcmp.lt.s32.totalorder %v4732_v54, 14  ;;  %v1502_v63 = vld [vmem:[#allocation2 + $0x330] sm:$0xff]  ;;  %v1485_v2 = vld [vmem:[#allocation2 + $0x2a8] sm:$0xff]  ;;  %v1395_v15 = vsel %vm156_vm1, %v1389_v8, %v1390_v5  ;;  %v1380_v1 = vrot.slane %v5089_v13, 7 }
 0x65b   :  { %4424 = vrot.lane.b32.xlu2 %v4423_v51, %s4563_s7  ;;  %v1412_v14 = vsel %vm5860_vm4, %v1408_v47, 0.0  ;;  %v1492_v51 = vld [vmem:[#allocation2 + $0x2e0] sm:$0xff]  ;;  %1591 = vmatpush.msra.mxu2 %v1507_v55  ;;  %v1360_v24 = vsel %vm105_vm14, %v1356_v17, %v1353_v18  ;;  %vm5861_vm11 = vcmp.ge.s32.totalorder %v4617_v9, 3  ;;  %v1383_v43 = vsel %vm139_vm3, %v1377_v0, %v1378_v30 }
 0x65c   :  { %1624 = vmatpush.msrb.mxu0 %v1519_v12  ;;  %v4443_v19 = vpack.i.bf16 %v1412_v14, %v1369_v48  ;;  %1561 = vmatpush.msra.mxu1 %v1492_v51  ;;  %v1361_v33 = vsel %vm5861_vm11, %v1360_v24, 0.0  ;;  %v1379_v44 = vrot.slane %v5071_v40, 7  ;;  %vm5863_vm4 = vcmp.ge.s32.totalorder %v4617_v9, 2 }
 0x65d   :  { %1592 = vmatpush.msra.mxu2 %v1506_v49  ;;  %v1392_v49 = vrot.slane %v5089_v13, 1  ;;  %vm5864_vm11 = vcmp.ge.s32.totalorder %v4684_v35, 2 }
 0x65e   :  { %4273 = vmatmul.msk.f32.gmra.mxu3 %vm379_vm10, %v1417_v56  ;;  %1625 = vmatpush.msrb.mxu0 %v1518_v50  ;;  %v1489_v56 = vld [vmem:[#allocation2 + $0x2c8] sm:$0xff]  ;;  %v1382_v12 = vsel %vm139_vm3, %v1378_v30, %v1379_v44 }
 0x65f   :  { %1562 = vmatpush.msra.mxu1 %v1491_v53  ;;  %1593 = vmatpush.msra.mxu2 %v1505_v57  ;;  %v1387_v52 = vsel %vm146_vm9, %v1382_v12, 0.0 }
 0x660   :  { %1626 = vmatpush.msrb.mxu0 %v1517_v22 }
 0x661   :  { %1563 = vmatpush.msra.mxu1 %v1490_v11  ;;  %1594 = vmatpush.msra.mxu2 %v1504_v59  ;;  %v1381_v59 = vsel %vm139_vm3, %v1379_v44, %v1380_v1 }
 0x663   :  { %4429 = vrot.lane.b32.xlu2 %v4428_v7, %s4563_s7  ;;  %1564 = vmatpush.msra.mxu1 %v1489_v56 }
 0x664   :  { %1595 = vmatpush.msra.mxu2 %v1503_v61 }
 0x665   :  { %1565 = vmatpush.msra.mxu1 %v1488_v58 }
 0x666   :  { %4274 = vmatmul.msk.f32.gmra.mxu3 %vm379_vm10, %v1424_v25  ;;  %1596 = vmatpush.msra.mxu2 %v1502_v63  ;;  %v1384_v25 = vsel %vm139_vm3, %v1380_v1, %v1377_v0  ;;  %v1396_v63 = vsel %vm156_vm1, %v1392_v49, %v1389_v8 }
 0x667   :  { %1566 = vmatpush.msra.mxu1 %v1487_v60  ;;  %v1385_v36 = vsel %vm144_vm5, %v1384_v25, 0.0 }
 0x668   :  { %1597 = vmatpush.msra.mxu2 %v1501_v4 }
 0x669   :  { %1567 = vmatpush.msra.mxu1 %v1486_v62 }
 0x66b   :  { %4434 = vrot.lane.b32.xlu2 %v4433_v23, %s4563_s7  ;;  %1568 = vmatpush.msra.mxu1 %v1485_v2  ;;  %v1354_v23 = vrot.slane %v5067_v38, 5 }
 0x66d   :  { %v1359_v42 = vsel %vm105_vm14, %v1353_v18, %v1354_v23  ;;  %v1358_v47 = vsel %vm105_vm14, %v1354_v23, %v1355_v20 }
 0x66e   :  { %v1363_v51 = vsel %vm5862_vm6, %v1358_v47, 0.0  ;;  %vm5865_vm6 = vcmp.lt.s32.totalorder %v4612_v6, 6 }
 0x673   :  { %4439 = vrot.lane.b32.xlu2 %v4438_v45, %s4563_s7  ;;  %v1391_v45 = vrot.slane %v5071_v40, 1 }
 0x675   :  { %v1394_v48 = vsel %vm156_vm1, %v1390_v5, %v1391_v45  ;;  %v1393_v60 = vsel %vm156_vm1, %v1391_v45, %v1392_v49  ;;  %v1819_v49 = vld [vmem:[#allocation2 + $0x5e8] sm:$0xff] }
 0x676   :  { %v1398_v22 = vsel %vm162_vm8, %v1394_v48, 0.0 }
 0x67b   :  { %4444 = vrot.lane.b32.xlu2 %v4443_v19, %s4563_s7 }
 0x6aa   :  { %v4420_v7 = vpop.permute.xlu2 %4419 }
 0x6ab   :  { %v4422_v10 = vunpack.i.h.bf16 %v4420_v7  ;;  %v4421_v39 = vunpack.i.l.bf16 %v4420_v7  ;;  %v1357_v7 = vsel %vm105_vm14, %v1355_v20, %v1356_v17 }
 0x6ad   :  { %v1481_v16 = vsel %vm379_vm10, %v1395_v15, %v4422_v10  ;;  %v1478_v21 = vsel %vm379_vm10, %v1383_v43, %v4421_v39  ;;  %v1400_v10 = vsel %vm164_vm13, %v1396_v63, 0.0 }
 0x6ae   :  { %1627 = vmatmul.f32.vlgmr.msrb.gmra.mxu0 %v1481_v16 }
 0x6b5   :  { %v4425_v27 = vpop.permute.xlu2 %4424 }
 0x6b6   :  { %v4427_v28 = vunpack.i.h.bf16 %v4425_v27  ;;  %v4426_v32 = vunpack.i.l.bf16 %v4425_v27 }
 0x6b8   :  { %v1473_v37 = vsel %vm379_vm10, %v1361_v33, %v4427_v28  ;;  %v1477_v29 = vsel %vm379_vm10, %v1385_v36, %v4426_v32 }
 0x6b9   :  { %1569 = vmatmul.f32.vlgmr.msra.gmra.mxu1 %v1473_v37  ;;  %1598 = vmatmul.f32.vlgmr.msra.gmra.mxu2 %v1477_v29 }
 0x6bd   :  { %v4430_v31 = vpop.permute.xlu2 %4429 }
 0x6be   :  { %v4431_v41 = vunpack.i.l.bf16 %v4430_v31  ;;  %v4432_v46 = vunpack.i.h.bf16 %v4430_v31 }
 0x6c0   :  { %v1474_v34 = vsel %vm379_vm10, %v1359_v42, %v4431_v41  ;;  %v1479_v55 = vsel %vm379_vm10, %v1387_v52, %v4432_v46 }
 0x6c1   :  { %1572 = vmatmul.f32.gmra.mxu1 %v1474_v34  ;;  %1601 = vmatmul.f32.gmra.mxu2 %v1478_v21 }
 0x6c5   :  { %v4435_v14 = vpop.permute.xlu2 %4434 }
 0x6c6   :  { %v4437_v19 = vunpack.i.h.bf16 %v4435_v14  ;;  %v4436_v50 = vunpack.i.l.bf16 %v4435_v14 }
 0x6c8   :  { %v1475_v53 = vsel %vm379_vm10, %v1363_v51, %v4437_v19  ;;  %v1482_v11 = vsel %vm379_vm10, %v1398_v22, %v4436_v50 }
 0x6c9   :  { %1575 = vmatmul.f32.gmra.mxu1 %v1475_v53  ;;  %1604 = vmatmul.f32.gmra.mxu2 %v1479_v55  ;;  %v1820_v55 = vld [vmem:[#allocation2 + $0x5f0] sm:$0xff] }
 0x6ca   :  { %1630 = vmatmul.f32.gmra.mxu0 %v1482_v11 }
 0x6cb   :  { %1911 = vmatpush.msra.mxu0 %v1820_v55  ;;  %v1779_v55 = vld [vmem:[#allocation2 + $0x4a8] sm:$0xff] }
 0x6cd   :  { %v4440_v56 = vpop.permute.xlu2 %4439  ;;  %1912 = vmatpush.msra.mxu0 %v1819_v49  ;;  %v1827_v49 = vld [vmem:[#allocation2 + $0x628] sm:$0xff] }
 0x6ce   :  { %v4442_v57 = vunpack.i.h.bf16 %v4440_v56  ;;  %v4441_v58 = vunpack.i.l.bf16 %v4440_v56 }
 0x6d0   :  { %v1480_v61 = vsel %vm379_vm10, %v1381_v59, %v4441_v58  ;;  %v1483_v62 = vsel %vm379_vm10, %v1393_v60, %v4442_v57  ;;  %v1788_v59 = vld [vmem:[#allocation2 + $0x4f0] sm:$0xff] }
 0x6d1   :  { %1607 = vmatmul.f32.gmra.mxu2 %v1480_v61  ;;  %v1657_v18 = vpop.f32.mrf.mxu3  ;;  %v1804_v60 = vld [vmem:[#allocation2 + $0x570] sm:$0xff]  ;;  %1853 = vmatpush.msrb.mxu1 %v1788_v59  ;;  %v1809_v59 = vld [vmem:[#allocation2 + $0x598] sm:$0xff] }
 0x6d2   :  { %1633 = vmatmul.f32.gmra.mxu0 %v1483_v62  ;;  %v1836_v61 = vld [vmem:[#allocation2 + $0x670] sm:$0xff]  ;;  %1882 = vmatpush.msrb.mxu2 %v1804_v60  ;;  %v1818_v62 = vld [vmem:[#allocation2 + $0x5e0] sm:$0xff] }
 0x6d3   :  { %1940 = vmatpush.msrb.mxu3 %v1836_v61  ;;  %1913 = vmatpush.msra.mxu0 %v1818_v62  ;;  %v1778_v61 = vld [vmem:[#allocation2 + $0x4a0] sm:$0xff] }
 0x6d4   :  { %v1794_v62 = vld [vmem:[#allocation2 + $0x520] sm:$0xff] }
 0x6d5   :  { %v4445_v2 = vpop.permute.xlu2 %4444 }
 0x6d6   :  { %v4447_v4 = vunpack.i.h.bf16 %v4445_v2  ;;  %v4446_v5 = vunpack.i.l.bf16 %v4445_v2 }
 0x6d8   :  { %v1476_v15 = vsel %vm379_vm10, %v1357_v7, %v4446_v5  ;;  %v1484_v16 = vsel %vm379_vm10, %v1400_v10, %v4447_v4  ;;  %v1787_v5 = vld [vmem:[#allocation2 + $0x4e8] sm:$0xff] }
 0x6d9   :  { %1578 = vmatmul.f32.gmra.mxu1 %v1476_v15  ;;  %v1660_v27 = vpop.f32.mrf.mxu3  ;;  %v1803_v7 = vld [vmem:[#allocation2 + $0x568] sm:$0xff]  ;;  %v1817_v15 = vld [vmem:[#allocation2 + $0x5d8] sm:$0xff] }
 0x6da   :  { %1636 = vmatmul.f32.gmra.mxu0 %v1484_v16  ;;  %v1835_v10 = vld [vmem:[#allocation2 + $0x668] sm:$0xff]  ;;  %1854 = vmatpush.msrb.mxu1 %v1787_v5  ;;  %v1777_v5 = vld [vmem:[#allocation2 + $0x498] sm:$0xff] }
 0x6db   :  { %1883 = vmatpush.msrb.mxu2 %v1803_v7  ;;  %1941 = vmatpush.msrb.mxu3 %v1835_v10  ;;  %v1793_v7 = vld [vmem:[#allocation2 + $0x518] sm:$0xff] }
 0x6dc   :  { %1914 = vmatpush.msra.mxu0 %v1817_v15  ;;  %v1825_v15 = vld [vmem:[#allocation2 + $0x618] sm:$0xff] }
 0x6e1   :  { %v1663_v23 = vpop.f32.mrf.mxu3 }
 0x6e9   :  { %v1666_v47 = vpop.f32.mrf.mxu3 }
 0x72b   :  { %v1628_v24 = vpop.f32.mrf.mxu0 }
 0x736   :  { %v1570_v1 = vpop.f32.mrf.mxu1 }
 0x73c   :  { %v1599_v0 = vpop.f32.mrf.mxu2 }
 0x73d   :  { %v1600_v36 = vadd.f32 %v1599_v0, %v1570_v1  ;;  %v1802_v0 = vld [vmem:[#allocation2 + $0x560] sm:$0xff] }
 0x73e   :  { %v1573_v8 = vpop.f32.mrf.mxu1  ;;  %1884 = vmatpush.msrb.mxu2 %v1802_v0  ;;  %v1824_v0 = vld [vmem:[#allocation2 + $0x610] sm:$0xff] }
 0x73f   :  { %v1629_v39 = vadd.f32 %v1628_v24, %v1600_v36  ;;  %v1834_v24 = vld [vmem:[#allocation2 + $0x660] sm:$0xff] }
 0x740   :  { %1942 = vmatpush.msrb.mxu3 %v1834_v24 }
 0x741   :  { %v1658_v20 = vadd.f32 %v1657_v18, %v1629_v39  ;;  %v1786_v18 = vld [vmem:[#allocation2 + $0x4e0] sm:$0xff] }
 0x742   :  { %1855 = vmatpush.msrb.mxu1 %v1786_v18  ;;  %v1792_v18 = vld [vmem:[#allocation2 + $0x510] sm:$0xff] }
 0x744   :  { %v1602_v25 = vpop.f32.mrf.mxu2 }
 0x745   :  { %v1603_v33 = vadd.f32 %v1602_v25, %v1573_v8  ;;  %v1816_v8 = vld [vmem:[#allocation2 + $0x5d0] sm:$0xff] }
 0x746   :  { %v1576_v17 = vpop.f32.mrf.mxu1  ;;  %1915 = vmatpush.msra.mxu0 %v1816_v8  ;;  %v1806_v8 = vld [vmem:[#allocation2 + $0x580] sm:$0xff] }
 0x747   :  { %v1631_v28 = vpop.f32.mrf.mxu0 }
 0x748   :  { %v1632_v30 = vadd.f32 %v1631_v28, %v1603_v33  ;;  %v1785_v28 = vld [vmem:[#allocation2 + $0x4d8] sm:$0xff] }
 0x749   :  { %v1833_v33 = vld [vmem:[#allocation2 + $0x658] sm:$0xff]  ;;  %1856 = vmatpush.msrb.mxu1 %v1785_v28  ;;  %v1823_v28 = vld [vmem:[#allocation2 + $0x608] sm:$0xff] }
 0x74a   :  { %v1661_v41 = vadd.f32 %v1660_v27, %v1632_v30  ;;  %1943 = vmatpush.msrb.mxu3 %v1833_v33  ;;  %v1814_v30 = vld [vmem:[#allocation2 + $0x5c0] sm:$0xff] }
 0x74b   :  { %v1774_v33 = vld [vmem:[#allocation2 + $0x480] sm:$0xff] }
 0x74c   :  { %v1605_v32 = vpop.f32.mrf.mxu2  ;;  %v1669_v45 = vadd.f32 %v1661_v41, %v1658_v20 }
 0x74d   :  { %v1606_v37 = vadd.f32 %v1605_v32, %v1576_v17  ;;  %v1801_v32 = vld [vmem:[#allocation2 + $0x558] sm:$0xff]  ;;  %v1815_v17 = vld [vmem:[#allocation2 + $0x5c8] sm:$0xff] }
 0x74e   :  { %1885 = vmatpush.msrb.mxu2 %v1801_v32  ;;  %1916 = vmatpush.msra.mxu0 %v1815_v17  ;;  %v1805_v32 = vld [vmem:[#allocation2 + $0x578] sm:$0xff]  ;;  %v1790_v17 = vld [vmem:[#allocation2 + $0x500] sm:$0xff] }
 0x74f   :  { %v1634_v29 = vpop.f32.mrf.mxu0 }
 0x750   :  { %v1635_v31 = vadd.f32 %v1634_v29, %v1606_v37  ;;  %v1784_v37 = vld [vmem:[#allocation2 + $0x4d0] sm:$0xff]  ;;  %1917 = vmatpush.msra.mxu0 %v1814_v30 }
 0x751   :  { %v1800_v29 = vld [vmem:[#allocation2 + $0x550] sm:$0xff]  ;;  %1857 = vmatpush.msrb.mxu1 %v1784_v37  ;;  %v1773_v37 = vld [vmem:[#allocation2 + $0x478] sm:$0xff] }
 0x752   :  { %v1664_v34 = vadd.f32 %v1663_v23, %v1635_v31  ;;  %v1832_v23 = vld [vmem:[#allocation2 + $0x650] sm:$0xff]  ;;  %1886 = vmatpush.msrb.mxu2 %v1800_v29  ;;  %v1783_v31 = vld [vmem:[#allocation2 + $0x4c8] sm:$0xff]  ;;  %v1789_v29 = vld [vmem:[#allocation2 + $0x4f8] sm:$0xff] }
 0x753   :  { %1944 = vmatpush.msrb.mxu3 %v1832_v23  ;;  %1858 = vmatpush.msrb.mxu1 %v1783_v31  ;;  %v1821_v23 = vld [vmem:[#allocation2 + $0x5f8] sm:$0xff]  ;;  %v1852_v30 = vld [vmem:[#allocation2 + $0x6f0] sm:$0xff]  ;;  %v1851_v31 = vld [vmem:[#allocation2 + $0x6e8] sm:$0xff] }
 0x754   :  { %v1608_v42 = vpop.f32.mrf.mxu2  ;;  %v1670_v12 = vadd.f32 %v1669_v45, %v1664_v34  ;;  %v1812_v45 = vld [vmem:[#allocation2 + $0x5b0] sm:$0xff] }
 0x756   :  { %v1579_v43 = vpop.f32.mrf.mxu1 }
 0x757   :  { %v1609_v21 = vadd.f32 %v1608_v42, %v1579_v43  ;;  %v1637_v44 = vpop.f32.mrf.mxu0  ;;  %v1831_v42 = vld [vmem:[#allocation2 + $0x648] sm:$0xff]  ;;  %v1813_v43 = vld [vmem:[#allocation2 + $0x5b8] sm:$0xff] }
 0x758   :  { %1945 = vmatpush.msrb.mxu3 %v1831_v42  ;;  %1918 = vmatpush.msra.mxu0 %v1813_v43  ;;  %v1850_v42 = vld [vmem:[#allocation2 + $0x6e0] sm:$0xff] }
 0x759   :  { %v1638_v46 = vadd.f32 %v1637_v44, %v1609_v21  ;;  %v1798_v21 = vld [vmem:[#allocation2 + $0x540] sm:$0xff] }
 0x75a   :  { %v1830_v44 = vld [vmem:[#allocation2 + $0x640] sm:$0xff]  ;;  %1919 = vmatpush.msra.mxu0 %v1812_v45  ;;  %v1847_v45 = vld [vmem:[#allocation2 + $0x6c8] sm:$0xff] }
 0x75b   :  { %v1667_v48 = vadd.f32 %v1666_v47, %v1638_v46  ;;  %1946 = vmatpush.msrb.mxu3 %v1830_v44  ;;  %v1781_v47 = vld [vmem:[#allocation2 + $0x4b8] sm:$0xff] }
 0x75d   :  { %v1671_v14 = vadd.f32 %v1670_v12, %v1667_v48  ;;  %v1797_v12 = vld [vmem:[#allocation2 + $0x538] sm:$0xff] }
 0x75f   :  { %v1672_v19 = vrot.slane %v1671_v14, 4 }
 0x761   :  { %v1673_v50 = vadd.f32 %v1672_v19, %v1671_v14  ;;  %v1811_v14 = vld [vmem:[#allocation2 + $0x5a8] sm:$0xff] }
 0x762   :  { %1920 = vmatpush.msra.mxu0 %v1811_v14 }
 0x763   :  { %v1674_v51 = vrot.slane %v1673_v50, 2 }
 0x765   :  { %v1675_v52 = vadd.f32 %v1674_v51, %v1673_v50  ;;  %v1780_v50 = vld [vmem:[#allocation2 + $0x4b0] sm:$0xff] }
 0x766   :  { %v1796_v51 = vld [vmem:[#allocation2 + $0x530] sm:$0xff] }
 0x767   :  { %v1676_v22 = vrot.slane %v1675_v52, 1 }
 0x769   :  { %v1677_v53 = vadd.f32 %v1676_v22, %v1675_v52  ;;  %v1828_v52 = vld [vmem:[#allocation2 + $0x630] sm:$0xff]  ;;  %v1810_v22 = vld [vmem:[#allocation2 + $0x5a0] sm:$0xff] }
 0x76a   :  { %1921 = vmatpush.msra.mxu0 %v1810_v22 }
 0x76b   :  { %v1678_v11 = vmul.f32 0.03125, %v1677_v53 }
 0x76c   :  { %1922 = vmatpush.msra.mxu0 %v1809_v59 }
 0x76d   :  { %v5209_v56 = vsub.f32 %v1658_v20, %v1678_v11  ;;  %v5211_v57 = vsub.f32 %v1661_v41, %v1678_v11  ;;  %v5213_v58 = vsub.f32 %v1664_v34, %v1678_v11  ;;  %v5215_v63 = vsub.f32 %v1667_v48, %v1678_v11  ;;  %v1799_v41 = vld [vmem:[#allocation2 + $0x548] sm:$0xff]  ;;  %v1782_v34 = vld [vmem:[#allocation2 + $0x4c0] sm:$0xff]  ;;  %v1829_v48 = vld [vmem:[#allocation2 + $0x638] sm:$0xff] }
 0x76e   :  { %1887 = vmatpush.msrb.mxu2 %v1799_v41  ;;  %1859 = vmatpush.msrb.mxu1 %v1782_v34  ;;  %v1795_v11 = vld [vmem:[#allocation2 + $0x528] sm:$0xff] }
 0x76f   :  { %v1683_v2 = vmul.f32 %v5209_v56, %v5209_v56  ;;  %v1684_v4 = vmul.f32 %v5211_v57, %v5211_v57  ;;  %v1685_v16 = vmul.f32 %v5213_v58, %v5213_v58  ;;  %v1686_v25 = vmul.f32 %v5215_v63, %v5215_v63  ;;  %1947 = vmatpush.msrb.mxu3 %v1829_v48 }
 0x770   :  { %1888 = vmatpush.msrb.mxu2 %v1798_v21  ;;  %1860 = vmatpush.msrb.mxu1 %v1781_v47  ;;  %v1848_v21 = vld [vmem:[#allocation2 + $0x6d0] sm:$0xff]  ;;  %v1708_v47 = vld [vmem:[#allocation2 + $0x468] sm:$0x1] }
 0x771   :  { %v1687_v1 = vadd.f32 %v1684_v4, %v1683_v2  ;;  %1948 = vmatpush.msrb.mxu3 %v1828_v52  ;;  %v1826_v2 = vld [vmem:[#allocation2 + $0x620] sm:$0xff]  ;;  %v1808_v4 = vld [vmem:[#allocation2 + $0x590] sm:$0xff] }
 0x772   :  { %1889 = vmatpush.msrb.mxu2 %v1797_v12  ;;  %1861 = vmatpush.msrb.mxu1 %v1780_v50  ;;  %v1846_v12 = vld [vmem:[#allocation2 + $0x6c0] sm:$0xff]  ;;  %v1844_v52 = vld [vmem:[#allocation2 + $0x6b0] sm:$0xff] }
 0x773   :  { %v1688_v27 = vadd.f32 %v1687_v1, %v1685_v16  ;;  %1949 = vmatpush.msrb.mxu3 %v1827_v49  ;;  %v1807_v16 = vld [vmem:[#allocation2 + $0x588] sm:$0xff]  ;;  %v1776_v1 = vld [vmem:[#allocation2 + $0x490] sm:$0xff]  ;;  %1923 = vmatpush.msra.mxu0 %v1808_v4 }
 0x774   :  { %1890 = vmatpush.msrb.mxu2 %v1796_v51  ;;  %1862 = vmatpush.msrb.mxu1 %v1779_v55  ;;  %v4452_v51 = vld [vmem:[#allocation2 + $0x470] ss:$0 sm:$0xff] }
 0x775   :  { %v1689_v36 = vadd.f32 %v1688_v27, %v1686_v25  ;;  %1950 = vmatpush.msrb.mxu3 %v1826_v2  ;;  %v1775_v25 = vld [vmem:[#allocation2 + $0x488] sm:$0xff]  ;;  %1924 = vmatpush.msra.mxu0 %v1807_v16 }
 0x776   :  { %1891 = vmatpush.msrb.mxu2 %v1795_v11  ;;  %1863 = vmatpush.msrb.mxu1 %v1778_v61  ;;  %v1791_v27 = vld [vmem:[#allocation2 + $0x508] sm:$0xff] }
 0x777   :  { %v1690_v39 = vrot.slane %v1689_v36, 4  ;;  %1951 = vmatpush.msrb.mxu3 %v1825_v15  ;;  %1925 = vmatpush.msra.mxu0 %v1806_v8  ;;  %v1843_v11 = vld [vmem:[#allocation2 + $0x6a8] sm:$0xff] }
 0x778   :  { %1892 = vmatpush.msrb.mxu2 %v1794_v62  ;;  %1864 = vmatpush.msrb.mxu1 %v1777_v5  ;;  %v1842_v62 = vld [vmem:[#allocation2 + $0x6a0] sm:$0xff] }
 0x779   :  { %v1691_v20 = vadd.f32 %v1690_v39, %v1689_v36  ;;  %1952 = vmatpush.msrb.mxu3 %v1824_v0  ;;  %v1822_v36 = vld [vmem:[#allocation2 + $0x600] sm:$0xff]  ;;  %1926 = vmatpush.msra.mxu0 %v1805_v32 }
 0x77a   :  { %1893 = vmatpush.msrb.mxu2 %v1793_v7  ;;  %1865 = vmatpush.msrb.mxu1 %v1776_v1  ;;  %v1840_v1 = vld [vmem:[#allocation2 + $0x690] sm:$0xff] }
 0x77b   :  { %v1692_v46 = vrot.slane %v1691_v20, 2  ;;  %1953 = vmatpush.msrb.mxu3 %v1823_v28 }
 0x77c   :  { %1894 = vmatpush.msrb.mxu2 %v1792_v18  ;;  %1866 = vmatpush.msrb.mxu1 %v1775_v25  ;;  %v1839_v25 = vld [vmem:[#allocation2 + $0x688] sm:$0xff] }
 0x77d   :  { %v1693_v19 = vadd.f32 %v1692_v46, %v1691_v20  ;;  %1954 = vmatpush.msrb.mxu3 %v1822_v36  ;;  %v1849_v20 = vld [vmem:[#allocation2 + $0x6d8] sm:$0xff] }
 0x77e   :  { %1895 = vmatpush.msrb.mxu2 %v1791_v27  ;;  %1867 = vmatpush.msrb.mxu1 %v1774_v33  ;;  %v1838_v27 = vld [vmem:[#allocation2 + $0x680] sm:$0xff] }
 0x77f   :  { %v1694_v53 = vrot.slane %v1693_v19, 1  ;;  %1955 = vmatpush.msrb.mxu3 %v1821_v23 }
 0x780   :  { %1896 = vmatpush.msrb.mxu2 %v1790_v17  ;;  %1868 = vmatpush.msrb.mxu1 %v1773_v37  ;;  %v1837_v17 = vld [vmem:[#allocation2 + $0x678] sm:$0xff] }
 0x781   :  { %v1695_v60 = vadd.f32 %v1694_v53, %v1693_v19  ;;  %v1845_v19 = vld [vmem:[#allocation2 + $0x6b8] sm:$0xff] }
 0x782   :  { %1897 = vmatpush.msrb.mxu2 %v1789_v29  ;;  %1969 = vmatpush.msra.mxu1 %v1852_v30 }
 0x783   :  { %v1696_v10 = vmul.f32 0.03125, %v1695_v60 }
 0x784   :  { %1970 = vmatpush.msra.mxu1 %v1851_v31 }
 0x785   :  { %v1697_v24 = vadd.f32 1e-05, %v1696_v10 }
 0x786   :  { %1971 = vmatpush.msra.mxu1 %v1850_v42 }
 0x787   :  { %4468 = vrsqrt.f32 %v1697_v24  ;;  %vm1704_vm15 = vweird.f32 %v1697_v24 }
 0x788   :  { %1972 = vmatpush.msra.mxu1 %v1849_v20  ;;  %v2271_v20 = vld [vmem:[#allocation2 + $0x948] sm:$0xff] }
 0x78a   :  { %1973 = vmatpush.msra.mxu1 %v1848_v21  ;;  %v2269_v21 = vld [vmem:[#allocation2 + $0x938] sm:$0xff] }
 0x78c   :  { %1974 = vmatpush.msra.mxu1 %v1847_v45 }
 0x78d   :  { %v4469_v39 = vpop.eup %4468 }
 0x78e   :  { %v1699_v41 = vmul.f32 %v4469_v39, %v1697_v24  ;;  %vm1705_vm12 = vweird.f32 %v4469_v39  ;;  %1975 = vmatpush.msra.mxu1 %v1846_v12  ;;  %v2267_v12 = vld [vmem:[#allocation2 + $0x928] sm:$0xff] }
 0x78f   :  { %vm1706_vm2 = vmor %vm1704_vm15, %vm1705_vm12  ;;  %vm5867_vm15 = vcmp.lt.s32.totalorder %v4664_v26, 14 }
 0x790   :  { %v1700_v43 = vmul.f32 %v4469_v39, %v1699_v41  ;;  %1976 = vmatpush.msra.mxu1 %v1845_v19  ;;  %vm5866_vm12 = vmmov %vm5865_vm6 }
 0x792   :  { %v1701_v34 = vmul.f32 0.5, %v1700_v43  ;;  %1977 = vmatpush.msra.mxu1 %v1844_v52  ;;  %v2272_v43 = vld [vmem:[#allocation2 + $0x950] sm:$0xff] }
 0x794   :  { %v1702_v44 = vsub.f32 1.5, %v1701_v34  ;;  %1978 = vmatpush.msra.mxu1 %v1843_v11  ;;  %v2270_v34 = vld [vmem:[#allocation2 + $0x940] sm:$0xff] }
 0x796   :  { %v1703_v46 = vmul.f32 %v4469_v39, %v1702_v44  ;;  %1979 = vmatpush.msra.mxu1 %v1842_v62 }
 0x798   :  { %v1707_v48 = vsel %vm1706_vm2, %v4469_v39, %v1703_v46  ;;  %vm5868_vm2 = vmmov %vm5865_vm6 }
 0x799   :  { %v1709_v14 = vmul.f32 %v1708_v47, %v1707_v48  ;;  %v2268_v47 = vld [vmem:[#allocation2 + $0x930] sm:$0xff]  ;;  %v2266_v48 = vld [vmem:[#allocation2 + $0x920] sm:$0xff] }
 0x79b   :  { %v1710_v50 = vperm.slane %v1709_v14, 0 }
 0x79d   :  { %v1712_v22 = vmul.f32 %v1710_v50, %v5211_v57  ;;  %v1714_v53 = vmul.f32 %v1710_v50, %v5215_v63  ;;  %v1711_v55 = vmul.f32 %v1710_v50, %v5209_v56  ;;  %v1713_v49 = vmul.f32 %v1710_v50, %v5213_v58  ;;  %v1841_v57 = vld [vmem:[#allocation2 + $0x698] sm:$0xff] }
 0x79e   :  { %1980 = vmatpush.msra.mxu1 %v1841_v57  ;;  %v2265_v50 = vld [vmem:[#allocation2 + $0x918] sm:$0xff] }
 0x79f   :  { %v1718_v59 = vadd.f32 %v4452_v51, %v1712_v22  ;;  %v1720_v60 = vadd.f32 %v4452_v51, %v1714_v53  ;;  %v1717_v61 = vadd.f32 %v4452_v51, %v1711_v55  ;;  %v1719_v7 = vadd.f32 %v4452_v51, %v1713_v49 }
 0x7a0   :  { %1981 = vmatpush.msra.mxu1 %v1840_v1 }
 0x7a1   :  { %v5229_v2 = vmax.f32 %v1718_v59, 0.0  ;;  %v5231_v4 = vmax.f32 %v1720_v60, 0.0  ;;  %v5233_v5 = vmax.f32 %v1717_v61, 0.0  ;;  %v5246_v24 = vmax.f32 %v1719_v7, 0.0 }
 0x7a2   :  { %1982 = vmatpush.msra.mxu1 %v1839_v25 }
 0x7a3   :  { %1927 = vmatmul.f32.vlgmr.msra.gmra.mxu0 %v5233_v5  ;;  %v1725_v56 = vrot.slane %v5233_v5, 6  ;;  %v1728_v58 = vrot.slane %v5231_v4, 6  ;;  %v1737_v63 = vrot.slane %v5233_v5, 7  ;;  %v1740_v10 = vrot.slane %v5231_v4, 7 }
 0x7a4   :  { %v1749_v15 = vrot.slane %v5233_v5, 1  ;;  %v1750_v16 = vrot.slane %v5229_v2, 1  ;;  %v1726_v28 = vrot.slane %v5229_v2, 6  ;;  %v1738_v32 = vrot.slane %v5229_v2, 7  ;;  %1983 = vmatpush.msra.mxu1 %v1838_v27 }
 0x7a5   :  { %v1732_v18 = vsel %vm122_vm0, %v1728_v58, %v1725_v56  ;;  %v1744_v0 = vsel %vm139_vm3, %v1740_v10, %v1737_v63  ;;  %v1751_v33 = vrot.slane %v5246_v24, 1  ;;  %v1727_v23 = vrot.slane %v5246_v24, 6 }
 0x7a6   :  { %4275 = vmatmul.msk.f32.vlgmr.msrb.gmra.mxu1 %vm5863_vm4, %v1732_v18  ;;  %4277 = vmatmul.msk.f32.vlgmr.msrb.gmra.mxu2 %vm144_vm5, %v1744_v0  ;;  %v1755_v8 = vsel %vm156_vm1, %v1749_v15, %v1750_v16  ;;  %v1731_v36 = vsel %vm122_vm0, %v1725_v56, %v1726_v28  ;;  %v1743_v37 = vsel %vm139_vm3, %v1737_v63, %v1738_v32  ;;  %v1739_v30 = vrot.slane %v5246_v24, 7  ;;  %vm5869_vm4 = vmmov %vm5868_vm2 }
 0x7a7   :  { %1956 = vmatmul.f32.vlgmr.msrb.gmra.mxu3 %v1755_v8  ;;  %1984 = vmatpush.msra.mxu1 %v1837_v17  ;;  %v1754_v29 = vsel %vm156_vm1, %v1750_v16, %v1751_v33  ;;  %v1752_v39 = vrot.slane %v5231_v4, 1  ;;  %v1730_v31 = vsel %vm122_vm0, %v1726_v28, %v1727_v23  ;;  %v1729_v44 = vsel %vm122_vm0, %v1727_v23, %v1728_v58 }
 0x7a8   :  { %v1742_v41 = vsel %vm139_vm3, %v1738_v32, %v1739_v30  ;;  %v1741_v45 = vsel %vm139_vm3, %v1739_v30, %v1740_v10  ;;  %v1761_v14 = vrot.slane %v5233_v5, 2  ;;  %v1762_v19 = vrot.slane %v5229_v2, 2 }
 0x7a9   :  { %v1753_v42 = vsel %vm156_vm1, %v1751_v33, %v1752_v39  ;;  %2289 = vmatpush.msrb.mxu1 %v2272_v43  ;;  %v1756_v46 = vsel %vm156_vm1, %v1752_v39, %v1749_v15  ;;  %v1763_v52 = vrot.slane %v5246_v24, 2  ;;  %v1764_v53 = vrot.slane %v5231_v4, 2 }
 0x7aa   :  { %v1767_v51 = vsel %vm5865_vm6, %v1761_v14, %v1762_v19 }
 0x7ab   :  { %1930 = vmatmul.f32.gmra.mxu0 %v5229_v2  ;;  %2290 = vmatpush.msrb.mxu1 %v2271_v20  ;;  %v1766_v22 = vsel %vm5866_vm12, %v1762_v19, %v1763_v52  ;;  %v1765_v55 = vsel %vm5868_vm2, %v1763_v52, %v1764_v53  ;;  %v1768_v11 = vsel %vm5869_vm4, %v1764_v53, %v1761_v14  ;;  %v2093_v19 = vld [vmem:[#allocation2 + $0x780] sm:$0xff] }
 0x7ac   :  { %2126 = vmatpush.msra.mxu2 %v2093_v19  ;;  %v2112_v19 = vld [vmem:[#allocation2 + $0x818] sm:$0xff] }
 0x7ad   :  { %2291 = vmatpush.msrb.mxu1 %v2270_v34 }
 0x7ae   :  { %1872 = vmatmul.f32.gmra.mxu1 %v1731_v36  ;;  %1901 = vmatmul.f32.gmra.mxu2 %v1743_v37 }
 0x7af   :  { %4279 = vmatmul.msk.f32.gmra.mxu3 %vm162_vm8, %v1754_v29  ;;  %2292 = vmatpush.msrb.mxu1 %v2269_v21 }
 0x7b1   :  { %2293 = vmatpush.msrb.mxu1 %v2268_v47  ;;  %v2108_v47 = vld [vmem:[#allocation2 + $0x7f8] sm:$0xff] }
 0x7b3   :  { %1933 = vmatmul.f32.gmra.mxu0 %v5246_v24  ;;  %2294 = vmatpush.msrb.mxu1 %v2267_v12 }
 0x7b5   :  { %2295 = vmatpush.msrb.mxu1 %v2266_v48 }
 0x7b6   :  { %4276 = vmatmul.msk.f32.gmra.mxu1 %vm5864_vm11, %v1730_v31  ;;  %4278 = vmatmul.msk.f32.gmra.mxu2 %vm146_vm9, %v1742_v41  ;;  %vm5870_vm11 = vcmp.lt.s32.totalorder %v4732_v54, 14 }
 0x7b7   :  { %1962 = vmatmul.f32.gmra.mxu3 %v1753_v42  ;;  %2296 = vmatpush.msrb.mxu1 %v2265_v50  ;;  %v2125_v50 = vld [vmem:[#allocation2 + $0x880] sm:$0xff] }
 0x7b8   :  { %2184 = vmatpush.msra.mxu3 %v2125_v50  ;;  %v2094_v50 = vld [vmem:[#allocation2 + $0x788] sm:$0xff] }
 0x7bb   :  { %1936 = vmatmul.f32.gmra.mxu0 %v5231_v4 }
 0x7be   :  { %1878 = vmatmul.f32.gmra.mxu1 %v1729_v44  ;;  %1907 = vmatmul.f32.gmra.mxu2 %v1741_v45  ;;  %v2109_v45 = vld [vmem:[#allocation2 + $0x800] sm:$0xff] }
 0x7bf   :  { %4280 = vmatmul.msk.f32.gmra.mxu3 %vm164_vm13, %v1756_v46  ;;  %2155 = vmatpush.msrb.mxu0 %v2109_v45  ;;  %v2113_v45 = vld [vmem:[#allocation2 + $0x820] sm:$0xff] }
 0x7c1   :  { %2156 = vmatpush.msrb.mxu0 %v2108_v47  ;;  %v2080_v47 = vld [vmem:[#allocation2 + $0x718] sm:$0xff] }
 0x7c6   :  { %1985 = vmatmul.f32.vlgmr.msra.gmra.mxu1 %v1767_v51  ;;  %v2107_v51 = vld [vmem:[#allocation2 + $0x7f0] sm:$0xff] }
 0x7c7   :  { %2157 = vmatpush.msrb.mxu0 %v2107_v51  ;;  %v2079_v51 = vld [vmem:[#allocation2 + $0x710] sm:$0xff] }
 0x7ce   :  { %4281 = vmatmul.msk.f32.gmra.mxu1 %vm5867_vm15, %v1766_v22 }
 0x7d6   :  { %1991 = vmatmul.f32.gmra.mxu1 %v1765_v55  ;;  %v2092_v55 = vld [vmem:[#allocation2 + $0x778] sm:$0xff] }
 0x7d7   :  { %2127 = vmatpush.msra.mxu2 %v2092_v55  ;;  %v2110_v55 = vld [vmem:[#allocation2 + $0x808] sm:$0xff] }
 0x7de   :  { %4282 = vmatmul.msk.f32.gmra.mxu1 %vm5870_vm11, %v1768_v11  ;;  %v2124_v11 = vld [vmem:[#allocation2 + $0x878] sm:$0xff] }
 0x7df   :  { %2185 = vmatpush.msra.mxu3 %v2124_v11 }
 0x7e6   :  { %4287 = vmatmul.msk.f32.vlgmr.msrb.gmra.mxu1 %vm379_vm10, %v5064_v3 }
 0x7ee   :  { %4288 = vmatmul.msk.f32.gmra.mxu1 %vm379_vm10, %v5067_v38 }
 0x7f6   :  { %4289 = vmatmul.msk.f32.gmra.mxu1 %vm379_vm10, %v5071_v40 }
 0x7fe   :  { %4290 = vmatmul.msk.f32.gmra.mxu1 %vm379_vm10, %v5089_v13 }
 0x820   :  { %v1928_v62 = vpop.f32.mrf.mxu0 }
 0x823   :  { %v1870_v49 = vpop.f32.mrf.mxu1 }
 0x828   :  { %v1931_v57 = vpop.f32.mrf.mxu0 }
 0x829   :  { %v1899_v60 = vpop.f32.mrf.mxu2 }
 0x82a   :  { %v1957_v2 = vpop.f32.mrf.mxu3  ;;  %v1900_v10 = vadd.f32 %v1899_v60, %v1870_v49  ;;  %v2106_v49 = vld [vmem:[#allocation2 + $0x7e8] sm:$0xff] }
 0x82b   :  { %v1873_v59 = vpop.f32.mrf.mxu1  ;;  %2158 = vmatpush.msrb.mxu0 %v2106_v49 }
 0x82c   :  { %v1929_v1 = vadd.f32 %v1928_v62, %v1900_v10  ;;  %v2123_v62 = vld [vmem:[#allocation2 + $0x870] sm:$0xff] }
 0x82d   :  { %2186 = vmatpush.msra.mxu3 %v2123_v62 }
 0x82e   :  { %v1958_v27 = vadd.f32 %v1957_v2, %v1929_v1  ;;  %v2105_v2 = vld [vmem:[#allocation2 + $0x7e0] sm:$0xff]  ;;  %v2087_v1 = vld [vmem:[#allocation2 + $0x750] sm:$0xff] }
 0x82f   :  { %2159 = vmatpush.msrb.mxu0 %v2105_v2  ;;  %v2037_v2 = vld [vmem:[#allocation2 + $0x6f8] sm:$0x1] }
 0x830   :  { %v1934_v58 = vpop.f32.mrf.mxu0 }
 0x831   :  { %v1902_v4 = vpop.f32.mrf.mxu2 }
 0x832   :  { %v1960_v3 = vpop.f32.mrf.mxu3  ;;  %v1903_v63 = vadd.f32 %v1902_v4, %v1873_v59 }
 0x833   :  { %v1876_v61 = vpop.f32.mrf.mxu1 }
 0x834   :  { %v1932_v13 = vadd.f32 %v1931_v57, %v1903_v63  ;;  %v2090_v57 = vld [vmem:[#allocation2 + $0x768] sm:$0xff]  ;;  %v2103_v63 = vld [vmem:[#allocation2 + $0x7d0] sm:$0xff] }
 0x836   :  { %v1961_v8 = vadd.f32 %v1960_v3, %v1932_v13  ;;  %v2104_v3 = vld [vmem:[#allocation2 + $0x7d8] sm:$0xff] }
 0x837   :  { %2160 = vmatpush.msrb.mxu0 %v2104_v3 }
 0x838   :  { %v1937_v25 = vpop.f32.mrf.mxu0 }
 0x839   :  { %v1905_v56 = vpop.f32.mrf.mxu2  ;;  %2161 = vmatpush.msrb.mxu0 %v2103_v63 }
 0x83a   :  { %v1906_v40 = vadd.f32 %v1905_v56, %v1876_v61  ;;  %v1963_v15 = vpop.f32.mrf.mxu3  ;;  %v2091_v61 = vld [vmem:[#allocation2 + $0x770] sm:$0xff] }
 0x83b   :  { %v1879_v5 = vpop.f32.mrf.mxu1  ;;  %2128 = vmatpush.msra.mxu2 %v2091_v61 }
 0x83c   :  { %v1935_v18 = vadd.f32 %v1934_v58, %v1906_v40  ;;  %v2089_v58 = vld [vmem:[#allocation2 + $0x760] sm:$0xff]  ;;  %v2088_v40 = vld [vmem:[#allocation2 + $0x758] sm:$0xff] }
 0x83d   :  { %2129 = vmatpush.msra.mxu2 %v2090_v57 }
 0x83e   :  { %v1964_v28 = vadd.f32 %v1963_v15, %v1935_v18  ;;  %v2120_v15 = vld [vmem:[#allocation2 + $0x858] sm:$0xff]  ;;  %v2119_v18 = vld [vmem:[#allocation2 + $0x850] sm:$0xff] }
 0x83f   :  { %2130 = vmatpush.msra.mxu2 %v2089_v58 }
 0x841   :  { %v1908_v16 = vpop.f32.mrf.mxu2  ;;  %2131 = vmatpush.msra.mxu2 %v2088_v40 }
 0x842   :  { %v1909_v0 = vadd.f32 %v1908_v16, %v1879_v5  ;;  %v1966_v37 = vpop.f32.mrf.mxu3  ;;  %v2102_v16 = vld [vmem:[#allocation2 + $0x7c8] sm:$0xff] }
 0x843   :  { %v1986_v7 = vpop.f32.mrf.mxu1  ;;  %2162 = vmatpush.msrb.mxu0 %v2102_v16  ;;  %2132 = vmatpush.msra.mxu2 %v2087_v1 }
 0x844   :  { %v1938_v32 = vadd.f32 %v1937_v25, %v1909_v0  ;;  %v1987_v17 = vadd.f32 %v1986_v7, %v1958_v27  ;;  %v2122_v7 = vld [vmem:[#allocation2 + $0x868] sm:$0xff]  ;;  %v2101_v0 = vld [vmem:[#allocation2 + $0x7c0] sm:$0xff]  ;;  %v2100_v27 = vld [vmem:[#allocation2 + $0x7b8] sm:$0xff] }
 0x845   :  { %2187 = vmatpush.msra.mxu3 %v2122_v7  ;;  %2163 = vmatpush.msrb.mxu0 %v2101_v0  ;;  %v2118_v25 = vld [vmem:[#allocation2 + $0x848] sm:$0xff]  ;;  %v4453_v7 = vld [vmem:[#allocation2 + $0x700] ss:$0 sm:$0xff] }
 0x846   :  { %v1967_v29 = vadd.f32 %v1966_v37, %v1938_v32  ;;  %v2085_v32 = vld [vmem:[#allocation2 + $0x740] sm:$0xff]  ;;  %v2084_v37 = vld [vmem:[#allocation2 + $0x738] sm:$0xff] }
 0x847   :  { %2164 = vmatpush.msrb.mxu0 %v2100_v27 }
 0x84b   :  { %v1989_v38 = vpop.f32.mrf.mxu1 }
 0x84c   :  { %v1990_v33 = vadd.f32 %v1989_v38, %v1961_v8  ;;  %v2121_v38 = vld [vmem:[#allocation2 + $0x860] sm:$0xff]  ;;  %v2086_v8 = vld [vmem:[#allocation2 + $0x748] sm:$0xff] }
 0x84d   :  { %2188 = vmatpush.msra.mxu3 %v2121_v38  ;;  %2133 = vmatpush.msra.mxu2 %v2086_v8 }
 0x84e   :  { %v1998_v23 = vadd.f32 %v1990_v33, %v1987_v17 }
 0x84f   :  { %2189 = vmatpush.msra.mxu3 %v2120_v15  ;;  %2134 = vmatpush.msra.mxu2 %v2085_v32 }
 0x851   :  { %2190 = vmatpush.msra.mxu3 %v2119_v18  ;;  %2135 = vmatpush.msra.mxu2 %v2084_v37 }
 0x853   :  { %v1992_v24 = vpop.f32.mrf.mxu1  ;;  %2191 = vmatpush.msra.mxu3 %v2118_v25 }
 0x854   :  { %v1993_v36 = vadd.f32 %v1992_v24, %v1964_v28 }
 0x856   :  { %v1999_v39 = vadd.f32 %v1998_v23, %v1993_v36  ;;  %v2098_v23 = vld [vmem:[#allocation2 + $0x7a8] sm:$0xff] }
 0x85b   :  { %v1995_v30 = vpop.f32.mrf.mxu1 }
 0x85c   :  { %v1996_v31 = vadd.f32 %v1995_v30, %v1967_v29  ;;  %v2116_v29 = vld [vmem:[#allocation2 + $0x838] sm:$0xff] }
 0x85e   :  { %v2000_v41 = vadd.f32 %v1999_v39, %v1996_v31  ;;  %v2083_v39 = vld [vmem:[#allocation2 + $0x730] sm:$0xff] }
 0x85f   :  { %2136 = vmatpush.msra.mxu2 %v2083_v39 }
 0x860   :  { %v2001_v42 = vrot.slane %v2000_v41, 4 }
 0x862   :  { %v2002_v43 = vadd.f32 %v2001_v42, %v2000_v41  ;;  %v2097_v41 = vld [vmem:[#allocation2 + $0x7a0] sm:$0xff] }
 0x864   :  { %v2003_v20 = vrot.slane %v2002_v43, 2 }
 0x866   :  { %v2004_v34 = vadd.f32 %v2003_v20, %v2002_v43  ;;  %v2082_v43 = vld [vmem:[#allocation2 + $0x728] sm:$0xff] }
 0x867   :  { %v2114_v20 = vld [vmem:[#allocation2 + $0x828] sm:$0xff]  ;;  %2137 = vmatpush.msra.mxu2 %v2082_v43 }
 0x868   :  { %v2005_v21 = vrot.slane %v2004_v34, 1 }
 0x86a   :  { %v2006_v44 = vadd.f32 %v2005_v21, %v2004_v34  ;;  %v2096_v34 = vld [vmem:[#allocation2 + $0x798] sm:$0xff] }
 0x86c   :  { %v2007_v46 = vmul.f32 0.03125, %v2006_v44  ;;  %v2081_v44 = vld [vmem:[#allocation2 + $0x720] sm:$0xff] }
 0x86d   :  { %2138 = vmatpush.msra.mxu2 %v2081_v44 }
 0x86e   :  { %v5313_v12 = vsub.f32 %v1987_v17, %v2007_v46  ;;  %v5315_v48 = vsub.f32 %v1990_v33, %v2007_v46  ;;  %v5317_v14 = vsub.f32 %v1993_v36, %v2007_v46  ;;  %v5319_v52 = vsub.f32 %v1996_v31, %v2007_v46  ;;  %v2117_v33 = vld [vmem:[#allocation2 + $0x840] sm:$0xff]  ;;  %v2099_v17 = vld [vmem:[#allocation2 + $0x7b0] sm:$0xff] }
 0x86f   :  { %2192 = vmatpush.msra.mxu3 %v2117_v33  ;;  %2165 = vmatpush.msrb.mxu0 %v2099_v17  ;;  %v2115_v31 = vld [vmem:[#allocation2 + $0x830] sm:$0xff] }
 0x870   :  { %v2012_v22 = vmul.f32 %v5313_v12, %v5313_v12  ;;  %v2013_v53 = vmul.f32 %v5315_v48, %v5315_v48  ;;  %v2014_v59 = vmul.f32 %v5317_v14, %v5317_v14  ;;  %v2015_v4 = vmul.f32 %v5319_v52, %v5319_v52  ;;  %v2095_v46 = vld [vmem:[#allocation2 + $0x790] sm:$0xff]  ;;  %2139 = vmatpush.msra.mxu2 %v2080_v47 }
 0x871   :  { %2193 = vmatpush.msra.mxu3 %v2116_v29  ;;  %2166 = vmatpush.msrb.mxu0 %v2098_v23 }
 0x872   :  { %v2016_v60 = vadd.f32 %v2013_v53, %v2012_v22  ;;  %v2111_v22 = vld [vmem:[#allocation2 + $0x810] sm:$0xff]  ;;  %2140 = vmatpush.msra.mxu2 %v2079_v51  ;;  %v2078_v53 = vld [vmem:[#allocation2 + $0x708] sm:$0xff] }
 0x873   :  { %2194 = vmatpush.msra.mxu3 %v2115_v31  ;;  %2167 = vmatpush.msrb.mxu0 %v2097_v41 }
 0x874   :  { %v2017_v5 = vadd.f32 %v2016_v60, %v2014_v59  ;;  %2141 = vmatpush.msra.mxu2 %v2078_v53 }
 0x875   :  { %2195 = vmatpush.msra.mxu3 %v2114_v20  ;;  %2168 = vmatpush.msrb.mxu0 %v2096_v34 }
 0x876   :  { %v2018_v56 = vadd.f32 %v2017_v5, %v2015_v4 }
 0x877   :  { %2196 = vmatpush.msra.mxu3 %v2113_v45  ;;  %2169 = vmatpush.msrb.mxu0 %v2095_v46 }
 0x878   :  { %v2019_v10 = vrot.slane %v2018_v56, 4 }
 0x879   :  { %2197 = vmatpush.msra.mxu3 %v2112_v19  ;;  %2170 = vmatpush.msrb.mxu0 %v2094_v50 }
 0x87a   :  { %v2020_v13 = vadd.f32 %v2019_v10, %v2018_v56 }
 0x87b   :  { %2198 = vmatpush.msra.mxu3 %v2111_v22 }
 0x87c   :  { %v2021_v24 = vrot.slane %v2020_v13, 2 }
 0x87d   :  { %2199 = vmatpush.msra.mxu3 %v2110_v55 }
 0x87e   :  { %v2022_v28 = vadd.f32 %v2021_v24, %v2020_v13 }
 0x880   :  { %v2023_v36 = vrot.slane %v2022_v28, 1 }
 0x882   :  { %v2024_v30 = vadd.f32 %v2023_v36, %v2022_v28 }
 0x884   :  { %v2025_v42 = vmul.f32 0.03125, %v2024_v30 }
 0x886   :  { %v2026_v21 = vadd.f32 1e-05, %v2025_v42 }
 0x888   :  { %4470 = vrsqrt.f32 %v2026_v21  ;;  %vm2033_vm6 = vweird.f32 %v2026_v21 }
 0x88e   :  { %v4471_v11 = vpop.eup %4470 }
 0x88f   :  { %v2028_v49 = vmul.f32 %v4471_v11, %v2026_v21  ;;  %vm2034_vm10 = vweird.f32 %v4471_v11 }
 0x890   :  { %vm2035_vm12 = vmor %vm2033_vm6, %vm2034_vm10 }
 0x891   :  { %v2029_v59 = vmul.f32 %v4471_v11, %v2028_v49 }
 0x893   :  { %v2030_v60 = vmul.f32 0.5, %v2029_v59 }
 0x895   :  { %v2031_v61 = vsub.f32 1.5, %v2030_v60 }
 0x897   :  { %v2032_v62 = vmul.f32 %v4471_v11, %v2031_v61 }
 0x899   :  { %v2036_v4 = vsel %vm2035_vm12, %v4471_v11, %v2032_v62  ;;  %vm5871_vm12 = vcmp.lt.s32.totalorder %v4612_v6, 5 }
 0x89a   :  { %v2038_v5 = vmul.f32 %v2037_v2, %v2036_v4 }
 0x89c   :  { %v2039_v57 = vperm.slane %v2038_v5, 0  ;;  %v2378_v5 = vld [vmem:[#allocation2 + $0x910] sm:$0xff] }
 0x89d   :  { %2379 = vmatpush.msrb.mxu2 %v2378_v5 }
 0x89e   :  { %v2043_v3 = vmul.f32 %v2039_v57, %v5319_v52  ;;  %v2040_v56 = vmul.f32 %v2039_v57, %v5313_v12  ;;  %v2041_v58 = vmul.f32 %v2039_v57, %v5315_v48  ;;  %v2042_v38 = vmul.f32 %v2039_v57, %v5317_v14 }
 0x8a0   :  { %v2049_v63 = vadd.f32 %v4453_v7, %v2043_v3  ;;  %v2046_v10 = vadd.f32 %v4453_v7, %v2040_v56  ;;  %v2047_v40 = vadd.f32 %v4453_v7, %v2041_v58  ;;  %v2048_v1 = vadd.f32 %v4453_v7, %v2042_v38  ;;  %v2377_v7 = vld [vmem:[#allocation2 + $0x908] sm:$0xff]  ;;  %v2376_v56 = vld [vmem:[#allocation2 + $0x900] sm:$0xff] }
 0x8a1   :  { %2380 = vmatpush.msrb.mxu2 %v2377_v7 }
 0x8a2   :  { %v2053_v15 = vmax.f32 %v2049_v63, 0.0  ;;  %v2050_v16 = vmax.f32 %v2046_v10, 0.0  ;;  %v2051_v13 = vmax.f32 %v2047_v40, 0.0  ;;  %v2052_v48 = vmax.f32 %v2048_v1, 0.0  ;;  %v2375_v10 = vld [vmem:[#allocation2 + $0x8f8] sm:$0xff] }
 0x8a3   :  { %2381 = vmatpush.msrb.mxu2 %v2376_v56 }
 0x8a4   :  { %2171 = vmatmul.f32.vlgmr.msrb.gmra.mxu0 %v2050_v16  ;;  %v2054_v18 = vrot.slane %v2050_v16, 7  ;;  %v2057_v0 = vrot.slane %v2053_v15, 7  ;;  %v2066_v24 = vrot.slane %v2050_v16, 1  ;;  %v2067_v8 = vrot.slane %v2051_v13, 1 }
 0x8a5   :  { %v2055_v14 = vrot.slane %v2051_v13, 7  ;;  %v2068_v25 = vrot.slane %v2052_v48, 1  ;;  %v2056_v32 = vrot.slane %v2052_v48, 7  ;;  %v2069_v33 = vrot.slane %v2053_v15, 1  ;;  %2382 = vmatpush.msrb.mxu2 %v2375_v10 }
 0x8a6   :  { %v2061_v52 = vsel %vm139_vm3, %v2057_v0, %v2054_v18  ;;  %v2072_v12 = vsel %vm156_vm1, %v2066_v24, %v2067_v8 }
 0x8a7   :  { %4283 = vmatmul.msk.f32.vlgmr.msra.gmra.mxu2 %vm144_vm5, %v2061_v52  ;;  %2200 = vmatmul.f32.vlgmr.msra.gmra.mxu3 %v2072_v12  ;;  %v2060_v27 = vsel %vm139_vm3, %v2054_v18, %v2055_v14  ;;  %v2071_v28 = vsel %vm156_vm1, %v2067_v8, %v2068_v25  ;;  %v2059_v17 = vsel %vm139_vm3, %v2055_v14, %v2056_v32  ;;  %v2372_v52 = vld [vmem:[#allocation2 + $0x8e0] sm:$0xff] }
 0x8a8   :  { %v2070_v36 = vsel %vm156_vm1, %v2068_v25, %v2069_v33  ;;  %v2058_v37 = vsel %vm139_vm3, %v2056_v32, %v2057_v0  ;;  %v2073_v29 = vsel %vm156_vm1, %v2069_v33, %v2066_v24  ;;  %v2373_v0 = vld [vmem:[#allocation2 + $0x8e8] sm:$0xff]  ;;  %v2370_v25 = vld [vmem:[#allocation2 + $0x8d0] sm:$0xff]  ;;  %v2368_v33 = vld [vmem:[#allocation2 + $0x8c0] sm:$0xff] }
 0x8ac   :  { %2174 = vmatmul.f32.gmra.mxu0 %v2051_v13  ;;  %v2374_v13 = vld [vmem:[#allocation2 + $0x8f0] sm:$0xff] }
 0x8ad   :  { %2383 = vmatpush.msrb.mxu2 %v2374_v13 }
 0x8af   :  { %2145 = vmatmul.f32.gmra.mxu2 %v2060_v27  ;;  %4285 = vmatmul.msk.f32.gmra.mxu3 %vm162_vm8, %v2071_v28  ;;  %v2369_v28 = vld [vmem:[#allocation2 + $0x8c8] sm:$0xff] }
 0x8b0   :  { %2384 = vmatpush.msrb.mxu2 %v2373_v0 }
 0x8b2   :  { %2385 = vmatpush.msrb.mxu2 %v2372_v52 }
 0x8b4   :  { %2177 = vmatmul.f32.gmra.mxu0 %v2052_v48  ;;  %v2371_v48 = vld [vmem:[#allocation2 + $0x8d8] sm:$0xff] }
 0x8b5   :  { %2386 = vmatpush.msrb.mxu2 %v2371_v48 }
 0x8b7   :  { %4284 = vmatmul.msk.f32.gmra.mxu2 %vm146_vm9, %v2059_v17  ;;  %2206 = vmatmul.f32.gmra.mxu3 %v2070_v36  ;;  %v2367_v36 = vld [vmem:[#allocation2 + $0x8b8] sm:$0xff] }
 0x8b8   :  { %2387 = vmatpush.msrb.mxu2 %v2370_v25 }
 0x8ba   :  { %2388 = vmatpush.msrb.mxu2 %v2369_v28 }
 0x8bc   :  { %2180 = vmatmul.f32.gmra.mxu0 %v2053_v15  ;;  %2389 = vmatpush.msrb.mxu2 %v2368_v33 }
 0x8be   :  { %2390 = vmatpush.msrb.mxu2 %v2367_v36 }
 0x8bf   :  { %2151 = vmatmul.f32.gmra.mxu2 %v2058_v37  ;;  %4286 = vmatmul.msk.f32.gmra.mxu3 %vm164_vm13, %v2073_v29  ;;  %v2366_v37 = vld [vmem:[#allocation2 + $0x8b0] sm:$0xff] }
 0x8c0   :  { %2391 = vmatpush.msrb.mxu2 %v2366_v37 }
 0x921   :  { %v2172_v23 = vpop.f32.mrf.mxu0 }
 0x929   :  { %v2175_v31 = vpop.f32.mrf.mxu0 }
 0x92a   :  { %v2143_v30 = vpop.f32.mrf.mxu2  ;;  %v2201_v39 = vpop.f32.mrf.mxu3 }
 0x92b   :  { %v2173_v44 = vadd.f32 %v2172_v23, %v2143_v30  ;;  %v2365_v23 = vld [vmem:[#allocation2 + $0x8a8] sm:$0xff] }
 0x92c   :  { %2392 = vmatpush.msrb.mxu2 %v2365_v23 }
 0x92d   :  { %v2202_v47 = vadd.f32 %v2201_v39, %v2173_v44  ;;  %v2364_v39 = vld [vmem:[#allocation2 + $0x8a0] sm:$0xff] }
 0x92e   :  { %2393 = vmatpush.msrb.mxu2 %v2364_v39 }
 0x931   :  { %v2178_v43 = vpop.f32.mrf.mxu0 }
 0x932   :  { %v2146_v41 = vpop.f32.mrf.mxu2  ;;  %v2204_v42 = vpop.f32.mrf.mxu3 }
 0x933   :  { %v2176_v34 = vadd.f32 %v2175_v31, %v2146_v41  ;;  %v2363_v41 = vld [vmem:[#allocation2 + $0x898] sm:$0xff] }
 0x934   :  { %2394 = vmatpush.msrb.mxu2 %v2363_v41 }
 0x935   :  { %v2205_v46 = vadd.f32 %v2204_v42, %v2176_v34 }
 0x937   :  { %v2213_v22 = vadd.f32 %v2205_v46, %v2202_v47 }
 0x939   :  { %v2181_v50 = vpop.f32.mrf.mxu0 }
 0x93a   :  { %v2149_v20 = vpop.f32.mrf.mxu2  ;;  %v2207_v21 = vpop.f32.mrf.mxu3 }
 0x93b   :  { %v2179_v45 = vadd.f32 %v2178_v43, %v2149_v20 }
 0x93d   :  { %v2208_v19 = vadd.f32 %v2207_v21, %v2179_v45 }
 0x93f   :  { %v2214_v11 = vadd.f32 %v2213_v22, %v2208_v19 }
 0x942   :  { %v2152_v51 = vpop.f32.mrf.mxu2  ;;  %v2210_v55 = vpop.f32.mrf.mxu3 }
 0x943   :  { %v2182_v53 = vadd.f32 %v2181_v50, %v2152_v51  ;;  %v4455_v51 = vld [vmem:[#allocation2 + $0x890] ss:$0 sm:$0xff] }
 0x945   :  { %v2211_v49 = vadd.f32 %v2210_v55, %v2182_v53 }
 0x947   :  { %v2215_v59 = vadd.f32 %v2214_v11, %v2211_v49 }
 0x949   :  { %v2216_v60 = vrot.slane %v2215_v59, 4 }
 0x94b   :  { %v2217_v61 = vadd.f32 %v2216_v60, %v2215_v59 }
 0x94d   :  { %v2218_v62 = vrot.slane %v2217_v61, 2 }
 0x94f   :  { %v2219_v2 = vadd.f32 %v2218_v62, %v2217_v61 }
 0x951   :  { %v2220_v4 = vrot.slane %v2219_v2, 1 }
 0x953   :  { %v2221_v57 = vadd.f32 %v2220_v4, %v2219_v2 }
 0x955   :  { %v2222_v3 = vmul.f32 0.03125, %v2221_v57 }
 0x957   :  { %v5357_v58 = vsub.f32 %v2202_v47, %v2222_v3  ;;  %v2224_v38 = vsub.f32 %v2205_v46, %v2222_v3  ;;  %v2225_v63 = vsub.f32 %v2208_v19, %v2222_v3  ;;  %v2226_v40 = vsub.f32 %v2211_v49, %v2222_v3  ;;  %v2252_v46 = vld [vmem:[#allocation2 + $0x888] sm:$0x1] }
 0x959   :  { %v2227_v15 = vmul.f32 %v5357_v58, %v5357_v58  ;;  %v2228_v16 = vmul.f32 %v2224_v38, %v2224_v38  ;;  %v2229_v1 = vmul.f32 %v2225_v63, %v2225_v63  ;;  %v2230_v24 = vmul.f32 %v2226_v40, %v2226_v40 }
 0x95b   :  { %v2231_v18 = vadd.f32 %v2228_v16, %v2227_v15 }
 0x95d   :  { %v2232_v8 = vadd.f32 %v2231_v18, %v2229_v1 }
 0x95f   :  { %v2233_v12 = vadd.f32 %v2232_v8, %v2230_v24 }
 0x961   :  { %v2234_v14 = vrot.slane %v2233_v12, 4 }
 0x963   :  { %v2235_v27 = vadd.f32 %v2234_v14, %v2233_v12 }
 0x965   :  { %v2236_v32 = vrot.slane %v2235_v27, 2 }
 0x967   :  { %v2237_v17 = vadd.f32 %v2236_v32, %v2235_v27 }
 0x969   :  { %v2238_v29 = vrot.slane %v2237_v17, 1 }
 0x96b   :  { %v2239_v30 = vadd.f32 %v2238_v29, %v2237_v17 }
 0x96d   :  { %v2240_v31 = vmul.f32 0.03125, %v2239_v30 }
 0x96f   :  { %v2241_v42 = vadd.f32 1e-05, %v2240_v31 }
 0x971   :  { %4472 = vrsqrt.f32 %v2241_v42  ;;  %vm2248_vm2 = vweird.f32 %v2241_v42 }
 0x977   :  { %v4473_v43 = vpop.eup %4472 }
 0x978   :  { %v2243_v20 = vmul.f32 %v4473_v43, %v2241_v42  ;;  %vm2249_vm15 = vweird.f32 %v4473_v43 }
 0x979   :  { %vm2250_vm4 = vmor %vm2248_vm2, %vm2249_vm15  ;;  %vm5873_vm2 = vcmp.lt.s32.totalorder %v4664_v26, 13 }
 0x97a   :  { %v2244_v34 = vmul.f32 %v4473_v43, %v2243_v20  ;;  %vm5872_vm15 = vmmov %vm5871_vm12 }
 0x97c   :  { %v2245_v21 = vmul.f32 0.5, %v2244_v34 }
 0x97e   :  { %v2246_v44 = vsub.f32 1.5, %v2245_v21 }
 0x980   :  { %v2247_v45 = vmul.f32 %v4473_v43, %v2246_v44 }
 0x982   :  { %v2251_v47 = vsel %vm2250_vm4, %v4473_v43, %v2247_v45  ;;  %vm5874_vm4 = vmmov %vm5871_vm12 }
 0x983   :  { %v2253_v19 = vmul.f32 %v2252_v46, %v2251_v47 }
 0x985   :  { %v2254_v50 = vperm.slane %v2253_v19, 0 }
 0x987   :  { %v2258_v22 = vmul.f32 %v2254_v50, %v2226_v40  ;;  %v2257_v53 = vmul.f32 %v2254_v50, %v2225_v63  ;;  %v2256_v55 = vmul.f32 %v2254_v50, %v2224_v38  ;;  %v2255_v11 = vmul.f32 %v2254_v50, %v5357_v58 }
 0x989   :  { %v5362_v49 = vadd.f32 %v4455_v51, %v2258_v22  ;;  %v5364_v59 = vadd.f32 %v4455_v51, %v2257_v53  ;;  %v5366_v60 = vadd.f32 %v4455_v51, %v2256_v55  ;;  %v5368_v61 = vadd.f32 %v4455_v51, %v2255_v11 }
 0x98b   :  { %2647 = vmatpush.msrb.mxu3 %v5362_v49  ;;  %2553 = vxpose.xlu0.b32.start [1/2] (short) %v5364_v59, 128 }
 0x98c   :  { %2502 = vmatpush.msra.mxu0 %v5366_v60  ;;  %2408 = vxpose.xlu2.b32.start [1/2] (short) %v5368_v61, 128 }
 0x98d   :  { %2395 = vmatmul.f32.vlgmr.msrb.gmra.mxu2 %v5368_v61  ;;  %2648 = vmatpush.msrb.mxu3 %v5364_v59 }
 0x98e   :  { %2503 = vmatpush.msra.mxu0 %v5368_v61 }
 0x993   :  { %2554 = vxpose.xlu0.b32.end [2/2] (short) %v5362_v49, 128 }
 0x994   :  { %2409 = vxpose.xlu2.b32.end [2/2] (short) %v5366_v60, 128 }
 0x995   :  { %2398 = vmatmul.f32.gmra.mxu2 %v5366_v60 }
 0x99d   :  { %2401 = vmatmul.f32.gmra.mxu2 %v5364_v59 }
 0x9a5   :  { %2404 = vmatmul.f32.gmra.mxu2 %v5362_v49 }
 0xa25   :  { %v2424_v62 = vpop.trf.xlu2 }
 0xa26   :  { %4292 = vmatmul.msk.f32.vlgmr.msra.gmra.mxu0 %vm314_vm7, %v2424_v62 }
 0xa2d   :  { %v2425_v2 = vpop.trf.xlu2 }
 0xa2e   :  { %4293 = vmatmul.msk.f32.gmra.mxu0 %vm314_vm7, %v2425_v2 }
 0xa2f   :  { %v2569_v4 = vpop.trf.xlu0 }
 0xa30   :  { %4308 = vmatmul.msk.f32.vlgmr.msrb.gmra.mxu3 %vm314_vm7, %v2569_v4 }
 0xa35   :  { %v2426_v5 = vpop.trf.xlu2 }
 0xa36   :  { %4294 = vmatmul.msk.f32.gmra.mxu0 %vm314_vm7, %v2426_v5 }
 0xa37   :  { %v2570_v57 = vpop.trf.xlu0 }
 0xa38   :  { %4309 = vmatmul.msk.f32.gmra.mxu3 %vm314_vm7, %v2570_v57 }
 0xa3d   :  { %v2427_v7 = vpop.trf.xlu2 }
 0xa3e   :  { %4295 = vmatmul.msk.f32.gmra.mxu0 %vm314_vm7, %v2427_v7 }
 0xa3f   :  { %v2571_v3 = vpop.trf.xlu0 }
 0xa40   :  { %4310 = vmatmul.msk.f32.gmra.mxu3 %vm314_vm7, %v2571_v3 }
 0xa45   :  { %v2428_v56 = vpop.trf.xlu2 }
 0xa46   :  { %4296 = vmatmul.msk.f32.gmra.mxu0 %vm314_vm7, %v2428_v56  ;;  %v5428_v56 = vpop.f32.mrf.mxu1 }
 0xa47   :  { %v2572_v58 = vpop.trf.xlu0 }
 0xa48   :  { %4311 = vmatmul.msk.f32.gmra.mxu3 %vm314_vm7, %v2572_v58 }
 0xa4d   :  { %v2429_v38 = vpop.trf.xlu2 }
 0xa4e   :  { %4297 = vmatmul.msk.f32.gmra.mxu0 %vm314_vm7, %v2429_v38  ;;  %v2301_v38 = vpop.f32.mrf.mxu1 }
 0xa4f   :  { %v2573_v63 = vpop.trf.xlu0 }
 0xa50   :  { %4312 = vmatmul.msk.f32.gmra.mxu3 %vm314_vm7, %v2573_v63 }
 0xa55   :  { %v2430_v10 = vpop.trf.xlu2 }
 0xa56   :  { %4298 = vmatmul.msk.f32.gmra.mxu0 %vm314_vm7, %v2430_v10  ;;  %v2304_v10 = vpop.f32.mrf.mxu1 }
 0xa57   :  { %v2574_v40 = vpop.trf.xlu0 }
 0xa58   :  { %4313 = vmatmul.msk.f32.gmra.mxu3 %vm314_vm7, %v2574_v40  ;;  %v2944_v40 = vld [vmem:[#allocation2 + $0xce0] sm:$0xff] }
 0xa59   :  { %3119 = vmatpush.msrb.mxu0 %v2944_v40  ;;  %v2863_v40 = vld [vmem:[#allocation2 + $0xa58] sm:$0xff] }
 0xa5d   :  { %v2431_v15 = vpop.trf.xlu2 }
 0xa5e   :  { %4299 = vmatmul.msk.f32.gmra.mxu0 %vm314_vm7, %v2431_v15  ;;  %v2396_v15 = vpop.f32.mrf.mxu2 }
 0xa5f   :  { %v2575_v16 = vpop.trf.xlu0 }
 0xa60   :  { %4314 = vmatmul.msk.f32.gmra.mxu3 %vm314_vm7, %v2575_v16  ;;  %v2943_v16 = vld [vmem:[#allocation2 + $0xcd8] sm:$0xff] }
 0xa61   :  { %3120 = vmatpush.msrb.mxu0 %v2943_v16  ;;  %v2862_v16 = vld [vmem:[#allocation2 + $0xa50] sm:$0xff] }
 0xa65   :  { %v2432_v13 = vpop.trf.xlu2 }
 0xa66   :  { %4300 = vmatmul.msk.f32.gmra.mxu0 %vm314_vm7, %v2432_v13  ;;  %v2942_v13 = vld [vmem:[#allocation2 + $0xcd0] sm:$0xff] }
 0xa67   :  { %v2576_v1 = vpop.trf.xlu0  ;;  %3121 = vmatpush.msrb.mxu0 %v2942_v13  ;;  %v2931_v13 = vld [vmem:[#allocation2 + $0xc78] sm:$0xff] }
 0xa68   :  { %4315 = vmatmul.msk.f32.gmra.mxu3 %vm314_vm7, %v2576_v1  ;;  %v2941_v1 = vld [vmem:[#allocation2 + $0xcc8] sm:$0xff] }
 0xa69   :  { %3122 = vmatpush.msrb.mxu0 %v2941_v1  ;;  %v2845_v1 = vld [vmem:[#allocation2 + $0x9c8] sm:$0xff] }
 0xa6d   :  { %v2433_v18 = vpop.trf.xlu2 }
 0xa6e   :  { %4301 = vmatmul.msk.f32.gmra.mxu0 %vm314_vm7, %v2433_v18  ;;  %v2940_v18 = vld [vmem:[#allocation2 + $0xcc0] sm:$0xff] }
 0xa6f   :  { %v2577_v0 = vpop.trf.xlu0  ;;  %3123 = vmatpush.msrb.mxu0 %v2940_v18  ;;  %v2861_v18 = vld [vmem:[#allocation2 + $0xa48] sm:$0xff] }
 0xa70   :  { %4316 = vmatmul.msk.f32.gmra.mxu3 %vm314_vm7, %v2577_v0  ;;  %v2310_v0 = vadd.f32 %v2301_v38, %v5428_v56 }
 0xa75   :  { %v2434_v24 = vpop.trf.xlu2 }
 0xa76   :  { %4302 = vmatmul.msk.f32.gmra.mxu0 %vm314_vm7, %v2434_v24  ;;  %v2307_v24 = vpop.f32.mrf.mxu1 }
 0xa77   :  { %v2578_v8 = vpop.trf.xlu0 }
 0xa78   :  { %4317 = vmatmul.msk.f32.gmra.mxu3 %vm314_vm7, %v2578_v8  ;;  %v2939_v8 = vld [vmem:[#allocation2 + $0xcb8] sm:$0xff] }
 0xa79   :  { %3124 = vmatpush.msrb.mxu0 %v2939_v8  ;;  %v2844_v8 = vld [vmem:[#allocation2 + $0x9c0] sm:$0xff] }
 0xa7d   :  { %v2435_v52 = vpop.trf.xlu2 }
 0xa7e   :  { %4303 = vmatmul.msk.f32.gmra.mxu0 %vm314_vm7, %v2435_v52  ;;  %v2311_v52 = vadd.f32 %v2310_v0, %v2304_v10 }
 0xa7f   :  { %v2579_v12 = vpop.trf.xlu0 }
 0xa80   :  { %4318 = vmatmul.msk.f32.gmra.mxu3 %vm314_vm7, %v2579_v12  ;;  %v2399_v12 = vpop.f32.mrf.mxu2 }
 0xa85   :  { %v2436_v48 = vpop.trf.xlu2 }
 0xa86   :  { %4304 = vmatmul.msk.f32.gmra.mxu0 %vm314_vm7, %v2436_v48  ;;  %v2312_v48 = vadd.f32 %v2311_v52, %v2307_v24  ;;  %v2860_v52 = vld [vmem:[#allocation2 + $0xa40] sm:$0xff] }
 0xa87   :  { %v2580_v14 = vpop.trf.xlu0 }
 0xa88   :  { %4319 = vmatmul.msk.f32.gmra.mxu3 %vm314_vm7, %v2580_v14  ;;  %v2313_v14 = vrot.slane %v2312_v48, 4 }
 0xa8d   :  { %v2437_v25 = vpop.trf.xlu2 }
 0xa8e   :  { %4305 = vmatmul.msk.f32.gmra.mxu0 %vm314_vm7, %v2437_v25  ;;  %v2314_v25 = vadd.f32 %v2313_v14, %v2312_v48  ;;  %v2843_v48 = vld [vmem:[#allocation2 + $0x9b8] sm:$0xff] }
 0xa8f   :  { %v2581_v27 = vpop.trf.xlu0  ;;  %v2859_v14 = vld [vmem:[#allocation2 + $0xa38] sm:$0xff] }
 0xa90   :  { %4320 = vmatmul.msk.f32.gmra.mxu3 %vm314_vm7, %v2581_v27  ;;  %v2402_v27 = vpop.f32.mrf.mxu2 }
 0xa95   :  { %v2438_v28 = vpop.trf.xlu2 }
 0xa96   :  { %4306 = vmatmul.msk.f32.gmra.mxu0 %vm314_vm7, %v2438_v28  ;;  %v2315_v28 = vrot.slane %v2314_v25, 2 }
 0xa97   :  { %v2582_v32 = vpop.trf.xlu0 }
 0xa98   :  { %4321 = vmatmul.msk.f32.gmra.mxu3 %vm314_vm7, %v2582_v32  ;;  %v2316_v32 = vadd.f32 %v2315_v28, %v2314_v25 }
 0xa9d   :  { %v2439_v33 = vpop.trf.xlu2 }
 0xa9e   :  { %4307 = vmatmul.msk.f32.gmra.mxu0 %vm314_vm7, %v2439_v33  ;;  %v2405_v33 = vpop.f32.mrf.mxu2 }
 0xa9f   :  { %v2583_v17 = vpop.trf.xlu0 }
 0xaa0   :  { %4322 = vmatmul.msk.f32.gmra.mxu3 %vm314_vm7, %v2583_v17  ;;  %v2317_v17 = vrot.slane %v2316_v32, 1 }
 0xaa3   :  { %v5413_v36 = vpop.f32.mrf.mxu0 }
 0xaa7   :  { %v2584_v37 = vpop.trf.xlu0 }
 0xaa8   :  { %4323 = vmatmul.msk.f32.gmra.mxu3 %vm314_vm7, %v2584_v37 }
 0xaab   :  { %v2508_v29 = vpop.f32.mrf.mxu0 }
 0xab3   :  { %v2511_v23 = vpop.f32.mrf.mxu0  ;;  %v5416_v30 = vpop.f32.mrf.mxu3 }
 0xabb   :  { %v2514_v39 = vpop.f32.mrf.mxu0  ;;  %v5418_v31 = vpop.f32.mrf.mxu3 }
 0xac3   :  { %v2517_v41 = vpop.f32.mrf.mxu0  ;;  %v5420_v42 = vpop.f32.mrf.mxu3 }
 0xacb   :  { %v2520_v43 = vpop.f32.mrf.mxu0  ;;  %v5422_v20 = vpop.f32.mrf.mxu3 }
 0xad3   :  { %v2523_v34 = vpop.f32.mrf.mxu0  ;;  %v5424_v21 = vpop.f32.mrf.mxu3 }
 0xadb   :  { %v2526_v44 = vpop.f32.mrf.mxu0  ;;  %v5426_v45 = vpop.f32.mrf.mxu3 }
 0xae3   :  { %v2529_v46 = vpop.f32.mrf.mxu0  ;;  %v2668_v47 = vpop.f32.mrf.mxu3 }
 0xaeb   :  { %v2532_v19 = vpop.f32.mrf.mxu0  ;;  %v2671_v50 = vpop.f32.mrf.mxu3 }
 0xaf3   :  { %v2535_v51 = vpop.f32.mrf.mxu0  ;;  %v2674_v22 = vpop.f32.mrf.mxu3 }
 0xafb   :  { %v2538_v53 = vpop.f32.mrf.mxu0  ;;  %v2677_v55 = vpop.f32.mrf.mxu3 }
 0xb03   :  { %v2541_v11 = vpop.f32.mrf.mxu0  ;;  %v2680_v62 = vpop.f32.mrf.mxu3 }
 0xb0b   :  { %v2544_v2 = vpop.f32.mrf.mxu0  ;;  %v2683_v4 = vpop.f32.mrf.mxu3 }
 0xb13   :  { %v2547_v5 = vpop.f32.mrf.mxu0  ;;  %v2686_v57 = vpop.f32.mrf.mxu3 }
 0xb1b   :  { %v2550_v7 = vpop.f32.mrf.mxu0  ;;  %v2689_v3 = vpop.f32.mrf.mxu3 }
 0xb1c   :  { %2698 = vmatpush.msra.mxu1 %v2550_v7  ;;  %v2934_v7 = vld [vmem:[#allocation2 + $0xc90] sm:$0xff] }
 0xb1e   :  { %2699 = vmatpush.msra.mxu1 %v2547_v5  ;;  %v2935_v5 = vld [vmem:[#allocation2 + $0xc98] sm:$0xff] }
 0xb20   :  { %2700 = vmatpush.msra.mxu1 %v2544_v2 }
 0xb22   :  { %2701 = vmatpush.msra.mxu1 %v2541_v11  ;;  %v2938_v11 = vld [vmem:[#allocation2 + $0xcb0] sm:$0xff] }
 0xb23   :  { %v2692_v58 = vpop.f32.mrf.mxu3  ;;  %3125 = vmatpush.msrb.mxu0 %v2938_v11  ;;  %v2852_v11 = vld [vmem:[#allocation2 + $0xa00] sm:$0xff] }
 0xb24   :  { %2702 = vmatpush.msra.mxu1 %v2538_v53 }
 0xb26   :  { %2703 = vmatpush.msra.mxu1 %v2535_v51 }
 0xb28   :  { %2704 = vmatpush.msra.mxu1 %v2532_v19 }
 0xb2a   :  { %2705 = vmatpush.msra.mxu1 %v2529_v46 }
 0xb2b   :  { %v2695_v63 = vpop.f32.mrf.mxu3 }
 0xb2c   :  { %2706 = vmatpush.msra.mxu1 %v2526_v44  ;;  %2721 = vmatpush.msra.mxu2 %v2695_v63  ;;  %v2932_v63 = vld [vmem:[#allocation2 + $0xc80] sm:$0xff] }
 0xb2e   :  { %2707 = vmatpush.msra.mxu1 %v2523_v34  ;;  %2722 = vmatpush.msra.mxu2 %v2692_v58  ;;  %v2864_v58 = vld [vmem:[#allocation2 + $0xa60] sm:$0xff] }
 0xb30   :  { %2708 = vmatpush.msra.mxu1 %v2520_v43  ;;  %2723 = vmatpush.msra.mxu2 %v2689_v3  ;;  %v2933_v3 = vld [vmem:[#allocation2 + $0xc88] sm:$0xff] }
 0xb32   :  { %2709 = vmatpush.msra.mxu1 %v2517_v41  ;;  %2724 = vmatpush.msra.mxu2 %v2686_v57 }
 0xb34   :  { %2710 = vmatpush.msra.mxu1 %v2514_v39  ;;  %2725 = vmatpush.msra.mxu2 %v2683_v4  ;;  %v2936_v4 = vld [vmem:[#allocation2 + $0xca0] sm:$0xff] }
 0xb36   :  { %2711 = vmatpush.msra.mxu1 %v2511_v23  ;;  %2726 = vmatpush.msra.mxu2 %v2680_v62  ;;  %v2937_v62 = vld [vmem:[#allocation2 + $0xca8] sm:$0xff] }
 0xb37   :  { %3126 = vmatpush.msrb.mxu0 %v2937_v62 }
 0xb38   :  { %2712 = vmatpush.msra.mxu1 %v2508_v29  ;;  %2727 = vmatpush.msra.mxu2 %v2677_v55 }
 0xb39   :  { %3127 = vmatpush.msrb.mxu0 %v2936_v4  ;;  %v2851_v4 = vld [vmem:[#allocation2 + $0x9f8] sm:$0xff] }
 0xb3a   :  { %2713 = vmatpush.msra.mxu1 %v5413_v36  ;;  %2728 = vmatpush.msra.mxu2 %v2674_v22  ;;  %v2318_v36 = vadd.f32 %v2317_v17, %v2316_v32  ;;  %v2842_v32 = vld [vmem:[#allocation2 + $0x9b0] sm:$0xff]  ;;  %v2841_v17 = vld [vmem:[#allocation2 + $0x9a8] sm:$0xff] }
 0xb3b   :  { %2714 = vmatmul.f32.vlgmr.msra.gmra.mxu1 %v2396_v15  ;;  %3128 = vmatpush.msrb.mxu0 %v2935_v5  ;;  %v2846_v15 = vld [vmem:[#allocation2 + $0x9d0] sm:$0xff] }
 0xb3c   :  { %2729 = vmatpush.msra.mxu2 %v2671_v50  ;;  %v2319_v37 = vmul.f32 0.03125, %v2318_v36  ;;  %v5455_v36 = vstv %s4291_s16 }
 0xb3d   :  { %3129 = vmatpush.msrb.mxu0 %v2934_v7  ;;  %v2834_v7 = vld [vmem:[#allocation2 + $0x970] sm:$0xff] }
 0xb3e   :  { %2730 = vmatpush.msra.mxu2 %v2668_v47  ;;  %v5439_v29 = vsub.f32 %v5428_v56, %v2319_v37  ;;  %v5441_v23 = vsub.f32 %v2301_v38, %v2319_v37  ;;  %v2848_v56 = vld [vmem:[#allocation2 + $0x9e0] sm:$0xff] }
 0xb3f   :  { %2945 = vmatpush.msrb.mxu1 %v2848_v56  ;;  %3130 = vmatpush.msrb.mxu0 %v2933_v3  ;;  %v2850_v3 = vld [vmem:[#allocation2 + $0x9f0] sm:$0xff] }
 0xb40   :  { %2731 = vmatpush.msra.mxu2 %v5426_v45  ;;  %v2324_v39 = vmul.f32 %v5439_v29, %v5439_v29 }
 0xb41   :  { %3131 = vmatpush.msrb.mxu0 %v2932_v63  ;;  %v2880_v63 = vld [vmem:[#allocation2 + $0xae0] sm:$0xff] }
 0xb42   :  { %2732 = vmatpush.msra.mxu2 %v5424_v21 }
 0xb43   :  { %2717 = vmatmul.f32.gmra.mxu1 %v2399_v12  ;;  %3132 = vmatpush.msrb.mxu0 %v2931_v13  ;;  %v2929_v12 = vld [vmem:[#allocation2 + $0xc68] sm:$0xff] }
 0xb44   :  { %2733 = vmatpush.msra.mxu2 %v5422_v20 }
 0xb46   :  { %2734 = vmatpush.msra.mxu2 %v5420_v42  ;;  %v5449_v42 = vsub.f32 %v2307_v24, %v2319_v37  ;;  %v2930_v24 = vld [vmem:[#allocation2 + $0xc70] sm:$0xff] }
 0xb47   :  { %3133 = vmatpush.msrb.mxu0 %v2930_v24  ;;  %v2877_v24 = vld [vmem:[#allocation2 + $0xac8] sm:$0xff] }
 0xb48   :  { %2735 = vmatpush.msra.mxu2 %v5418_v31  ;;  %v2325_v31 = vmul.f32 %v5441_v23, %v5441_v23  ;;  %v2327_v34 = vmul.f32 %v5449_v42, %v5449_v42 }
 0xb49   :  { %3134 = vmatpush.msrb.mxu0 %v2929_v12 }
 0xb4a   :  { %2736 = vmatpush.msra.mxu2 %v5416_v30  ;;  %v5447_v30 = vsub.f32 %v2304_v10, %v2319_v37  ;;  %v2328_v41 = vadd.f32 %v2325_v31, %v2324_v39  ;;  %v2847_v10 = vld [vmem:[#allocation2 + $0x9d8] sm:$0xff]  ;;  %v2857_v37 = vld [vmem:[#allocation2 + $0xa28] sm:$0xff]  ;;  %v2840_v31 = vld [vmem:[#allocation2 + $0x9a0] sm:$0xff] }
 0xb4b   :  { %2737 = vmatmul.f32.vlgmr.msra.gmra.mxu2 %v2402_v27  ;;  %2946 = vmatpush.msrb.mxu1 %v2847_v10  ;;  %v2349_v27 = vld [vmem:[#allocation2 + $0x958] sm:$0x1]  ;;  %v2896_v10 = vld [vmem:[#allocation2 + $0xb60] sm:$0xff] }
 0xb4c   :  { %v2326_v43 = vmul.f32 %v5447_v30, %v5447_v30  ;;  %2974 = vmatpush.msrb.mxu2 %v2864_v58  ;;  %v2833_v58 = vld [vmem:[#allocation2 + $0x968] sm:$0xff] }
 0xb4d   :  { %2947 = vmatpush.msrb.mxu1 %v2846_v15  ;;  %v2879_v15 = vld [vmem:[#allocation2 + $0xad8] sm:$0xff] }
 0xb4e   :  { %v2329_v20 = vadd.f32 %v2328_v41, %v2326_v43  ;;  %2975 = vmatpush.msrb.mxu2 %v2863_v40  ;;  %v2856_v41 = vld [vmem:[#allocation2 + $0xa20] sm:$0xff] }
 0xb4f   :  { %2948 = vmatpush.msrb.mxu1 %v2845_v1  ;;  %v2878_v1 = vld [vmem:[#allocation2 + $0xad0] sm:$0xff] }
 0xb50   :  { %v2330_v21 = vadd.f32 %v2329_v20, %v2327_v34  ;;  %2976 = vmatpush.msrb.mxu2 %v2862_v16  ;;  %v2839_v34 = vld [vmem:[#allocation2 + $0x998] sm:$0xff] }
 0xb51   :  { %2949 = vmatpush.msrb.mxu1 %v2844_v8  ;;  %v2895_v16 = vld [vmem:[#allocation2 + $0xb58] sm:$0xff]  ;;  %v2893_v8 = vld [vmem:[#allocation2 + $0xb48] sm:$0xff] }
 0xb52   :  { %v2331_v44 = vrot.slane %v2330_v21, 4  ;;  %2977 = vmatpush.msrb.mxu2 %v2861_v18  ;;  %v2894_v18 = vld [vmem:[#allocation2 + $0xb50] sm:$0xff] }
 0xb53   :  { %2740 = vmatmul.f32.gmra.mxu2 %v2405_v33  ;;  %2950 = vmatpush.msrb.mxu1 %v2843_v48  ;;  %v2858_v33 = vld [vmem:[#allocation2 + $0xa30] sm:$0xff]  ;;  %v2876_v48 = vld [vmem:[#allocation2 + $0xac0] sm:$0xff] }
 0xb54   :  { %v2332_v45 = vadd.f32 %v2331_v44, %v2330_v21  ;;  %2978 = vmatpush.msrb.mxu2 %v2860_v52  ;;  %v2855_v21 = vld [vmem:[#allocation2 + $0xa18] sm:$0xff]  ;;  %v5460_v44 = vld [vmem:[#allocation2 + $0x960] ss:$0 sm:$0xff] }
 0xb55   :  { %2951 = vmatpush.msrb.mxu1 %v2842_v32 }
 0xb56   :  { %v2333_v46 = vrot.slane %v2332_v45, 2  ;;  %2979 = vmatpush.msrb.mxu2 %v2859_v14  ;;  %v2892_v14 = vld [vmem:[#allocation2 + $0xb40] sm:$0xff] }
 0xb57   :  { %2952 = vmatpush.msrb.mxu1 %v2841_v17  ;;  %v2874_v17 = vld [vmem:[#allocation2 + $0xab0] sm:$0xff] }
 0xb58   :  { %v2334_v47 = vadd.f32 %v2333_v46, %v2332_v45  ;;  %2980 = vmatpush.msrb.mxu2 %v2858_v33 }
 0xb59   :  { %2953 = vmatpush.msrb.mxu1 %v2840_v31  ;;  %v2873_v31 = vld [vmem:[#allocation2 + $0xaa8] sm:$0xff] }
 0xb5a   :  { %v2335_v19 = vrot.slane %v2334_v47, 1  ;;  %2981 = vmatpush.msrb.mxu2 %v2857_v37  ;;  %v2890_v37 = vld [vmem:[#allocation2 + $0xb30] sm:$0xff] }
 0xb5b   :  { %2954 = vmatpush.msrb.mxu1 %v2839_v34 }
 0xb5c   :  { %v2336_v50 = vadd.f32 %v2335_v19, %v2334_v47  ;;  %2982 = vmatpush.msrb.mxu2 %v2856_v41  ;;  %v2838_v47 = vld [vmem:[#allocation2 + $0x990] sm:$0xff]  ;;  %v2889_v41 = vld [vmem:[#allocation2 + $0xb28] sm:$0xff] }
 0xb5d   :  { %v2854_v19 = vld [vmem:[#allocation2 + $0xa10] sm:$0xff]  ;;  %2955 = vmatpush.msrb.mxu1 %v2838_v47  ;;  %v2871_v47 = vld [vmem:[#allocation2 + $0xa98] sm:$0xff] }
 0xb5e   :  { %v2337_v51 = vmul.f32 0.03125, %v2336_v50  ;;  %2983 = vmatpush.msrb.mxu2 %v2855_v21  ;;  %v2837_v50 = vld [vmem:[#allocation2 + $0x988] sm:$0xff]  ;;  %v2872_v21 = vld [vmem:[#allocation2 + $0xaa0] sm:$0xff] }
 0xb5f   :  { %2956 = vmatpush.msrb.mxu1 %v2837_v50 }
 0xb60   :  { %v2338_v22 = vadd.f32 1e-05, %v2337_v51  ;;  %2984 = vmatpush.msrb.mxu2 %v2854_v19  ;;  %v2853_v51 = vld [vmem:[#allocation2 + $0xa08] sm:$0xff] }
 0xb62   :  { %4474 = vrsqrt.f32 %v2338_v22  ;;  %vm2345_vm10 = vweird.f32 %v2338_v22  ;;  %2985 = vmatpush.msrb.mxu2 %v2853_v51 }
 0xb64   :  { %2986 = vmatpush.msrb.mxu2 %v2852_v11  ;;  %v2868_v11 = vld [vmem:[#allocation2 + $0xa80] sm:$0xff] }
 0xb66   :  { %2987 = vmatpush.msrb.mxu2 %v2851_v4  ;;  %v2884_v4 = vld [vmem:[#allocation2 + $0xb00] sm:$0xff] }
 0xb68   :  { %v4475_v53 = vpop.eup %4474  ;;  %2988 = vmatpush.msrb.mxu2 %v2850_v3  ;;  %v2867_v3 = vld [vmem:[#allocation2 + $0xa78] sm:$0xff] }
 0xb69   :  { %v2340_v55 = vmul.f32 %v4475_v53, %v2338_v22  ;;  %vm2346_vm11 = vweird.f32 %v4475_v53 }
 0xb6a   :  { %vm2347_vm6 = vmor %vm2345_vm10, %vm2346_vm11  ;;  %vm5875_vm11 = vcmp.ge.s32.totalorder %v4617_v9, 3  ;;  %vm5876_vm10 = vcmp.ge.s32.totalorder %v4617_v9, 2 }
 0xb6b   :  { %v2341_v2 = vmul.f32 %v4475_v53, %v2340_v55  ;;  %v2836_v55 = vld [vmem:[#allocation2 + $0x980] sm:$0xff] }
 0xb6c   :  { %2957 = vmatpush.msrb.mxu1 %v2836_v55 }
 0xb6d   :  { %v2342_v57 = vmul.f32 0.5, %v2341_v2 }
 0xb6f   :  { %v2343_v38 = vsub.f32 1.5, %v2342_v57 }
 0xb71   :  { %v2344_v0 = vmul.f32 %v4475_v53, %v2343_v38  ;;  %v2849_v38 = vld [vmem:[#allocation2 + $0x9e8] sm:$0xff] }
 0xb72   :  { %2989 = vmatpush.msrb.mxu2 %v2849_v38  ;;  %v2882_v38 = vld [vmem:[#allocation2 + $0xaf0] sm:$0xff] }
 0xb73   :  { %v2348_v25 = vsel %vm2347_vm6, %v4475_v53, %v2344_v0  ;;  %vm5877_vm6 = vmmov %vm5874_vm4 }
 0xb74   :  { %v2350_v28 = vmul.f32 %v2349_v27, %v2348_v25  ;;  %3032 = vmatpush.msra.mxu2 %v2896_v10  ;;  %v2875_v27 = vld [vmem:[#allocation2 + $0xab8] sm:$0xff] }
 0xb76   :  { %v5457_v39 = vperm.slane %v2350_v28, 0  ;;  %3033 = vmatpush.msra.mxu2 %v2895_v16  ;;  %v2891_v28 = vld [vmem:[#allocation2 + $0xb38] sm:$0xff]  ;;  %v2881_v16 = vld [vmem:[#allocation2 + $0xae8] sm:$0xff] }
 0xb78   :  { %v2352_v45 = vmul.f32 %v5457_v39, %v5439_v29  ;;  %v2353_v53 = vmul.f32 %v5457_v39, %v5441_v23  ;;  %v2354_v52 = vmul.f32 %v5457_v39, %v5447_v30  ;;  %3034 = vmatpush.msra.mxu2 %v2894_v18 }
 0xb7a   :  { %v2358_v22 = vadd.f32 %v5460_v44, %v2352_v45  ;;  %v2359_v5 = vadd.f32 %v5460_v44, %v2353_v53  ;;  %3035 = vmatpush.msra.mxu2 %v2893_v8  ;;  %v2360_v32 = vadd.f32 %v5460_v44, %v2354_v52  ;;  %v2869_v53 = vld [vmem:[#allocation2 + $0xa88] sm:$0xff]  ;;  %v2927_v52 = vld [vmem:[#allocation2 + $0xc58] sm:$0xff] }
 0xb7c   :  { %3036 = vmatpush.msra.mxu2 %v2892_v14 }
 0xb7e   :  { %3037 = vmatpush.msra.mxu2 %v2891_v28  ;;  %v2925_v28 = vld [vmem:[#allocation2 + $0xc48] sm:$0xff] }
 0xb80   :  { %3038 = vmatpush.msra.mxu2 %v2890_v37  ;;  %v2907_v37 = vld [vmem:[#allocation2 + $0xbb8] sm:$0xff] }
 0xb82   :  { %3039 = vmatpush.msra.mxu2 %v2889_v41  ;;  %v2922_v41 = vld [vmem:[#allocation2 + $0xc30] sm:$0xff] }
 0xbb8   :  { %v2715_v43 = vpop.f32.mrf.mxu1 }
 0xbb9   :  { %v2745_v20 = vmul.f32 %v5455_v36, %v2715_v43  ;;  %v2355_v43 = vmul.f32 %v5457_v39, %v5449_v42  ;;  %v2887_v39 = vld [vmem:[#allocation2 + $0xb18] sm:$0xff] }
 0xbbb   :  { %v2749_v46 = vadd.f32 %v2745_v20, %v5368_v61  ;;  %v2835_v61 = vld [vmem:[#allocation2 + $0x978] sm:$0xff]  ;;  %v2361_v19 = vadd.f32 %v5460_v44, %v2355_v43  ;;  %v2885_v44 = vld [vmem:[#allocation2 + $0xb08] sm:$0xff] }
 0xbbc   :  { %2958 = vmatpush.msrb.mxu1 %v2835_v61  ;;  %v2905_v43 = vld [vmem:[#allocation2 + $0xba8] sm:$0xff] }
 0xbbd   :  { %v2753_v29 = vadd.f32 %v2749_v46, %v2358_v22  ;;  %v2888_v46 = vld [vmem:[#allocation2 + $0xb20] sm:$0xff]  ;;  %v2886_v22 = vld [vmem:[#allocation2 + $0xb10] sm:$0xff] }
 0xbbe   :  { %2959 = vmatpush.msrb.mxu1 %v2834_v7  ;;  %3040 = vmatpush.msra.mxu2 %v2888_v46 }
 0xbbf   :  { %v5471_v23 = vmax.f32 %v2753_v29, 0.0 }
 0xbc0   :  { %v2718_v62 = vpop.f32.mrf.mxu1  ;;  %2960 = vmatpush.msrb.mxu1 %v2833_v58  ;;  %3041 = vmatpush.msra.mxu2 %v2887_v39  ;;  %v2866_v58 = vld [vmem:[#allocation2 + $0xa70] sm:$0xff] }
 0xbc1   :  { %v2746_v2 = vmul.f32 %v5455_v36, %v2718_v62  ;;  %v2773_v29 = vrot.slane %v5471_v23, 6 }
 0xbc2   :  { %3003 = vmatpush.msra.mxu1 %v2880_v63  ;;  %3042 = vmatpush.msra.mxu2 %v2886_v22  ;;  %v2785_v22 = vrot.slane %v5471_v23, 7 }
 0xbc3   :  { %v2750_v57 = vadd.f32 %v2746_v2, %v5366_v60  ;;  %v2821_v60 = vrot.slane %v5471_v23, 3 }
 0xbc4   :  { %3004 = vmatpush.msra.mxu1 %v2879_v15  ;;  %3043 = vmatpush.msra.mxu2 %v2885_v44  ;;  %v2865_v15 = vld [vmem:[#allocation2 + $0xa68] sm:$0xff]  ;;  %v2916_v44 = vld [vmem:[#allocation2 + $0xc00] sm:$0xff] }
 0xbc5   :  { %v2754_v56 = vadd.f32 %v2750_v57, %v2359_v5 }
 0xbc6   :  { %3005 = vmatpush.msra.mxu1 %v2878_v1  ;;  %3044 = vmatpush.msra.mxu2 %v2884_v4  ;;  %v2928_v1 = vld [vmem:[#allocation2 + $0xc60] sm:$0xff]  ;;  %v2897_v4 = vld [vmem:[#allocation2 + $0xb68] sm:$0xff] }
 0xbc7   :  { %v5473_v40 = vmax.f32 %v2754_v56, 0.0  ;;  %v2883_v56 = vld [vmem:[#allocation2 + $0xaf8] sm:$0xff] }
 0xbc8   :  { %3006 = vmatpush.msra.mxu1 %v2877_v24  ;;  %3045 = vmatpush.msra.mxu2 %v2883_v56  ;;  %v2911_v24 = vld [vmem:[#allocation2 + $0xbd8] sm:$0xff] }
 0xbc9   :  { %v2822_v13 = vrot.slane %v5473_v40, 3  ;;  %v2762_v63 = vrot.slane %v5473_v40, 5  ;;  %v2774_v10 = vrot.slane %v5473_v40, 6 }
 0xbca   :  { %3007 = vmatpush.msra.mxu1 %v2876_v48  ;;  %3046 = vmatpush.msra.mxu2 %v2882_v38  ;;  %v2926_v48 = vld [vmem:[#allocation2 + $0xc50] sm:$0xff]  ;;  %v2810_v38 = vrot.slane %v5473_v40, 2 }
 0xbcb   :  { %v2827_v0 = vsel %vm5871_vm12, %v2821_v60, %v2822_v13  ;;  %vm5878_vm12 = vcmp.lt.s32.totalorder %v4732_v54, 13 }
 0xbcc   :  { %3135 = vmatmul.f32.vlgmr.msrb.gmra.mxu0 %v2827_v0  ;;  %3008 = vmatpush.msra.mxu1 %v2875_v27  ;;  %v2779_v0 = vsel %vm122_vm0, %v2773_v29, %v2774_v10  ;;  %v2909_v27 = vld [vmem:[#allocation2 + $0xbc8] sm:$0xff] }
 0xbcd   :  { %3047 = vmatpush.msra.mxu2 %v2881_v16 }
 0xbce   :  { %v2738_v12 = vpop.f32.mrf.mxu2  ;;  %3009 = vmatpush.msra.mxu1 %v2874_v17 }
 0xbcf   :  { %v2747_v25 = vmul.f32 %v5455_v36, %v2738_v12  ;;  %v2910_v12 = vld [vmem:[#allocation2 + $0xbd0] sm:$0xff] }
 0xbd0   :  { %3010 = vmatpush.msra.mxu1 %v2873_v31  ;;  %v2906_v31 = vld [vmem:[#allocation2 + $0xbb0] sm:$0xff] }
 0xbd1   :  { %v2751_v33 = vadd.f32 %v2747_v25, %v5364_v59 }
 0xbd2   :  { %3011 = vmatpush.msra.mxu1 %v2872_v21  ;;  %v2904_v21 = vld [vmem:[#allocation2 + $0xba0] sm:$0xff] }
 0xbd3   :  { %v2755_v30 = vadd.f32 %v2751_v33, %v2360_v32  ;;  %v2908_v32 = vld [vmem:[#allocation2 + $0xbc0] sm:$0xff] }
 0xbd4   :  { %3012 = vmatpush.msra.mxu1 %v2871_v47  ;;  %v2903_v47 = vld [vmem:[#allocation2 + $0xb98] sm:$0xff] }
 0xbd5   :  { %v5488_v20 = vmax.f32 %v2755_v30, 0.0  ;;  %v2923_v30 = vld [vmem:[#allocation2 + $0xc38] sm:$0xff] }
 0xbd6   :  { %v2741_v34 = vpop.f32.mrf.mxu2 }
 0xbd7   :  { %v2748_v59 = vmul.f32 %v5455_v36, %v2741_v34  ;;  %v2823_v45 = vrot.slane %v5488_v20, 3  ;;  %v2870_v36 = vld [vmem:[#allocation2 + $0xa90] sm:$0xff]  ;;  %v2763_v14 = vrot.slane %v5488_v20, 5  ;;  %v2775_v25 = vrot.slane %v5488_v20, 6  ;;  %v2921_v34 = vld [vmem:[#allocation2 + $0xc28] sm:$0xff] }
 0xbd8   :  { %3013 = vmatpush.msra.mxu1 %v2870_v36  ;;  %v2901_v36 = vld [vmem:[#allocation2 + $0xb88] sm:$0xff] }
 0xbd9   :  { %v2752_v50 = vadd.f32 %v2748_v59, %v5362_v49  ;;  %v2826_v42 = vsel %vm5872_vm15, %v2822_v13, %v2823_v45  ;;  %v2761_v49 = vrot.slane %v5471_v23, 5  ;;  %v2912_v13 = vld [vmem:[#allocation2 + $0xbe0] sm:$0xff]  ;;  %v2766_v33 = vsel %vm105_vm14, %v2762_v63, %v2763_v14 }
 0xbda   :  { %4334 = vmatmul.msk.f32.gmra.mxu0 %vm5873_vm2, %v2826_v42  ;;  %3014 = vmatpush.msra.mxu1 %v2869_v53  ;;  %v2778_v17 = vsel %vm122_vm0, %v2774_v10, %v2775_v25  ;;  %vm5879_vm15 = vcmp.ge.s32.totalorder %v4684_v35, 3  ;;  %vm5880_vm2 = vcmp.ge.s32.totalorder %v4684_v35, 2  ;;  %v2920_v59 = vld [vmem:[#allocation2 + $0xc20] sm:$0xff]  ;;  %v2918_v42 = vld [vmem:[#allocation2 + $0xc10] sm:$0xff]  ;;  %v2809_v10 = vrot.slane %v5471_v23, 2 }
 0xbdb   :  { %v2756_v51 = vadd.f32 %v2752_v50, %v2361_v19  ;;  %v2767_v18 = vsel %vm105_vm14, %v2761_v49, %v2762_v63  ;;  %v2919_v19 = vld [vmem:[#allocation2 + $0xc18] sm:$0xff]  ;;  %v2902_v50 = vld [vmem:[#allocation2 + $0xb90] sm:$0xff]  ;;  %v2900_v53 = vld [vmem:[#allocation2 + $0xb80] sm:$0xff]  ;;  %v2797_v63 = vrot.slane %v5471_v23, 1 }
 0xbdc   :  { %3015 = vmatpush.msra.mxu1 %v2868_v11  ;;  %v2899_v11 = vld [vmem:[#allocation2 + $0xb78] sm:$0xff] }
 0xbdd   :  { %v5498_v55 = vmax.f32 %v2756_v51, 0.0  ;;  %v2917_v51 = vld [vmem:[#allocation2 + $0xc08] sm:$0xff] }
 0xbde   :  { %3016 = vmatpush.msra.mxu1 %v2867_v3 }
 0xbdf   :  { %v2764_v62 = vrot.slane %v5498_v55, 5  ;;  %v2776_v2 = vrot.slane %v5498_v55, 6  ;;  %v2824_v61 = vrot.slane %v5498_v55, 3  ;;  %v2788_v39 = vrot.slane %v5498_v55, 7 }
 0xbe0   :  { %3017 = vmatpush.msra.mxu1 %v2866_v58  ;;  %v2798_v58 = vrot.slane %v5473_v40, 1 }
 0xbe1   :  { %v2768_v5 = vsel %vm105_vm14, %v2764_v62, %v2761_v49  ;;  %v2780_v57 = vsel %vm122_vm0, %v2776_v2, %v2773_v29  ;;  %v2825_v7 = vsel %vm5874_vm4, %v2823_v45, %v2824_v61  ;;  %v2828_v8 = vsel %vm5877_vm6, %v2824_v61, %v2821_v60  ;;  %v2924_v60 = vld [vmem:[#allocation2 + $0xc40] sm:$0xff]  ;;  %v2898_v29 = vld [vmem:[#allocation2 + $0xb70] sm:$0xff] }
 0xbe2   :  { %4324 = vmatmul.msk.f32.vlgmr.msrb.gmra.mxu1 %vm5875_vm11, %v2768_v5  ;;  %4326 = vmatmul.msk.f32.vlgmr.msrb.gmra.mxu2 %vm5876_vm10, %v2780_v57  ;;  %v2765_v45 = vsel %vm105_vm14, %v2763_v14, %v2764_v62  ;;  %v2777_v46 = vsel %vm122_vm0, %v2775_v25, %v2776_v2  ;;  %v2792_v49 = vsel %vm139_vm3, %v2788_v39, %v2785_v22  ;;  %v2915_v62 = vld [vmem:[#allocation2 + $0xbf8] sm:$0xff]  ;;  %v2914_v2 = vld [vmem:[#allocation2 + $0xbf0] sm:$0xff]  ;;  %v2786_v61 = vrot.slane %v5473_v40, 7  ;;  %v2913_v5 = vld [vmem:[#allocation2 + $0xbe8] sm:$0xff] }
 0xbe3   :  { %3141 = vmatmul.f32.gmra.mxu0 %v2825_v7  ;;  %3018 = vmatpush.msra.mxu1 %v2865_v15  ;;  %v2787_v7 = vrot.slane %v5488_v20, 7  ;;  %v2803_v15 = vsel %vm156_vm1, %v2797_v63, %v2798_v58  ;;  %vm5881_vm14 = vcmp.lt.s32.totalorder %v4612_v6, 6  ;;  %vm5883_vm11 = vcmp.lt.s32.totalorder %v4664_v26, 14 }
 0xbe4   :  { %3090 = vmatpush.msrb.mxu2 %v2928_v1  ;;  %v2791_v57 = vsel %vm139_vm3, %v2785_v22, %v2786_v61  ;;  %v2815_v16 = vsel %vm5881_vm14, %v2809_v10, %v2810_v38  ;;  %v2811_v1 = vrot.slane %v5488_v20, 2  ;;  %vm5882_vm4 = vmmov %vm5881_vm14 }
 0xbe5   :  { %3061 = vmatpush.msrb.mxu1 %v2912_v13  ;;  %v2790_v3 = vsel %vm139_vm3, %v2786_v61, %v2787_v7  ;;  %v2789_v56 = vsel %vm139_vm3, %v2787_v7, %v2788_v39  ;;  %v2799_v13 = vrot.slane %v5488_v20, 1  ;;  %vm5884_vm10 = vmmov %vm5882_vm4 }
 0xbe6   :  { %3091 = vmatpush.msrb.mxu2 %v2927_v52  ;;  %vm5885_vm6 = vmmov %vm5882_vm4 }
 0xbe7   :  { %3062 = vmatpush.msrb.mxu1 %v2911_v24  ;;  %v2800_v24 = vrot.slane %v5498_v55, 1 }
 0xbe8   :  { %3092 = vmatpush.msrb.mxu2 %v2926_v48 }
 0xbe9   :  { %3063 = vmatpush.msrb.mxu1 %v2910_v12  ;;  %v2801_v52 = vsel %vm156_vm1, %v2799_v13, %v2800_v24  ;;  %v2804_v48 = vsel %vm156_vm1, %v2800_v24, %v2797_v63 }
 0xbea   :  { %2964 = vmatmul.f32.gmra.mxu1 %v2767_v18  ;;  %2993 = vmatmul.f32.gmra.mxu2 %v2779_v0  ;;  %v2802_v18 = vsel %vm156_vm1, %v2798_v58, %v2799_v13  ;;  %v2814_v0 = vsel %vm5882_vm4, %v2810_v38, %v2811_v1  ;;  %vm5887_vm4 = vcmp.ge.s32.totalorder %v4617_v9, 2 }
 0xbeb   :  { %4335 = vmatmul.msk.f32.gmra.mxu0 %vm5878_vm12, %v2828_v8  ;;  %3064 = vmatpush.msrb.mxu1 %v2909_v27  ;;  %v2812_v8 = vrot.slane %v5498_v55, 2  ;;  %vm5886_vm12 = vcmp.lt.s32.totalorder %v4732_v54, 14 }
 0xbec   :  { %3093 = vmatpush.msrb.mxu2 %v2925_v28 }
 0xbed   :  { %3065 = vmatpush.msrb.mxu1 %v2908_v32  ;;  %v2813_v12 = vsel %vm5884_vm10, %v2811_v1, %v2812_v8  ;;  %v2816_v14 = vsel %vm5885_vm6, %v2812_v8, %v2809_v10  ;;  %vm5889_vm10 = vmmov %vm5885_vm6 }
 0xbee   :  { %3094 = vmatpush.msrb.mxu2 %v2924_v60 }
 0xbef   :  { %3066 = vmatpush.msrb.mxu1 %v2907_v37 }
 0xbf0   :  { %3095 = vmatpush.msrb.mxu2 %v2923_v30 }
 0xbf1   :  { %3067 = vmatpush.msrb.mxu1 %v2906_v31 }
 0xbf2   :  { %4325 = vmatmul.msk.f32.gmra.mxu1 %vm5879_vm15, %v2766_v33  ;;  %4327 = vmatmul.msk.f32.gmra.mxu2 %vm5880_vm2, %v2778_v17 }
 0xbf3   :  { %3096 = vmatpush.msrb.mxu2 %v2922_v41  ;;  %3068 = vmatpush.msrb.mxu1 %v2905_v43 }
 0xbf5   :  { %3097 = vmatpush.msrb.mxu2 %v2921_v34  ;;  %3069 = vmatpush.msrb.mxu1 %v2904_v21 }
 0xbf7   :  { %3098 = vmatpush.msrb.mxu2 %v2920_v59  ;;  %3070 = vmatpush.msrb.mxu1 %v2903_v47 }
 0xbf9   :  { %3099 = vmatpush.msrb.mxu2 %v2919_v19  ;;  %3071 = vmatpush.msrb.mxu1 %v2902_v50 }
 0xbfa   :  { %2970 = vmatmul.f32.gmra.mxu1 %v2765_v45  ;;  %2999 = vmatmul.f32.gmra.mxu2 %v2777_v46 }
 0xbfb   :  { %3100 = vmatpush.msrb.mxu2 %v2918_v42  ;;  %3072 = vmatpush.msrb.mxu1 %v2901_v36 }
 0xbfd   :  { %3101 = vmatpush.msrb.mxu2 %v2917_v51  ;;  %3073 = vmatpush.msrb.mxu1 %v2900_v53 }
 0xbff   :  { %3102 = vmatpush.msrb.mxu2 %v2916_v44  ;;  %3074 = vmatpush.msrb.mxu1 %v2899_v11 }
 0xc01   :  { %3103 = vmatpush.msrb.mxu2 %v2915_v62  ;;  %3075 = vmatpush.msrb.mxu1 %v2898_v29 }
 0xc02   :  { %4328 = vmatmul.msk.f32.vlgmr.msra.gmra.mxu1 %vm144_vm5, %v2792_v49  ;;  %3048 = vmatmul.f32.vlgmr.msra.gmra.mxu2 %v5471_v23 }
 0xc03   :  { %3104 = vmatpush.msrb.mxu2 %v2914_v2  ;;  %3076 = vmatpush.msrb.mxu1 %v2897_v4 }
 0xc05   :  { %3105 = vmatpush.msrb.mxu2 %v2913_v5 }
 0xc0a   :  { %3022 = vmatmul.f32.gmra.mxu1 %v2791_v57  ;;  %3051 = vmatmul.f32.gmra.mxu2 %v5473_v40 }
 0xc12   :  { %4329 = vmatmul.msk.f32.gmra.mxu1 %vm146_vm9, %v2790_v3  ;;  %3054 = vmatmul.f32.gmra.mxu2 %v5488_v20 }
 0xc1a   :  { %3028 = vmatmul.f32.gmra.mxu1 %v2789_v56  ;;  %3057 = vmatmul.f32.gmra.mxu2 %v5498_v55 }
 0xc22   :  { %3077 = vmatmul.f32.vlgmr.msrb.gmra.mxu1 %v2803_v15  ;;  %3106 = vmatmul.f32.vlgmr.msrb.gmra.mxu2 %v2815_v16 }
 0xc2a   :  { %4330 = vmatmul.msk.f32.gmra.mxu1 %vm162_vm8, %v2802_v18  ;;  %4332 = vmatmul.msk.f32.gmra.mxu2 %vm5883_vm11, %v2814_v0  ;;  %vm5888_vm11 = vcmp.ge.s32.totalorder %v4684_v35, 2 }
 0xc32   :  { %3083 = vmatmul.f32.gmra.mxu1 %v2801_v52  ;;  %3112 = vmatmul.f32.gmra.mxu2 %v2813_v12 }
 0xc3a   :  { %4331 = vmatmul.msk.f32.gmra.mxu1 %vm164_vm13, %v2804_v48  ;;  %4333 = vmatmul.msk.f32.gmra.mxu2 %vm5886_vm12, %v2816_v14 }
 0xc49   :  { %v3136_v47 = vpop.f32.mrf.mxu0 }
 0xc57   :  { %v3139_v42 = vpop.f32.mrf.mxu0 }
 0xc5f   :  { %v2962_v25 = vpop.f32.mrf.mxu1 }
 0xc60   :  { %v3142_v4 = vpop.f32.mrf.mxu0 }
 0xc65   :  { %v2991_v27 = vpop.f32.mrf.mxu2 }
 0xc66   :  { %v2992_v22 = vadd.f32 %v2991_v27, %v2962_v25 }
 0xc67   :  { %v2965_v28 = vpop.f32.mrf.mxu1 }
 0xc68   :  { %v3145_v52 = vpop.f32.mrf.mxu0 }
 0xc6d   :  { %v2994_v32 = vpop.f32.mrf.mxu2 }
 0xc6e   :  { %v2995_v36 = vadd.f32 %v2994_v32, %v2965_v28 }
 0xc6f   :  { %v2968_v60 = vpop.f32.mrf.mxu1 }
 0xc75   :  { %v2997_v33 = vpop.f32.mrf.mxu2 }
 0xc76   :  { %v2998_v53 = vadd.f32 %v2997_v33, %v2968_v60 }
 0xc77   :  { %v2971_v17 = vpop.f32.mrf.mxu1 }
 0xc7d   :  { %v3000_v37 = vpop.f32.mrf.mxu2 }
 0xc7e   :  { %v3001_v57 = vadd.f32 %v3000_v37, %v2971_v17  ;;  %v3299_v17 = vld [vmem:[#allocation2 + $0xe70] sm:$0xff] }
 0xc7f   :  { %v3020_v30 = vpop.f32.mrf.mxu1  ;;  %3390 = vmatpush.msra.mxu2 %v3299_v17  ;;  %v3258_v17 = vld [vmem:[#allocation2 + $0xd28] sm:$0xff] }
 0xc80   :  { %v3021_v49 = vadd.f32 %v3020_v30, %v2992_v22  ;;  %v3298_v30 = vld [vmem:[#allocation2 + $0xe68] sm:$0xff] }
 0xc81   :  { %3391 = vmatpush.msra.mxu2 %v3298_v30  ;;  %v3306_v30 = vld [vmem:[#allocation2 + $0xea8] sm:$0xff] }
 0xc85   :  { %v3049_v31 = vpop.f32.mrf.mxu2 }
 0xc86   :  { %v3050_v29 = vadd.f32 %v3049_v31, %v3021_v49  ;;  %v3313_v49 = vld [vmem:[#allocation2 + $0xee0] sm:$0xff] }
 0xc87   :  { %v3023_v41 = vpop.f32.mrf.mxu1 }
 0xc88   :  { %v3024_v44 = vadd.f32 %v3023_v41, %v2995_v36  ;;  %v3296_v36 = vld [vmem:[#allocation2 + $0xe58] sm:$0xff] }
 0xc8d   :  { %v3052_v43 = vpop.f32.mrf.mxu2 }
 0xc8e   :  { %v3053_v11 = vadd.f32 %v3052_v43, %v3024_v44  ;;  %v3281_v44 = vld [vmem:[#allocation2 + $0xde0] sm:$0xff] }
 0xc8f   :  { %v3026_v34 = vpop.f32.mrf.mxu1 }
 0xc90   :  { %v3027_v62 = vadd.f32 %v3026_v34, %v2998_v53  ;;  %v3267_v34 = vld [vmem:[#allocation2 + $0xd70] sm:$0xff]  ;;  %v3265_v53 = vld [vmem:[#allocation2 + $0xd60] sm:$0xff] }
 0xc91   :  { %3332 = vmatpush.msra.mxu3 %v3267_v34  ;;  %v3288_v34 = vld [vmem:[#allocation2 + $0xe18] sm:$0xff] }
 0xc95   :  { %v3055_v21 = vpop.f32.mrf.mxu2 }
 0xc96   :  { %v3056_v2 = vadd.f32 %v3055_v21, %v3027_v62  ;;  %v3283_v21 = vld [vmem:[#allocation2 + $0xdf0] sm:$0xff] }
 0xc97   :  { %v3029_v59 = vpop.f32.mrf.mxu1  ;;  %3361 = vmatpush.msra.mxu1 %v3283_v21 }
 0xc98   :  { %v3030_v58 = vadd.f32 %v3029_v59, %v3001_v57  ;;  %v3315_v59 = vld [vmem:[#allocation2 + $0xef0] sm:$0xff] }
 0xc99   :  { %3419 = vmatpush.msra.mxu0 %v3315_v59  ;;  %v3257_v59 = vld [vmem:[#allocation2 + $0xd20] sm:$0xff] }
 0xc9d   :  { %v3058_v45 = vpop.f32.mrf.mxu2 }
 0xc9e   :  { %v3059_v15 = vadd.f32 %v3058_v45, %v3030_v58  ;;  %v3297_v45 = vld [vmem:[#allocation2 + $0xe60] sm:$0xff] }
 0xc9f   :  { %v3078_v46 = vpop.f32.mrf.mxu1  ;;  %3392 = vmatpush.msra.mxu2 %v3297_v45  ;;  %v3293_v58 = vld [vmem:[#allocation2 + $0xe40] sm:$0xff] }
 0xca0   :  { %v3079_v7 = vadd.f32 %v3078_v46, %v3050_v29  ;;  %v3273_v45 = vld [vmem:[#allocation2 + $0xda0] sm:$0xff] }
 0xca1   :  { %3393 = vmatpush.msra.mxu2 %v3296_v36  ;;  %v3304_v36 = vld [vmem:[#allocation2 + $0xe98] sm:$0xff] }
 0xca5   :  { %v3107_v19 = vpop.f32.mrf.mxu2 }
 0xca6   :  { %v3108_v38 = vadd.f32 %v3107_v19, %v3079_v7  ;;  %v3263_v7 = vld [vmem:[#allocation2 + $0xd50] sm:$0xff] }
 0xca7   :  { %v3081_v50 = vpop.f32.mrf.mxu1 }
 0xca8   :  { %v3082_v61 = vadd.f32 %v3081_v50, %v3053_v11  ;;  %v3137_v13 = vadd.f32 %v3136_v47, %v3108_v38  ;;  %v3266_v50 = vld [vmem:[#allocation2 + $0xd68] sm:$0xff]  ;;  %v3295_v11 = vld [vmem:[#allocation2 + $0xe50] sm:$0xff] }
 0xca9   :  { %3333 = vmatpush.msra.mxu3 %v3266_v50  ;;  %3394 = vmatpush.msra.mxu2 %v3295_v11  ;;  %v3256_v50 = vld [vmem:[#allocation2 + $0xd18] sm:$0xff]  ;;  %v3285_v11 = vld [vmem:[#allocation2 + $0xe00] sm:$0xff] }
 0xcab   :  { %3334 = vmatpush.msra.mxu3 %v3265_v53  ;;  %v3271_v53 = vld [vmem:[#allocation2 + $0xd90] sm:$0xff] }
 0xcad   :  { %v3110_v39 = vpop.f32.mrf.mxu2 }
 0xcae   :  { %v3111_v3 = vadd.f32 %v3110_v39, %v3082_v61  ;;  %v3314_v39 = vld [vmem:[#allocation2 + $0xee8] sm:$0xff]  ;;  %v3280_v61 = vld [vmem:[#allocation2 + $0xdd8] sm:$0xff] }
 0xcaf   :  { %v3084_v51 = vpop.f32.mrf.mxu1  ;;  %3420 = vmatpush.msra.mxu0 %v3314_v39 }
 0xcb0   :  { %v3085_v56 = vadd.f32 %v3084_v51, %v3056_v2  ;;  %v3140_v16 = vadd.f32 %v3139_v42, %v3111_v3  ;;  %v3282_v42 = vld [vmem:[#allocation2 + $0xde8] sm:$0xff]  ;;  %v3264_v2 = vld [vmem:[#allocation2 + $0xd58] sm:$0xff]  ;;  %v3279_v3 = vld [vmem:[#allocation2 + $0xdd0] sm:$0xff] }
 0xcb1   :  { %3362 = vmatpush.msra.mxu1 %v3282_v42  ;;  %3421 = vmatpush.msra.mxu0 %v3313_v49  ;;  %v3272_v42 = vld [vmem:[#allocation2 + $0xd98] sm:$0xff] }
 0xcb2   :  { %v3148_v24 = vadd.f32 %v3140_v16, %v3137_v13  ;;  %3335 = vmatpush.msra.mxu3 %v3264_v2  ;;  %v3302_v2 = vld [vmem:[#allocation2 + $0xe88] sm:$0xff] }
 0xcb3   :  { %3363 = vmatpush.msra.mxu1 %v3281_v44  ;;  %v3303_v44 = vld [vmem:[#allocation2 + $0xe90] sm:$0xff] }
 0xcb4   :  { %3336 = vmatpush.msra.mxu3 %v3263_v7  ;;  %v3252_v7 = vld [vmem:[#allocation2 + $0xcf8] sm:$0xff] }
 0xcb5   :  { %v3113_v5 = vpop.f32.mrf.mxu2  ;;  %3364 = vmatpush.msra.mxu1 %v3280_v61  ;;  %v3284_v61 = vld [vmem:[#allocation2 + $0xdf8] sm:$0xff] }
 0xcb6   :  { %v3114_v63 = vadd.f32 %v3113_v5, %v3085_v56  ;;  %v3294_v5 = vld [vmem:[#allocation2 + $0xe48] sm:$0xff]  ;;  %v3311_v56 = vld [vmem:[#allocation2 + $0xed0] sm:$0xff] }
 0xcb7   :  { %v3087_v10 = vpop.f32.mrf.mxu1  ;;  %3395 = vmatpush.msra.mxu2 %v3294_v5  ;;  %3365 = vmatpush.msra.mxu1 %v3279_v3  ;;  %v3269_v5 = vld [vmem:[#allocation2 + $0xd80] sm:$0xff]  ;;  %v3268_v3 = vld [vmem:[#allocation2 + $0xd78] sm:$0xff] }
 0xcb8   :  { %v3143_v1 = vadd.f32 %v3142_v4, %v3114_v63  ;;  %v3088_v18 = vadd.f32 %v3087_v10, %v3059_v15  ;;  %v3312_v4 = vld [vmem:[#allocation2 + $0xed8] sm:$0xff]  ;;  %v3262_v63 = vld [vmem:[#allocation2 + $0xd48] sm:$0xff] }
 0xcb9   :  { %3422 = vmatpush.msra.mxu0 %v3312_v4  ;;  %v3278_v10 = vld [vmem:[#allocation2 + $0xdc8] sm:$0xff]  ;;  %3396 = vmatpush.msra.mxu2 %v3293_v58  ;;  %v3253_v4 = vld [vmem:[#allocation2 + $0xd00] sm:$0xff]  ;;  %v3331_v58 = vld [vmem:[#allocation2 + $0xf70] sm:$0xff] }
 0xcba   :  { %v3149_v12 = vadd.f32 %v3148_v24, %v3143_v1  ;;  %v3310_v15 = vld [vmem:[#allocation2 + $0xec8] sm:$0xff]  ;;  %3337 = vmatpush.msra.mxu3 %v3262_v63  ;;  %3366 = vmatpush.msra.mxu1 %v3278_v10  ;;  %v3291_v24 = vld [vmem:[#allocation2 + $0xe30] sm:$0xff] }
 0xcbb   :  { %3423 = vmatpush.msra.mxu0 %v3311_v56  ;;  %v3300_v56 = vld [vmem:[#allocation2 + $0xe78] sm:$0xff]  ;;  %v3330_v63 = vld [vmem:[#allocation2 + $0xf68] sm:$0xff] }
 0xcbd   :  { %v3116_v0 = vpop.f32.mrf.mxu2  ;;  %3424 = vmatpush.msra.mxu0 %v3310_v15  ;;  %v3329_v15 = vld [vmem:[#allocation2 + $0xf60] sm:$0xff] }
 0xcbe   :  { %v3117_v8 = vadd.f32 %v3116_v0, %v3088_v18  ;;  %v3277_v18 = vld [vmem:[#allocation2 + $0xdc0] sm:$0xff] }
 0xcbf   :  { %v3309_v0 = vld [vmem:[#allocation2 + $0xec0] sm:$0xff]  ;;  %3367 = vmatpush.msra.mxu1 %v3277_v18  ;;  %v3327_v18 = vld [vmem:[#allocation2 + $0xf50] sm:$0xff] }
 0xcc0   :  { %v3146_v48 = vadd.f32 %v3145_v52, %v3117_v8  ;;  %3425 = vmatpush.msra.mxu0 %v3309_v0  ;;  %v3260_v52 = vld [vmem:[#allocation2 + $0xd38] sm:$0xff] }
 0xcc2   :  { %v3150_v14 = vadd.f32 %v3149_v12, %v3146_v48  ;;  %v3276_v12 = vld [vmem:[#allocation2 + $0xdb8] sm:$0xff] }
 0xcc3   :  { %3368 = vmatpush.msra.mxu1 %v3276_v12  ;;  %v3325_v12 = vld [vmem:[#allocation2 + $0xf40] sm:$0xff] }
 0xcc4   :  { %v3151_v25 = vrot.slane %v3150_v14, 4 }
 0xcc6   :  { %v3152_v27 = vadd.f32 %v3151_v25, %v3150_v14  ;;  %v3290_v14 = vld [vmem:[#allocation2 + $0xe28] sm:$0xff] }
 0xcc8   :  { %v3153_v28 = vrot.slane %v3152_v27, 2 }
 0xcca   :  { %v3154_v32 = vadd.f32 %v3153_v28, %v3152_v27  ;;  %v3259_v27 = vld [vmem:[#allocation2 + $0xd30] sm:$0xff] }
 0xccb   :  { %v3275_v28 = vld [vmem:[#allocation2 + $0xdb0] sm:$0xff] }
 0xccc   :  { %v3155_v60 = vrot.slane %v3154_v32, 1  ;;  %3369 = vmatpush.msra.mxu1 %v3275_v28  ;;  %v4456_v28 = vld [vmem:[#allocation2 + $0xcf0] ss:$0 sm:$0xff] }
 0xcce   :  { %v3156_v33 = vadd.f32 %v3155_v60, %v3154_v32  ;;  %v3307_v32 = vld [vmem:[#allocation2 + $0xeb0] sm:$0xff]  ;;  %v3289_v60 = vld [vmem:[#allocation2 + $0xe20] sm:$0xff] }
 0xcd0   :  { %v3157_v37 = vmul.f32 0.03125, %v3156_v33 }
 0xcd2   :  { %v5601_v31 = vsub.f32 %v3137_v13, %v3157_v37  ;;  %v5603_v41 = vsub.f32 %v3140_v16, %v3157_v37  ;;  %v5605_v43 = vsub.f32 %v3143_v1, %v3157_v37  ;;  %v5607_v46 = vsub.f32 %v3146_v48, %v3157_v37  ;;  %v3292_v16 = vld [vmem:[#allocation2 + $0xe38] sm:$0xff]  ;;  %v3261_v1 = vld [vmem:[#allocation2 + $0xd40] sm:$0xff]  ;;  %v3274_v37 = vld [vmem:[#allocation2 + $0xda8] sm:$0xff] }
 0xcd3   :  { %3397 = vmatpush.msra.mxu2 %v3292_v16  ;;  %3338 = vmatpush.msra.mxu3 %v3261_v1  ;;  %v3308_v48 = vld [vmem:[#allocation2 + $0xeb8] sm:$0xff] }
 0xcd4   :  { %v3162_v47 = vmul.f32 %v5601_v31, %v5601_v31  ;;  %v3163_v19 = vmul.f32 %v5603_v41, %v5603_v41  ;;  %v3164_v51 = vmul.f32 %v5605_v43, %v5605_v43  ;;  %v3165_v62 = vmul.f32 %v5607_v46, %v5607_v46  ;;  %3426 = vmatpush.msra.mxu0 %v3308_v48 }
 0xcd5   :  { %3398 = vmatpush.msra.mxu2 %v3291_v24  ;;  %3339 = vmatpush.msra.mxu3 %v3260_v52  ;;  %v3326_v24 = vld [vmem:[#allocation2 + $0xf48] sm:$0xff] }
 0xcd6   :  { %v3166_v22 = vadd.f32 %v3163_v19, %v3162_v47  ;;  %3427 = vmatpush.msra.mxu0 %v3307_v32  ;;  %3370 = vmatpush.msra.mxu1 %v3274_v37  ;;  %v3305_v47 = vld [vmem:[#allocation2 + $0xea0] sm:$0xff]  ;;  %v3287_v19 = vld [vmem:[#allocation2 + $0xe10] sm:$0xff]  ;;  %v3187_v52 = vld [vmem:[#allocation2 + $0xce8] sm:$0x1] }
 0xcd7   :  { %3399 = vmatpush.msra.mxu2 %v3290_v14  ;;  %3340 = vmatpush.msra.mxu3 %v3259_v27  ;;  %v3323_v32 = vld [vmem:[#allocation2 + $0xf30] sm:$0xff]  ;;  %v3322_v37 = vld [vmem:[#allocation2 + $0xf28] sm:$0xff] }
 0xcd8   :  { %v3167_v29 = vadd.f32 %v3166_v22, %v3164_v51  ;;  %3428 = vmatpush.msra.mxu0 %v3306_v30  ;;  %3371 = vmatpush.msra.mxu1 %v3273_v45  ;;  %v3286_v51 = vld [vmem:[#allocation2 + $0xe08] sm:$0xff]  ;;  %v3255_v22 = vld [vmem:[#allocation2 + $0xd10] sm:$0xff]  ;;  %v3321_v45 = vld [vmem:[#allocation2 + $0xf20] sm:$0xff] }
 0xcd9   :  { %3400 = vmatpush.msra.mxu2 %v3289_v60  ;;  %3341 = vmatpush.msra.mxu3 %v3258_v17 }
 0xcda   :  { %v3168_v57 = vadd.f32 %v3167_v29, %v3165_v62  ;;  %3429 = vmatpush.msra.mxu0 %v3305_v47  ;;  %3372 = vmatpush.msra.mxu1 %v3272_v42  ;;  %v3254_v62 = vld [vmem:[#allocation2 + $0xd08] sm:$0xff] }
 0xcdb   :  { %3401 = vmatpush.msra.mxu2 %v3288_v34  ;;  %3342 = vmatpush.msra.mxu3 %v3257_v59  ;;  %v3270_v29 = vld [vmem:[#allocation2 + $0xd88] sm:$0xff] }
 0xcdc   :  { %v3169_v38 = vrot.slane %v3168_v57, 4  ;;  %3430 = vmatpush.msra.mxu0 %v3304_v36  ;;  %3373 = vmatpush.msra.mxu1 %v3271_v53 }
 0xcdd   :  { %3402 = vmatpush.msra.mxu2 %v3287_v19  ;;  %3343 = vmatpush.msra.mxu3 %v3256_v50 }
 0xcde   :  { %v3170_v13 = vadd.f32 %v3169_v38, %v3168_v57  ;;  %3431 = vmatpush.msra.mxu0 %v3303_v44  ;;  %v3301_v57 = vld [vmem:[#allocation2 + $0xe80] sm:$0xff]  ;;  %3374 = vmatpush.msra.mxu1 %v3270_v29 }
 0xcdf   :  { %3403 = vmatpush.msra.mxu2 %v3286_v51  ;;  %3344 = vmatpush.msra.mxu3 %v3255_v22  ;;  %v3319_v22 = vld [vmem:[#allocation2 + $0xf10] sm:$0xff]  ;;  %v3317_v29 = vld [vmem:[#allocation2 + $0xf00] sm:$0xff] }
 0xce0   :  { %v3171_v8 = vrot.slane %v3170_v13, 2  ;;  %3432 = vmatpush.msra.mxu0 %v3302_v2  ;;  %3375 = vmatpush.msra.mxu1 %v3269_v5  ;;  %v3316_v5 = vld [vmem:[#allocation2 + $0xef8] sm:$0xff] }
 0xce1   :  { %3404 = vmatpush.msra.mxu2 %v3285_v11  ;;  %3345 = vmatpush.msra.mxu3 %v3254_v62  ;;  %v3318_v62 = vld [vmem:[#allocation2 + $0xf08] sm:$0xff] }
 0xce2   :  { %v3172_v25 = vadd.f32 %v3171_v8, %v3170_v13  ;;  %3433 = vmatpush.msra.mxu0 %v3301_v57  ;;  %3376 = vmatpush.msra.mxu1 %v3268_v3  ;;  %v3328_v13 = vld [vmem:[#allocation2 + $0xf58] sm:$0xff] }
 0xce3   :  { %3405 = vmatpush.msra.mxu2 %v3284_v61  ;;  %3346 = vmatpush.msra.mxu3 %v3253_v4 }
 0xce4   :  { %v3173_v33 = vrot.slane %v3172_v25, 1  ;;  %3434 = vmatpush.msra.mxu0 %v3300_v56 }
 0xce5   :  { %3347 = vmatpush.msra.mxu3 %v3252_v7 }
 0xce6   :  { %v3174_v21 = vadd.f32 %v3173_v33, %v3172_v25  ;;  %v3324_v25 = vld [vmem:[#allocation2 + $0xf38] sm:$0xff] }
 0xce7   :  { %3448 = vmatpush.msrb.mxu3 %v3331_v58 }
 0xce8   :  { %v3175_v39 = vmul.f32 0.03125, %v3174_v21 }
 0xce9   :  { %3449 = vmatpush.msrb.mxu3 %v3330_v63 }
 0xcea   :  { %v3176_v49 = vadd.f32 1e-05, %v3175_v39 }
 0xceb   :  { %3450 = vmatpush.msrb.mxu3 %v3329_v15 }
 0xcec   :  { %4476 = vrsqrt.f32 %v3176_v49  ;;  %vm3183_vm2 = vweird.f32 %v3176_v49 }
 0xced   :  { %3451 = vmatpush.msrb.mxu3 %v3328_v13 }
 0xcef   :  { %3452 = vmatpush.msrb.mxu3 %v3327_v18 }
 0xcf1   :  { %3453 = vmatpush.msrb.mxu3 %v3326_v24 }
 0xcf2   :  { %v4477_v38 = vpop.eup %4476 }
 0xcf3   :  { %v3178_v10 = vmul.f32 %v4477_v38, %v3176_v49  ;;  %vm3184_vm15 = vweird.f32 %v4477_v38  ;;  %3454 = vmatpush.msrb.mxu3 %v3325_v12 }
 0xcf4   :  { %vm3185_vm14 = vmor %vm3183_vm2, %vm3184_vm15  ;;  %vm5894_vm2 = vcmp.lt.s32.totalorder %v4732_v54, 14 }
 0xcf5   :  { %v3179_v16 = vmul.f32 %v4477_v38, %v3178_v10  ;;  %3455 = vmatpush.msrb.mxu3 %v3324_v25 }
 0xcf7   :  { %v3180_v1 = vmul.f32 0.5, %v3179_v16  ;;  %3456 = vmatpush.msrb.mxu3 %v3323_v32 }
 0xcf9   :  { %v3181_v0 = vsub.f32 1.5, %v3180_v1  ;;  %3457 = vmatpush.msrb.mxu3 %v3322_v37 }
 0xcfb   :  { %v3182_v8 = vmul.f32 %v4477_v38, %v3181_v0  ;;  %3458 = vmatpush.msrb.mxu3 %v3321_v45 }
 0xcfd   :  { %v3186_v48 = vsel %vm3185_vm14, %v4477_v38, %v3182_v8 }
 0xcfe   :  { %v3188_v14 = vmul.f32 %v3187_v52, %v3186_v48 }
 0xd00   :  { %v3189_v27 = vperm.slane %v3188_v14, 0 }
 0xd02   :  { %v3191_v60 = vmul.f32 %v3189_v27, %v5603_v41  ;;  %v3193_v33 = vmul.f32 %v3189_v27, %v5607_v46  ;;  %v3190_v17 = vmul.f32 %v3189_v27, %v5601_v31  ;;  %v3192_v30 = vmul.f32 %v3189_v27, %v5605_v43  ;;  %v3320_v41 = vld [vmem:[#allocation2 + $0xf18] sm:$0xff] }
 0xd03   :  { %3459 = vmatpush.msrb.mxu3 %v3320_v41 }
 0xd04   :  { %v3197_v34 = vadd.f32 %v4456_v28, %v3191_v60  ;;  %v3199_v21 = vadd.f32 %v4456_v28, %v3193_v33  ;;  %v3196_v59 = vadd.f32 %v4456_v28, %v3190_v17  ;;  %v3198_v42 = vadd.f32 %v4456_v28, %v3192_v30 }
 0xd05   :  { %3460 = vmatpush.msrb.mxu3 %v3319_v22 }
 0xd06   :  { %v5621_v47 = vmax.f32 %v3197_v34, 0.0  ;;  %v5623_v19 = vmax.f32 %v3199_v21, 0.0  ;;  %v5625_v50 = vmax.f32 %v3196_v59, 0.0  ;;  %v3202_v49 = vmax.f32 %v3198_v42, 0.0 }
 0xd07   :  { %3461 = vmatpush.msrb.mxu3 %v3318_v62 }
 0xd08   :  { %3406 = vmatmul.f32.vlgmr.msra.gmra.mxu2 %v5625_v50  ;;  %v3204_v31 = vrot.slane %v5625_v50, 6  ;;  %v3207_v43 = vrot.slane %v5623_v19, 6  ;;  %v3216_v46 = vrot.slane %v5625_v50, 7  ;;  %v3219_v39 = vrot.slane %v5623_v19, 7 }
 0xd09   :  { %v3228_v36 = vrot.slane %v5625_v50, 1  ;;  %v3229_v51 = vrot.slane %v5621_v47, 1  ;;  %v3205_v2 = vrot.slane %v5621_v47, 6  ;;  %v3217_v61 = vrot.slane %v5621_v47, 7  ;;  %3462 = vmatpush.msrb.mxu3 %v3317_v29 }
 0xd0a   :  { %v3211_v53 = vsel %vm122_vm0, %v3207_v43, %v3204_v31  ;;  %v3223_v44 = vsel %vm139_vm3, %v3219_v39, %v3216_v46  ;;  %v3230_v4 = vrot.slane %v3202_v49, 1  ;;  %v3206_v56 = vrot.slane %v3202_v49, 6 }
 0xd0b   :  { %4336 = vmatmul.msk.f32.vlgmr.msra.gmra.mxu3 %vm5887_vm4, %v3211_v53  ;;  %4338 = vmatmul.msk.f32.vlgmr.msra.gmra.mxu1 %vm144_vm5, %v3223_v44  ;;  %v3234_v11 = vsel %vm156_vm1, %v3228_v36, %v3229_v51  ;;  %v3210_v57 = vsel %vm122_vm0, %v3204_v31, %v3205_v2  ;;  %v3222_v7 = vsel %vm139_vm3, %v3216_v46, %v3217_v61  ;;  %v3218_v58 = vrot.slane %v3202_v49, 7 }
 0xd0c   :  { %3435 = vmatmul.f32.vlgmr.msra.gmra.mxu0 %v3234_v11  ;;  %3463 = vmatpush.msrb.mxu3 %v3316_v5  ;;  %v3233_v3 = vsel %vm156_vm1, %v3229_v51, %v3230_v4  ;;  %v3231_v38 = vrot.slane %v5623_v19, 1  ;;  %v3209_v63 = vsel %vm122_vm0, %v3205_v2, %v3206_v56  ;;  %v3208_v16 = vsel %vm122_vm0, %v3206_v56, %v3207_v43  ;;  %vm5890_vm0 = vmmov %vm5885_vm6 }
 0xd0d   :  { %v3221_v10 = vsel %vm139_vm3, %v3217_v61, %v3218_v58  ;;  %v3220_v13 = vsel %vm139_vm3, %v3218_v58, %v3219_v39  ;;  %v3240_v18 = vrot.slane %v5625_v50, 2  ;;  %v3241_v0 = vrot.slane %v5621_v47, 2  ;;  %vm5892_vm12 = vmmov %vm5890_vm0 }
 0xd0e   :  { %v3232_v15 = vsel %vm156_vm1, %v3230_v4, %v3231_v38  ;;  %v3235_v1 = vsel %vm156_vm1, %v3231_v38, %v3228_v36  ;;  %v3242_v8 = vrot.slane %v3202_v49, 2  ;;  %vm5891_vm6 = vcmp.lt.s32.totalorder %v4664_v26, 14  ;;  %vm5893_vm15 = vmmov %vm5890_vm0 }
 0xd0f   :  { %v3246_v24 = vsel %vm5889_vm10, %v3240_v18, %v3241_v0  ;;  %v3243_v12 = vrot.slane %v5623_v19, 2 }
 0xd10   :  { %3409 = vmatmul.f32.gmra.mxu2 %v5621_v47  ;;  %v3245_v52 = vsel %vm5890_vm0, %v3241_v0, %v3242_v8 }
 0xd11   :  { %v3244_v48 = vsel %vm5892_vm12, %v3242_v8, %v3243_v12  ;;  %v3247_v14 = vsel %vm5893_vm15, %v3243_v12, %v3240_v18  ;;  %v3587_v18 = vld [vmem:[#allocation2 + $0x1078] sm:$0xff]  ;;  %v3604_v12 = vld [vmem:[#allocation2 + $0x1100] sm:$0xff] }
 0xd12   :  { %3663 = vmatpush.msrb.mxu0 %v3604_v12  ;;  %v3574_v12 = vld [vmem:[#allocation2 + $0x1010] sm:$0xff] }
 0xd13   :  { %3351 = vmatmul.f32.gmra.mxu3 %v3210_v57  ;;  %3380 = vmatmul.f32.gmra.mxu1 %v3222_v7 }
 0xd14   :  { %4340 = vmatmul.msk.f32.gmra.mxu0 %vm162_vm8, %v3233_v3 }
 0xd18   :  { %3412 = vmatmul.f32.gmra.mxu2 %v3202_v49 }
 0xd1b   :  { %4337 = vmatmul.msk.f32.gmra.mxu3 %vm5888_vm11, %v3209_v63  ;;  %4339 = vmatmul.msk.f32.gmra.mxu1 %vm146_vm9, %v3221_v10 }
 0xd1c   :  { %3441 = vmatmul.f32.gmra.mxu0 %v3232_v15 }
 0xd20   :  { %3415 = vmatmul.f32.gmra.mxu2 %v5623_v19 }
 0xd23   :  { %3357 = vmatmul.f32.gmra.mxu3 %v3208_v16  ;;  %3386 = vmatmul.f32.gmra.mxu1 %v3220_v13  ;;  %v3588_v13 = vld [vmem:[#allocation2 + $0x1080] sm:$0xff] }
 0xd24   :  { %4341 = vmatmul.msk.f32.gmra.mxu0 %vm164_vm13, %v3235_v1  ;;  %3634 = vmatpush.msrb.mxu2 %v3588_v13  ;;  %v3593_v13 = vld [vmem:[#allocation2 + $0x10a8] sm:$0xff] }
 0xd26   :  { %3635 = vmatpush.msrb.mxu2 %v3587_v18  ;;  %v3560_v18 = vld [vmem:[#allocation2 + $0xfa0] sm:$0xff] }
 0xd2b   :  { %3464 = vmatmul.f32.vlgmr.msrb.gmra.mxu3 %v3246_v24 }
 0xd33   :  { %4342 = vmatmul.msk.f32.gmra.mxu3 %vm5891_vm6, %v3245_v52  ;;  %v3572_v52 = vld [vmem:[#allocation2 + $0x1000] sm:$0xff] }
 0xd34   :  { %3605 = vmatpush.msrb.mxu1 %v3572_v52  ;;  %v3592_v52 = vld [vmem:[#allocation2 + $0x10a0] sm:$0xff] }
 0xd3b   :  { %3470 = vmatmul.f32.gmra.mxu3 %v3244_v48  ;;  %v3586_v48 = vld [vmem:[#allocation2 + $0x1070] sm:$0xff] }
 0xd3c   :  { %3636 = vmatpush.msrb.mxu2 %v3586_v48 }
 0xd43   :  { %4343 = vmatmul.msk.f32.gmra.mxu3 %vm5894_vm2, %v3247_v14 }
 0xd88   :  { %v3378_v28 = vpop.f32.mrf.mxu1 }
 0xd89   :  { %v3436_v33 = vpop.f32.mrf.mxu0 }
 0xd8b   :  { %v3407_v60 = vpop.f32.mrf.mxu2 }
 0xd8e   :  { %v3349_v25 = vpop.f32.mrf.mxu3 }
 0xd8f   :  { %v3379_v50 = vadd.f32 %v3378_v28, %v3349_v25  ;;  %v3571_v28 = vld [vmem:[#allocation2 + $0xff8] sm:$0xff] }
 0xd90   :  { %v3381_v37 = vpop.f32.mrf.mxu1  ;;  %3606 = vmatpush.msrb.mxu1 %v3571_v28  ;;  %v3573_v28 = vld [vmem:[#allocation2 + $0x1008] sm:$0xff] }
 0xd91   :  { %v3439_v21 = vpop.f32.mrf.mxu0  ;;  %v3408_v46 = vadd.f32 %v3407_v60, %v3379_v50  ;;  %v3585_v60 = vld [vmem:[#allocation2 + $0x1068] sm:$0xff] }
 0xd92   :  { %3637 = vmatpush.msrb.mxu2 %v3585_v60  ;;  %v3590_v60 = vld [vmem:[#allocation2 + $0x1090] sm:$0xff] }
 0xd93   :  { %v3410_v30 = vpop.f32.mrf.mxu2  ;;  %v3437_v49 = vadd.f32 %v3436_v33, %v3408_v46  ;;  %v3567_v46 = vld [vmem:[#allocation2 + $0xfd8] sm:$0xff] }
 0xd96   :  { %v3352_v27 = vpop.f32.mrf.mxu3 }
 0xd97   :  { %v3382_v19 = vadd.f32 %v3381_v37, %v3352_v27  ;;  %v3570_v37 = vld [vmem:[#allocation2 + $0xff0] sm:$0xff] }
 0xd98   :  { %v3384_v59 = vpop.f32.mrf.mxu1  ;;  %3607 = vmatpush.msrb.mxu1 %v3570_v37 }
 0xd99   :  { %v3442_v42 = vpop.f32.mrf.mxu0  ;;  %v3411_v31 = vadd.f32 %v3410_v30, %v3382_v19  ;;  %v3602_v30 = vld [vmem:[#allocation2 + $0x10f0] sm:$0xff]  ;;  %v3583_v19 = vld [vmem:[#allocation2 + $0x1058] sm:$0xff] }
 0xd9b   :  { %v3413_v45 = vpop.f32.mrf.mxu2  ;;  %v3440_v22 = vadd.f32 %v3439_v21, %v3411_v31  ;;  %v3582_v31 = vld [vmem:[#allocation2 + $0x1050] sm:$0xff] }
 0xd9e   :  { %v3355_v32 = vpop.f32.mrf.mxu3 }
 0xd9f   :  { %v3385_v41 = vadd.f32 %v3384_v59, %v3355_v32  ;;  %v3603_v32 = vld [vmem:[#allocation2 + $0x10f8] sm:$0xff] }
 0xda0   :  { %v3387_v43 = vpop.f32.mrf.mxu1  ;;  %3664 = vmatpush.msrb.mxu0 %v3603_v32  ;;  %v3558_v32 = vld [vmem:[#allocation2 + $0xf90] sm:$0xff] }
 0xda1   :  { %v3414_v39 = vadd.f32 %v3413_v45, %v3385_v41  ;;  %v3445_v61 = vpop.f32.mrf.mxu0  ;;  %v3569_v45 = vld [vmem:[#allocation2 + $0xfe8] sm:$0xff]  ;;  %v3568_v41 = vld [vmem:[#allocation2 + $0xfe0] sm:$0xff] }
 0xda2   :  { %3665 = vmatpush.msrb.mxu0 %v3602_v30  ;;  %3608 = vmatpush.msrb.mxu1 %v3569_v45 }
 0xda3   :  { %v3416_v53 = vpop.f32.mrf.mxu2  ;;  %v3443_v62 = vadd.f32 %v3442_v42, %v3414_v39  ;;  %v3600_v42 = vld [vmem:[#allocation2 + $0x10e0] sm:$0xff]  ;;  %v3599_v39 = vld [vmem:[#allocation2 + $0x10d8] sm:$0xff] }
 0xda4   :  { %3609 = vmatpush.msrb.mxu1 %v3568_v41 }
 0xda6   :  { %v3358_v17 = vpop.f32.mrf.mxu3  ;;  %3610 = vmatpush.msrb.mxu1 %v3567_v46 }
 0xda7   :  { %v3388_v36 = vadd.f32 %v3387_v43, %v3358_v17 }
 0xda9   :  { %v3417_v44 = vadd.f32 %v3416_v53, %v3388_v36  ;;  %v3581_v36 = vld [vmem:[#allocation2 + $0x1048] sm:$0xff]  ;;  %v3598_v53 = vld [vmem:[#allocation2 + $0x10d0] sm:$0xff] }
 0xdab   :  { %v3446_v5 = vadd.f32 %v3445_v61, %v3417_v44  ;;  %v3580_v44 = vld [vmem:[#allocation2 + $0x1040] sm:$0xff] }
 0xdac   :  { %v3564_v61 = vld [vmem:[#allocation2 + $0xfc0] sm:$0xff] }
 0xdae   :  { %v3465_v34 = vpop.f32.mrf.mxu3 }
 0xdaf   :  { %v3466_v29 = vadd.f32 %v3465_v34, %v3437_v49  ;;  %v3584_v34 = vld [vmem:[#allocation2 + $0x1060] sm:$0xff] }
 0xdb0   :  { %3638 = vmatpush.msrb.mxu2 %v3584_v34 }
 0xdb2   :  { %3639 = vmatpush.msrb.mxu2 %v3583_v19 }
 0xdb4   :  { %3640 = vmatpush.msrb.mxu2 %v3582_v31 }
 0xdb6   :  { %v3468_v47 = vpop.f32.mrf.mxu3  ;;  %3641 = vmatpush.msrb.mxu2 %v3581_v36 }
 0xdb7   :  { %v3469_v11 = vadd.f32 %v3468_v47, %v3440_v22  ;;  %v3601_v47 = vld [vmem:[#allocation2 + $0x10e8] sm:$0xff]  ;;  %v3566_v22 = vld [vmem:[#allocation2 + $0xfd0] sm:$0xff] }
 0xdb8   :  { %3666 = vmatpush.msrb.mxu0 %v3601_v47  ;;  %3611 = vmatpush.msrb.mxu1 %v3566_v22  ;;  %v3516_v47 = vld [vmem:[#allocation2 + $0xf78] sm:$0x1] }
 0xdb9   :  { %v3477_v4 = vadd.f32 %v3469_v11, %v3466_v29  ;;  %3642 = vmatpush.msrb.mxu2 %v3580_v44 }
 0xdba   :  { %3667 = vmatpush.msrb.mxu0 %v3600_v42  ;;  %v4457_v42 = vld [vmem:[#allocation2 + $0xf80] ss:$0 sm:$0xff] }
 0xdbc   :  { %3668 = vmatpush.msrb.mxu0 %v3599_v39 }
 0xdbe   :  { %v3471_v51 = vpop.f32.mrf.mxu3  ;;  %3669 = vmatpush.msrb.mxu0 %v3598_v53 }
 0xdbf   :  { %v3472_v2 = vadd.f32 %v3471_v51, %v3443_v62  ;;  %v3597_v62 = vld [vmem:[#allocation2 + $0x10c8] sm:$0xff] }
 0xdc0   :  { %3670 = vmatpush.msrb.mxu0 %v3597_v62 }
 0xdc1   :  { %v3478_v7 = vadd.f32 %v3477_v4, %v3472_v2  ;;  %v3596_v4 = vld [vmem:[#allocation2 + $0x10c0] sm:$0xff] }
 0xdc2   :  { %3671 = vmatpush.msrb.mxu0 %v3596_v4 }
 0xdc6   :  { %v3474_v57 = vpop.f32.mrf.mxu3 }
 0xdc7   :  { %v3475_v3 = vadd.f32 %v3474_v57, %v3446_v5  ;;  %v3578_v5 = vld [vmem:[#allocation2 + $0x1030] sm:$0xff] }
 0xdc9   :  { %v3479_v56 = vadd.f32 %v3478_v7, %v3475_v3  ;;  %v3563_v7 = vld [vmem:[#allocation2 + $0xfb8] sm:$0xff] }
 0xdcb   :  { %v3480_v58 = vrot.slane %v3479_v56, 4 }
 0xdcd   :  { %v3481_v38 = vadd.f32 %v3480_v58, %v3479_v56  ;;  %v3577_v56 = vld [vmem:[#allocation2 + $0x1028] sm:$0xff] }
 0xdcf   :  { %v3482_v63 = vrot.slane %v3481_v38, 2 }
 0xdd1   :  { %v3483_v10 = vadd.f32 %v3482_v63, %v3481_v38  ;;  %v3562_v38 = vld [vmem:[#allocation2 + $0xfb0] sm:$0xff] }
 0xdd2   :  { %v3594_v63 = vld [vmem:[#allocation2 + $0x10b0] sm:$0xff] }
 0xdd3   :  { %v3484_v15 = vrot.slane %v3483_v10, 1 }
 0xdd5   :  { %v3485_v16 = vadd.f32 %v3484_v15, %v3483_v10  ;;  %v3576_v10 = vld [vmem:[#allocation2 + $0x1020] sm:$0xff] }
 0xdd7   :  { %v3486_v1 = vmul.f32 0.03125, %v3485_v16  ;;  %v3561_v16 = vld [vmem:[#allocation2 + $0xfa8] sm:$0xff] }
 0xdd9   :  { %v5690_v0 = vsub.f32 %v3466_v29, %v3486_v1  ;;  %v5692_v24 = vsub.f32 %v3469_v11, %v3486_v1  ;;  %v5694_v8 = vsub.f32 %v3472_v2, %v3486_v1  ;;  %v5696_v14 = vsub.f32 %v3475_v3, %v3486_v1  ;;  %v3565_v11 = vld [vmem:[#allocation2 + $0xfc8] sm:$0xff]  ;;  %v3579_v29 = vld [vmem:[#allocation2 + $0x1038] sm:$0xff] }
 0xdda   :  { %3612 = vmatpush.msrb.mxu1 %v3565_v11  ;;  %3643 = vmatpush.msrb.mxu2 %v3579_v29  ;;  %v3595_v3 = vld [vmem:[#allocation2 + $0x10b8] sm:$0xff] }
 0xddb   :  { %v3491_v25 = vmul.f32 %v5690_v0, %v5690_v0  ;;  %v3492_v27 = vmul.f32 %v5692_v24, %v5692_v24  ;;  %v3493_v33 = vmul.f32 %v5694_v8, %v5694_v8  ;;  %v3494_v21 = vmul.f32 %v5696_v14, %v5696_v14  ;;  %3672 = vmatpush.msrb.mxu0 %v3595_v3  ;;  %v3575_v1 = vld [vmem:[#allocation2 + $0x1018] sm:$0xff] }
 0xddc   :  { %3613 = vmatpush.msrb.mxu1 %v3564_v61  ;;  %3644 = vmatpush.msrb.mxu2 %v3578_v5 }
 0xddd   :  { %v3495_v17 = vadd.f32 %v3492_v27, %v3491_v25  ;;  %3673 = vmatpush.msrb.mxu0 %v3594_v63  ;;  %v3559_v25 = vld [vmem:[#allocation2 + $0xf98] sm:$0xff] }
 0xdde   :  { %3614 = vmatpush.msrb.mxu1 %v3563_v7  ;;  %3645 = vmatpush.msrb.mxu2 %v3577_v56  ;;  %v3591_v27 = vld [vmem:[#allocation2 + $0x1098] sm:$0xff] }
 0xddf   :  { %v3496_v59 = vadd.f32 %v3495_v17, %v3493_v33  ;;  %3674 = vmatpush.msrb.mxu0 %v3593_v13  ;;  %v3557_v33 = vld [vmem:[#allocation2 + $0xf88] sm:$0xff] }
 0xde0   :  { %3615 = vmatpush.msrb.mxu1 %v3562_v38  ;;  %3646 = vmatpush.msrb.mxu2 %v3576_v10  ;;  %v3589_v17 = vld [vmem:[#allocation2 + $0x1088] sm:$0xff] }
 0xde1   :  { %v3497_v50 = vadd.f32 %v3496_v59, %v3494_v21  ;;  %3675 = vmatpush.msrb.mxu0 %v3592_v52 }
 0xde2   :  { %3616 = vmatpush.msrb.mxu1 %v3561_v16  ;;  %3647 = vmatpush.msrb.mxu2 %v3575_v1 }
 0xde3   :  { %v3498_v43 = vrot.slane %v3497_v50, 4  ;;  %3676 = vmatpush.msrb.mxu0 %v3591_v27 }
 0xde4   :  { %3617 = vmatpush.msrb.mxu1 %v3560_v18  ;;  %3648 = vmatpush.msrb.mxu2 %v3574_v12 }
 0xde5   :  { %v3499_v51 = vadd.f32 %v3498_v43, %v3497_v50  ;;  %3677 = vmatpush.msrb.mxu0 %v3590_v60 }
 0xde6   :  { %3618 = vmatpush.msrb.mxu1 %v3559_v25  ;;  %3649 = vmatpush.msrb.mxu2 %v3573_v28 }
 0xde7   :  { %v3500_v49 = vrot.slane %v3499_v51, 2  ;;  %3678 = vmatpush.msrb.mxu0 %v3589_v17 }
 0xde8   :  { %3619 = vmatpush.msrb.mxu1 %v3558_v32 }
 0xde9   :  { %v3501_v2 = vadd.f32 %v3500_v49, %v3499_v51 }
 0xdea   :  { %3620 = vmatpush.msrb.mxu1 %v3557_v33 }
 0xdeb   :  { %v3502_v57 = vrot.slane %v3501_v2, 1 }
 0xded   :  { %v3503_v58 = vadd.f32 %v3502_v57, %v3501_v2 }
 0xdef   :  { %v3504_v15 = vmul.f32 0.03125, %v3503_v58 }
 0xdf1   :  { %v3505_v48 = vadd.f32 1e-05, %v3504_v15 }
 0xdf3   :  { %4478 = vrsqrt.f32 %v3505_v48  ;;  %vm3512_vm4 = vweird.f32 %v3505_v48 }
 0xdf9   :  { %v4479_v37 = vpop.eup %4478 }
 0xdfa   :  { %v3507_v30 = vmul.f32 %v4479_v37, %v3505_v48  ;;  %vm3513_vm14 = vweird.f32 %v4479_v37 }
 0xdfb   :  { %vm3514_vm11 = vmor %vm3512_vm4, %vm3513_vm14 }
 0xdfc   :  { %v3508_v34 = vmul.f32 %v4479_v37, %v3507_v30 }
 0xdfe   :  { %v3509_v21 = vmul.f32 0.5, %v3508_v34 }
 0xe00   :  { %v3510_v59 = vsub.f32 1.5, %v3509_v21 }
 0xe02   :  { %v3511_v45 = vmul.f32 %v4479_v37, %v3510_v59 }
 0xe04   :  { %v3515_v19 = vsel %vm3514_vm11, %v4479_v37, %v3511_v45 }
 0xe05   :  { %v3517_v50 = vmul.f32 %v3516_v47, %v3515_v19  ;;  %v3760_v19 = vld [vmem:[#allocation2 + $0x1190] sm:$0xff] }
 0xe06   :  { %3761 = vmatpush.msra.mxu3 %v3760_v19 }
 0xe07   :  { %v3518_v41 = vperm.slane %v3517_v50, 0 }
 0xe09   :  { %v3520_v31 = vmul.f32 %v3518_v41, %v5692_v24  ;;  %v3521_v43 = vmul.f32 %v3518_v41, %v5694_v8  ;;  %v3522_v46 = vmul.f32 %v3518_v41, %v5696_v14  ;;  %v3519_v39 = vmul.f32 %v3518_v41, %v5690_v0  ;;  %v3759_v41 = vld [vmem:[#allocation2 + $0x1188] sm:$0xff] }
 0xe0a   :  { %3762 = vmatpush.msra.mxu3 %v3759_v41 }
 0xe0b   :  { %v3528_v36 = vadd.f32 %v4457_v42, %v3522_v46  ;;  %v3525_v51 = vadd.f32 %v4457_v42, %v3519_v39  ;;  %v3526_v22 = vadd.f32 %v4457_v42, %v3520_v31  ;;  %v3527_v11 = vadd.f32 %v4457_v42, %v3521_v43  ;;  %v3758_v31 = vld [vmem:[#allocation2 + $0x1180] sm:$0xff] }
 0xe0c   :  { %3763 = vmatpush.msra.mxu3 %v3758_v31 }
 0xe0d   :  { %v3532_v53 = vmax.f32 %v3528_v36, 0.0  ;;  %v3529_v44 = vmax.f32 %v3525_v51, 0.0  ;;  %v3530_v49 = vmax.f32 %v3526_v22, 0.0  ;;  %v3531_v14 = vmax.f32 %v3527_v11, 0.0  ;;  %v3757_v36 = vld [vmem:[#allocation2 + $0x1178] sm:$0xff] }
 0xe0e   :  { %3764 = vmatpush.msra.mxu3 %v3757_v36 }
 0xe0f   :  { %v3536_v62 = vrot.slane %v3532_v53, 7  ;;  %3650 = vmatmul.f32.vlgmr.msrb.gmra.mxu2 %v3529_v44  ;;  %v3533_v29 = vrot.slane %v3529_v44, 7  ;;  %v3545_v2 = vrot.slane %v3529_v44, 1  ;;  %v3546_v61 = vrot.slane %v3530_v49, 1  ;;  %v3756_v44 = vld [vmem:[#allocation2 + $0x1170] sm:$0xff] }
 0xe10   :  { %v3534_v0 = vrot.slane %v3530_v49, 7  ;;  %v3547_v4 = vrot.slane %v3531_v14, 1  ;;  %v3535_v7 = vrot.slane %v3531_v14, 7  ;;  %v3548_v3 = vrot.slane %v3532_v53, 1  ;;  %3765 = vmatpush.msra.mxu3 %v3756_v44 }
 0xe11   :  { %v3540_v24 = vsel %vm139_vm3, %v3536_v62, %v3533_v29  ;;  %v3551_v8 = vsel %vm156_vm1, %v3545_v2, %v3546_v61 }
 0xe12   :  { %4344 = vmatmul.msk.f32.vlgmr.msrb.gmra.mxu1 %vm144_vm5, %v3540_v24  ;;  %3679 = vmatmul.f32.vlgmr.msrb.gmra.mxu0 %v3551_v8  ;;  %v3539_v5 = vsel %vm139_vm3, %v3533_v29, %v3534_v0  ;;  %v3550_v57 = vsel %vm156_vm1, %v3546_v61, %v3547_v4  ;;  %v3538_v9 = vsel %vm139_vm3, %v3534_v0, %v3535_v7  ;;  %v3754_v61 = vld [vmem:[#allocation2 + $0x1160] sm:$0xff]  ;;  %v3753_v8 = vld [vmem:[#allocation2 + $0x1158] sm:$0xff]  ;;  %v3752_v0 = vld [vmem:[#allocation2 + $0x1150] sm:$0xff] }
 0xe13   :  { %v3549_v56 = vsel %vm156_vm1, %v3547_v4, %v3548_v3  ;;  %v3537_v58 = vsel %vm139_vm3, %v3535_v7, %v3536_v62  ;;  %v3552_v26 = vsel %vm156_vm1, %v3548_v3, %v3545_v2  ;;  %v3755_v62 = vld [vmem:[#allocation2 + $0x1168] sm:$0xff]  ;;  %v3750_v7 = vld [vmem:[#allocation2 + $0x1140] sm:$0xff] }
 0xe14   :  { %3766 = vmatpush.msra.mxu3 %v3755_v62 }
 0xe16   :  { %3767 = vmatpush.msra.mxu3 %v3754_v61 }
 0xe17   :  { %3653 = vmatmul.f32.gmra.mxu2 %v3530_v49 }
 0xe18   :  { %3768 = vmatpush.msra.mxu3 %v3753_v8 }
 0xe1a   :  { %3624 = vmatmul.f32.gmra.mxu1 %v3539_v5  ;;  %4346 = vmatmul.msk.f32.gmra.mxu0 %vm162_vm8, %v3550_v57  ;;  %v3751_v5 = vld [vmem:[#allocation2 + $0x1148] sm:$0xff]  ;;  %vm4186_vm8 = vcmask 1041409  }
 0xe1b   :  { %3769 = vmatpush.msra.mxu3 %v3752_v0 }
 0xe1d   :  { %3770 = vmatpush.msra.mxu3 %v3751_v5 }
 0xe1f   :  { %3656 = vmatmul.f32.gmra.mxu2 %v3531_v14  ;;  %3771 = vmatpush.msra.mxu3 %v3750_v7 }
 0xe22   :  { %4345 = vmatmul.msk.f32.gmra.mxu1 %vm146_vm9, %v3538_v9  ;;  %3685 = vmatmul.f32.gmra.mxu0 %v3549_v56  ;;  %v3749_v9 = vld [vmem:[#allocation2 + $0x1138] sm:$0xff]  ;;  %v3748_v56 = vld [vmem:[#allocation2 + $0x1130] sm:$0xff]  ;;  %vm4209_vm9 = vcmask 17408  }
 0xe23   :  { %3772 = vmatpush.msra.mxu3 %v3749_v9 }
 0xe25   :  { %3773 = vmatpush.msra.mxu3 %v3748_v56 }
 0xe27   :  { %3659 = vmatmul.f32.gmra.mxu2 %v3532_v53 }
 0xe2a   :  { %3630 = vmatmul.f32.gmra.mxu1 %v3537_v58  ;;  %4347 = vmatmul.msk.f32.gmra.mxu0 %vm164_vm13, %v3552_v26  ;;  %v3747_v26 = vld [vmem:[#allocation2 + $0x1128] sm:$0xff] }
 0xe2b   :  { %3774 = vmatpush.msra.mxu3 %v3747_v26 }
 0xe8f   :  { %v3622_v38 = vpop.f32.mrf.mxu1  ;;  %v3680_v63 = vpop.f32.mrf.mxu0 }
 0xe92   :  { %v3651_v10 = vpop.f32.mrf.mxu2 }
 0xe93   :  { %v3652_v12 = vadd.f32 %v3651_v10, %v3622_v38 }
 0xe95   :  { %v3681_v27 = vadd.f32 %v3680_v63, %v3652_v12  ;;  %v3746_v63 = vld [vmem:[#allocation2 + $0x1120] sm:$0xff] }
 0xe96   :  { %3775 = vmatpush.msra.mxu3 %v3746_v63 }
 0xe97   :  { %v3625_v15 = vpop.f32.mrf.mxu1  ;;  %v3683_v16 = vpop.f32.mrf.mxu0 }
 0xe9a   :  { %v3654_v13 = vpop.f32.mrf.mxu2 }
 0xe9b   :  { %v3655_v52 = vadd.f32 %v3654_v13, %v3625_v15  ;;  %v3745_v15 = vld [vmem:[#allocation2 + $0x1118] sm:$0xff] }
 0xe9c   :  { %3776 = vmatpush.msra.mxu3 %v3745_v15 }
 0xe9d   :  { %v3684_v25 = vadd.f32 %v3683_v16, %v3655_v52 }
 0xe9f   :  { %v3628_v35 = vpop.f32.mrf.mxu1  ;;  %v3686_v1 = vpop.f32.mrf.mxu0  ;;  %v3692_v60 = vadd.f32 %v3684_v25, %v3681_v27 }
 0xea2   :  { %v3657_v18 = vpop.f32.mrf.mxu2 }
 0xea3   :  { %v3658_v48 = vadd.f32 %v3657_v18, %v3628_v35 }
 0xea5   :  { %v3687_v6 = vadd.f32 %v3686_v1, %v3658_v48  ;;  %v3731_v48 = vld [vmem:[#allocation2 + $0x1108] sm:$0x1] }
 0xea7   :  { %v3631_v28 = vpop.f32.mrf.mxu1  ;;  %v3689_v33 = vpop.f32.mrf.mxu0  ;;  %v3693_v17 = vadd.f32 %v3692_v60, %v3687_v6 }
 0xeaa   :  { %v3660_v32 = vpop.f32.mrf.mxu2 }
 0xeab   :  { %v3661_v54 = vadd.f32 %v3660_v32, %v3631_v28  ;;  %v4458_v28 = vld [vmem:[#allocation2 + $0x1110] ss:$0 sm:$0xff] }
 0xead   :  { %v3690_v37 = vadd.f32 %v3689_v33, %v3661_v54 }
 0xeaf   :  { %v3694_v30 = vadd.f32 %v3693_v17, %v3690_v37 }
 0xeb1   :  { %v3695_v34 = vrot.slane %v3694_v30, 4 }
 0xeb3   :  { %v3696_v21 = vadd.f32 %v3695_v34, %v3694_v30 }
 0xeb5   :  { %v3697_v59 = vrot.slane %v3696_v21, 2 }
 0xeb7   :  { %v3698_v45 = vadd.f32 %v3697_v59, %v3696_v21 }
 0xeb9   :  { %v3699_v47 = vrot.slane %v3698_v45, 1 }
 0xebb   :  { %v3700_v50 = vadd.f32 %v3699_v47, %v3698_v45 }
 0xebd   :  { %v3701_v42 = vmul.f32 0.03125, %v3700_v50 }
 0xebf   :  { %v5734_v43 = vsub.f32 %v3681_v27, %v3701_v42  ;;  %v3703_v46 = vsub.f32 %v3684_v25, %v3701_v42  ;;  %v3704_v39 = vsub.f32 %v3687_v6, %v3701_v42  ;;  %v3705_v51 = vsub.f32 %v3690_v37, %v3701_v42 }
 0xec1   :  { %v3706_v22 = vmul.f32 %v5734_v43, %v5734_v43  ;;  %v3707_v53 = vmul.f32 %v3703_v46, %v3703_v46  ;;  %v3708_v49 = vmul.f32 %v3704_v39, %v3704_v39  ;;  %v3709_v29 = vmul.f32 %v3705_v51, %v3705_v51 }
 0xec3   :  { %v3710_v11 = vadd.f32 %v3707_v53, %v3706_v22 }
 0xec5   :  { %v3711_v2 = vadd.f32 %v3710_v11, %v3708_v49 }
 0xec7   :  { %v3712_v24 = vadd.f32 %v3711_v2, %v3709_v29 }
 0xec9   :  { %v3713_v14 = vrot.slane %v3712_v24, 4 }
 0xecb   :  { %v3714_v4 = vadd.f32 %v3713_v14, %v3712_v24 }
 0xecd   :  { %v3715_v57 = vrot.slane %v3714_v4, 2 }
 0xecf   :  { %v3716_v3 = vadd.f32 %v3715_v57, %v3714_v4 }
 0xed1   :  { %v3717_v58 = vrot.slane %v3716_v3, 1 }
 0xed3   :  { %v3718_v38 = vadd.f32 %v3717_v58, %v3716_v3 }
 0xed5   :  { %v3719_v10 = vmul.f32 0.03125, %v3718_v38 }
 0xed7   :  { %v3720_v16 = vadd.f32 1e-05, %v3719_v10 }
 0xed9   :  { %4480 = vrsqrt.f32 %v3720_v16  ;;  %vm3727_vm3 = vweird.f32 %v3720_v16 }
 0xedf   :  { %v4481_v13 = vpop.eup %4480 }
 0xee0   :  { %v3722_v35 = vmul.f32 %v4481_v13, %v3720_v16  ;;  %vm3728_vm1 = vweird.f32 %v4481_v13 }
 0xee1   :  { %vm3729_vm5 = vmor %vm3727_vm3, %vm3728_vm1 }
 0xee2   :  { %v3723_v1 = vmul.f32 %v4481_v13, %v3722_v35 }
 0xee4   :  { %v3724_v18 = vmul.f32 0.5, %v3723_v1 }
 0xee6   :  { %v3725_v52 = vsub.f32 1.5, %v3724_v18 }
 0xee8   :  { %v3726_v12 = vmul.f32 %v4481_v13, %v3725_v52 }
 0xeea   :  { %v3730_v25 = vsel %vm3729_vm5, %v4481_v13, %v3726_v12 }
 0xeeb   :  { %v3732_v27 = vmul.f32 %v3731_v48, %v3730_v25 }
 0xeed   :  { %v3733_v6 = vperm.slane %v3732_v27, 0 }
 0xeef   :  { %v3737_v32 = vmul.f32 %v3733_v6, %v3705_v51  ;;  %v3736_v60 = vmul.f32 %v3733_v6, %v3704_v39  ;;  %v3735_v54 = vmul.f32 %v3733_v6, %v3703_v46  ;;  %v3734_v33 = vmul.f32 %v3733_v6, %v5734_v43 }
 0xef1   :  { %v5739_v17 = vadd.f32 %v4458_v28, %v3737_v32  ;;  %v5741_v37 = vadd.f32 %v4458_v28, %v3736_v60  ;;  %v5743_v30 = vadd.f32 %v4458_v28, %v3735_v54  ;;  %v5745_v34 = vadd.f32 %v4458_v28, %v3734_v33 }
 0xef3   :  { %4029 = vmatpush.msra.mxu2 %v5739_v17  ;;  %3935 = vxpose.xlu1.b32.start [1/2] (short) %v5741_v37, 128 }
 0xef4   :  { %3884 = vmatpush.msra.mxu1 %v5743_v30  ;;  %3790 = vxpose.xlu2.b32.start [1/2] (short) %v5745_v34, 128 }
 0xef5   :  { %3777 = vmatmul.f32.vlgmr.msra.gmra.mxu3 %v5745_v34  ;;  %4030 = vmatpush.msra.mxu2 %v5741_v37 }
 0xef6   :  { %3885 = vmatpush.msra.mxu1 %v5745_v34 }
 0xefb   :  { %3936 = vxpose.xlu1.b32.end [2/2] (short) %v5739_v17, 128 }
 0xefc   :  { %3791 = vxpose.xlu2.b32.end [2/2] (short) %v5743_v30, 128 }
 0xefd   :  { %3780 = vmatmul.f32.gmra.mxu3 %v5743_v30 }
 0xf05   :  { %3783 = vmatmul.f32.gmra.mxu3 %v5741_v37 }
 0xf0d   :  { %3786 = vmatmul.f32.gmra.mxu3 %v5739_v17 }
 0xf8d   :  { %v3806_v21 = vpop.trf.xlu2 }
 0xf8e   :  { %4349 = vmatmul.msk.f32.vlgmr.msra.gmra.mxu1 %vm314_vm7, %v3806_v21 }
 0xf95   :  { %v3807_v59 = vpop.trf.xlu2 }
 0xf96   :  { %4350 = vmatmul.msk.f32.gmra.mxu1 %vm314_vm7, %v3807_v59 }
 0xf97   :  { %v3951_v45 = vpop.trf.xlu1 }
 0xf98   :  { %4365 = vmatmul.msk.f32.vlgmr.msra.gmra.mxu2 %vm314_vm7, %v3951_v45 }
 0xf9d   :  { %v3808_v47 = vpop.trf.xlu2 }
 0xf9e   :  { %4351 = vmatmul.msk.f32.gmra.mxu1 %vm314_vm7, %v3808_v47 }
 0xf9f   :  { %v3952_v19 = vpop.trf.xlu1 }
 0xfa0   :  { %4366 = vmatmul.msk.f32.gmra.mxu2 %vm314_vm7, %v3952_v19 }
 0xfa5   :  { %v3809_v50 = vpop.trf.xlu2 }
 0xfa6   :  { %4352 = vmatmul.msk.f32.gmra.mxu1 %vm314_vm7, %v3809_v50 }
 0xfa7   :  { %v3953_v41 = vpop.trf.xlu1 }
 0xfa8   :  { %4367 = vmatmul.msk.f32.gmra.mxu2 %vm314_vm7, %v3953_v41 }
 0xfad   :  { %v3810_v42 = vpop.trf.xlu2 }
 0xfae   :  { %4353 = vmatmul.msk.f32.gmra.mxu1 %vm314_vm7, %v3810_v42 }
 0xfaf   :  { %v3954_v31 = vpop.trf.xlu1 }
 0xfb0   :  { %4368 = vmatmul.msk.f32.gmra.mxu2 %vm314_vm7, %v3954_v31  ;;  %v3778_v31 = vpop.f32.mrf.mxu3 }
 0xfb5   :  { %v3811_v43 = vpop.trf.xlu2 }
 0xfb6   :  { %4354 = vmatmul.msk.f32.gmra.mxu1 %vm314_vm7, %v3811_v43 }
 0xfb7   :  { %v3955_v46 = vpop.trf.xlu1 }
 0xfb8   :  { %4369 = vmatmul.msk.f32.gmra.mxu2 %vm314_vm7, %v3955_v46  ;;  %v3781_v43 = vpop.f32.mrf.mxu3 }
 0xfbd   :  { %v3812_v39 = vpop.trf.xlu2 }
 0xfbe   :  { %4355 = vmatmul.msk.f32.gmra.mxu1 %vm314_vm7, %v3812_v39 }
 0xfbf   :  { %v3956_v36 = vpop.trf.xlu1 }
 0xfc0   :  { %4370 = vmatmul.msk.f32.gmra.mxu2 %vm314_vm7, %v3956_v36  ;;  %v3784_v46 = vpop.f32.mrf.mxu3  ;;  %v4181_v36 = vld [vmem:[#allocation2 + $0x1210] sm:$0xff] }
 0xfc1   :  { %4189 = vmatpush.msrb.mxu1 %v4181_v36 }
 0xfc5   :  { %v3813_v51 = vpop.trf.xlu2 }
 0xfc6   :  { %4356 = vmatmul.msk.f32.gmra.mxu1 %vm314_vm7, %v3813_v51  ;;  %v4180_v51 = vld [vmem:[#allocation2 + $0x1208] sm:$0xff] }
 0xfc7   :  { %v3957_v22 = vpop.trf.xlu1  ;;  %4190 = vmatpush.msrb.mxu1 %v4180_v51 }
 0xfc8   :  { %4371 = vmatmul.msk.f32.gmra.mxu2 %vm314_vm7, %v3957_v22  ;;  %v3787_v39 = vpop.f32.mrf.mxu3  ;;  %v4179_v22 = vld [vmem:[#allocation2 + $0x1200] sm:$0xff] }
 0xfc9   :  { %4191 = vmatpush.msrb.mxu1 %v4179_v22 }
 0xfcd   :  { %v3814_v53 = vpop.trf.xlu2 }
 0xfce   :  { %4357 = vmatmul.msk.f32.gmra.mxu1 %vm314_vm7, %v3814_v53  ;;  %v4178_v53 = vld [vmem:[#allocation2 + $0x11f8] sm:$0xff] }
 0xfcf   :  { %v3958_v44 = vpop.trf.xlu1  ;;  %4192 = vmatpush.msrb.mxu1 %v4178_v53 }
 0xfd0   :  { %4372 = vmatmul.msk.f32.gmra.mxu2 %vm314_vm7, %v3958_v44  ;;  %v4177_v44 = vld [vmem:[#allocation2 + $0x11f0] sm:$0xff] }
 0xfd1   :  { %4193 = vmatpush.msrb.mxu1 %v4177_v44 }
 0xfd5   :  { %v3815_v49 = vpop.trf.xlu2 }
 0xfd6   :  { %4358 = vmatmul.msk.f32.gmra.mxu1 %vm314_vm7, %v3815_v49 }
 0xfd7   :  { %v3959_v11 = vpop.trf.xlu1 }
 0xfd8   :  { %4373 = vmatmul.msk.f32.gmra.mxu2 %vm314_vm7, %v3959_v11  ;;  %v4126_v11 = vstv %s4348_s17 }
 0xfdd   :  { %v3816_v62 = vpop.trf.xlu2 }
 0xfde   :  { %4359 = vmatmul.msk.f32.gmra.mxu1 %vm314_vm7, %v3816_v62  ;;  %v4176_v62 = vld [vmem:[#allocation2 + $0x11e8] sm:$0xff] }
 0xfdf   :  { %v3960_v29 = vpop.trf.xlu1  ;;  %4194 = vmatpush.msrb.mxu1 %v4176_v62 }
 0xfe0   :  { %4374 = vmatmul.msk.f32.gmra.mxu2 %vm314_vm7, %v3960_v29  ;;  %v4175_v29 = vld [vmem:[#allocation2 + $0x11e0] sm:$0xff] }
 0xfe1   :  { %4195 = vmatpush.msrb.mxu1 %v4175_v29 }
 0xfe5   :  { %v3817_v2 = vpop.trf.xlu2 }
 0xfe6   :  { %4360 = vmatmul.msk.f32.gmra.mxu1 %vm314_vm7, %v3817_v2 }
 0xfe7   :  { %v3961_v61 = vpop.trf.xlu1 }
 0xfe8   :  { %4375 = vmatmul.msk.f32.gmra.mxu2 %vm314_vm7, %v3961_v61  ;;  %v4174_v61 = vld [vmem:[#allocation2 + $0x11d8] sm:$0xff] }
 0xfe9   :  { %4196 = vmatpush.msrb.mxu1 %v4174_v61 }
 0xfed   :  { %v3818_v24 = vpop.trf.xlu2 }
 0xfee   :  { %4361 = vmatmul.msk.f32.gmra.mxu1 %vm314_vm7, %v3818_v24  ;;  %v4173_v24 = vld [vmem:[#allocation2 + $0x11d0] sm:$0xff] }
 0xfef   :  { %v3962_v8 = vpop.trf.xlu1  ;;  %4197 = vmatpush.msrb.mxu1 %v4173_v24 }
 0xff0   :  { %4376 = vmatmul.msk.f32.gmra.mxu2 %vm314_vm7, %v3962_v8 }
 0xff5   :  { %v3819_v14 = vpop.trf.xlu2 }
 0xff6   :  { %4362 = vmatmul.msk.f32.gmra.mxu1 %vm314_vm7, %v3819_v14 }
 0xff7   :  { %v3963_v0 = vpop.trf.xlu1 }
 0xff8   :  { %4377 = vmatmul.msk.f32.gmra.mxu2 %vm314_vm7, %v3963_v0 }
 0xffd   :  { %v3820_v4 = vpop.trf.xlu2 }
 0xffe   :  { %4363 = vmatmul.msk.f32.gmra.mxu1 %vm314_vm7, %v3820_v4  ;;  %v4172_v4 = vld [vmem:[#allocation2 + $0x11c8] sm:$0xff] }
 0xfff   :  { %v3964_v5 = vpop.trf.xlu1  ;;  %4198 = vmatpush.msrb.mxu1 %v4172_v4 }
0x1000   :  { %4378 = vmatmul.msk.f32.gmra.mxu2 %vm314_vm7, %v3964_v5  ;;  %v4171_v5 = vld [vmem:[#allocation2 + $0x11c0] sm:$0xff] }
0x1001   :  { %4199 = vmatpush.msrb.mxu1 %v4171_v5 }
0x1005   :  { %v3821_v57 = vpop.trf.xlu2 }
0x1006   :  { %4364 = vmatmul.msk.f32.gmra.mxu1 %vm314_vm7, %v3821_v57 }
0x1007   :  { %v3965_v7 = vpop.trf.xlu1 }
0x1008   :  { %4379 = vmatmul.msk.f32.gmra.mxu2 %vm314_vm7, %v3965_v7  ;;  %v4170_v7 = vld [vmem:[#allocation2 + $0x11b8] sm:$0xff] }
0x1009   :  { %4200 = vmatpush.msrb.mxu1 %v4170_v7 }
0x100b   :  { %v5790_v3 = vpop.f32.mrf.mxu1 }
0x100f   :  { %v3966_v9 = vpop.trf.xlu1 }
0x1010   :  { %4380 = vmatmul.msk.f32.gmra.mxu2 %vm314_vm7, %v3966_v9 }
0x1013   :  { %v3890_v56 = vpop.f32.mrf.mxu1 }
0x101b   :  { %v3893_v58 = vpop.f32.mrf.mxu1  ;;  %v5793_v26 = vpop.f32.mrf.mxu2 }
0x1023   :  { %v3896_v38 = vpop.f32.mrf.mxu1  ;;  %v5795_v63 = vpop.f32.mrf.mxu2 }
0x102b   :  { %v3899_v10 = vpop.f32.mrf.mxu1  ;;  %v5797_v15 = vpop.f32.mrf.mxu2 }
0x1033   :  { %v3902_v16 = vpop.f32.mrf.mxu1  ;;  %v5799_v13 = vpop.f32.mrf.mxu2 }
0x103b   :  { %v3905_v35 = vpop.f32.mrf.mxu1  ;;  %v5801_v1 = vpop.f32.mrf.mxu2 }
0x1043   :  { %v3908_v18 = vpop.f32.mrf.mxu1  ;;  %v4047_v52 = vpop.f32.mrf.mxu2 }
0x104b   :  { %v3911_v12 = vpop.f32.mrf.mxu1  ;;  %v4050_v48 = vpop.f32.mrf.mxu2 }
0x1053   :  { %v3914_v25 = vpop.f32.mrf.mxu1  ;;  %v4053_v27 = vpop.f32.mrf.mxu2 }
0x105b   :  { %v3917_v6 = vpop.f32.mrf.mxu1  ;;  %v4056_v28 = vpop.f32.mrf.mxu2 }
0x1063   :  { %v3920_v32 = vpop.f32.mrf.mxu1  ;;  %v4059_v60 = vpop.f32.mrf.mxu2 }
0x106b   :  { %v3923_v54 = vpop.f32.mrf.mxu1  ;;  %v4062_v33 = vpop.f32.mrf.mxu2 }
0x1073   :  { %v3926_v21 = vpop.f32.mrf.mxu1  ;;  %v4065_v59 = vpop.f32.mrf.mxu2 }
0x107b   :  { %v3929_v45 = vpop.f32.mrf.mxu1  ;;  %v4068_v47 = vpop.f32.mrf.mxu2 }
0x1083   :  { %v3932_v19 = vpop.f32.mrf.mxu1  ;;  %v4071_v50 = vpop.f32.mrf.mxu2 }
0x1084   :  { %4080 = vmatpush.msra.mxu0 %v3932_v19 }
0x1086   :  { %4081 = vmatpush.msra.mxu0 %v3929_v45 }
0x1088   :  { %4082 = vmatpush.msra.mxu0 %v3926_v21 }
0x108a   :  { %4083 = vmatpush.msra.mxu0 %v3923_v54 }
0x108b   :  { %v4074_v41 = vpop.f32.mrf.mxu2 }
0x108c   :  { %4084 = vmatpush.msra.mxu0 %v3920_v32 }
0x108e   :  { %4085 = vmatpush.msra.mxu0 %v3917_v6 }
0x1090   :  { %4086 = vmatpush.msra.mxu0 %v3914_v25 }
0x1092   :  { %4087 = vmatpush.msra.mxu0 %v3911_v12 }
0x1093   :  { %v4077_v42 = vpop.f32.mrf.mxu2 }
0x1094   :  { %4088 = vmatpush.msra.mxu0 %v3908_v18  ;;  %4103 = vmatpush.msrb.mxu2 %v4077_v42 }
0x1095   :  { %4389 = vmatpush.msrb.mxu3 %v4077_v42 }
0x1096   :  { %4089 = vmatpush.msra.mxu0 %v3905_v35  ;;  %4104 = vmatpush.msrb.mxu2 %v4074_v41 }
0x1097   :  { %4390 = vmatpush.msrb.mxu3 %v4074_v41 }
0x1098   :  { %4090 = vmatpush.msra.mxu0 %v3902_v16  ;;  %4105 = vmatpush.msrb.mxu2 %v4071_v50 }
0x1099   :  { %4391 = vmatpush.msrb.mxu3 %v4071_v50 }
0x109a   :  { %4091 = vmatpush.msra.mxu0 %v3899_v10  ;;  %4106 = vmatpush.msrb.mxu2 %v4068_v47  ;;  %v4564_v10 = vmov 16.0  }
0x109b   :  { %4392 = vmatpush.msrb.mxu3 %v4068_v47  ;;  %4482 = vrcp.f32 %v4564_v10 }
0x109c   :  { %4092 = vmatpush.msra.mxu0 %v3896_v38  ;;  %4107 = vmatpush.msrb.mxu2 %v4065_v59 }
0x109d   :  { %4393 = vmatpush.msrb.mxu3 %v4065_v59 }
0x109e   :  { %4093 = vmatpush.msra.mxu0 %v3893_v58  ;;  %4108 = vmatpush.msrb.mxu2 %v4062_v33 }
0x109f   :  { %4394 = vmatpush.msrb.mxu3 %v4062_v33 }
0x10a0   :  { %4094 = vmatpush.msra.mxu0 %v3890_v56  ;;  %4109 = vmatpush.msrb.mxu2 %v4059_v60  ;;  %v4169_v56 = vld [vmem:[#allocation2 + $0x11b0] sm:$0xff] }
0x10a1   :  { %4395 = vmatpush.msrb.mxu3 %v4059_v60  ;;  %4201 = vmatpush.msrb.mxu1 %v4169_v56  ;;  %v4483_v35 = vpop.eup %4482 }
0x10a2   :  { %4095 = vmatpush.msra.mxu0 %v5790_v3  ;;  %4110 = vmatpush.msrb.mxu2 %v4056_v28  ;;  %vm4162_vm7 = vweird.f32 %v4483_v35 }
0x10a3   :  { %4096 = vmatmul.f32.vlgmr.msra.gmra.mxu0 %v3778_v31  ;;  %4396 = vmatpush.msrb.mxu3 %v4056_v28 }
0x10a4   :  { %4111 = vmatpush.msrb.mxu2 %v4053_v27 }
0x10a5   :  { %4397 = vmatpush.msrb.mxu3 %v4053_v27 }
0x10a6   :  { %4112 = vmatpush.msrb.mxu2 %v4050_v48 }
0x10a7   :  { %4398 = vmatpush.msrb.mxu3 %v4050_v48  ;;  %v4158_v48 = vmul.f32 16.0, %v4483_v35 }
0x10a8   :  { %4113 = vmatpush.msrb.mxu2 %v4047_v52 }
0x10a9   :  { %4399 = vmatpush.msrb.mxu3 %v4047_v52  ;;  %v4159_v32 = vsub.f32 1.0, %v4158_v48 }
0x10aa   :  { %4114 = vmatpush.msrb.mxu2 %v5801_v1 }
0x10ab   :  { %4099 = vmatmul.f32.gmra.mxu0 %v3781_v43  ;;  %4400 = vmatpush.msrb.mxu3 %v5801_v1  ;;  %v4160_v21 = vmul.f32 %v4483_v35, %v4159_v32  ;;  %v4459_v43 = vld [vmem:[#allocation2 + $0x1218] ss:$0 sm:$0xff] }
0x10ac   :  { %4115 = vmatpush.msrb.mxu2 %v5799_v13 }
0x10ad   :  { %4401 = vmatpush.msrb.mxu3 %v5799_v13 }
0x10ae   :  { %4116 = vmatpush.msrb.mxu2 %v5797_v15 }
0x10af   :  { %4402 = vmatpush.msrb.mxu3 %v5797_v15  ;;  %v4166_v15 = vld [vmem:[#allocation2 + $0x1198] sm:$0xff] }
0x10b0   :  { %4117 = vmatpush.msrb.mxu2 %v5795_v63 }
0x10b1   :  { %4403 = vmatpush.msrb.mxu3 %v5795_v63 }
0x10b2   :  { %4118 = vmatpush.msrb.mxu2 %v5793_v26 }
0x10b3   :  { %4404 = vmatpush.msrb.mxu3 %v5793_v26  ;;  %4119 = vmatmul.f32.vlgmr.msrb.gmra.mxu2 %v3784_v46  ;;  %v4168_v26 = vld [vmem:[#allocation2 + $0x11a8] sm:$0xff] }
0x10b4   :  { %4122 = vmatmul.f32.vlgmr.msrb.gmra.mxu3 %v3787_v39  ;;  %4202 = vmatpush.msrb.mxu1 %v4168_v26 }
0x1120   :  { %v4097_v49 = vpop.f32.mrf.mxu0 }
0x1121   :  { %v4127_v2 = vmul.f32 %v4126_v11, %v4097_v49 }
0x1123   :  { %v4131_v8 = vadd.f32 %v4127_v2, %v5745_v34  ;;  %v4167_v34 = vld [vmem:[#allocation2 + $0x11a0] sm:$0xff] }
0x1124   :  { %4203 = vmatpush.msrb.mxu1 %v4167_v34 }
0x1125   :  { %v4135_v3 = vadd.f32 %v4131_v8, %v5471_v23 }
0x1126   :  { %4204 = vmatpush.msrb.mxu1 %v4166_v15 }
0x1127   :  { %v4139_v38 = vmax.f32 %v4135_v3, 0.0 }
0x1128   :  { %v4100_v14 = vpop.f32.mrf.mxu0 }
0x1129   :  { %v4128_v0 = vmul.f32 %v4126_v11, %v4100_v14 }
0x112b   :  { %v4132_v57 = vadd.f32 %v4128_v0, %v5743_v30 }
0x112d   :  { %v4136_v9 = vadd.f32 %v4132_v57, %v5473_v40 }
0x112f   :  { %v4140_v58 = vmax.f32 %v4136_v9, 0.0 }
0x1131   :  { %v4143_v63 = vadd.f32 %v4140_v58, %v4139_v38 }
0x1133   :  { %v4144_v30 = vrot.slane %v4143_v63, 4 }
0x1135   :  { %v4145_v18 = vadd.f32 %v4144_v30, %v4143_v63 }
0x1136   :  { %v4120_v16 = vpop.f32.mrf.mxu2 }
0x1137   :  { %v4129_v23 = vmul.f32 %v4126_v11, %v4120_v16  ;;  %v4123_v13 = vpop.f32.mrf.mxu3  ;;  %v4146_v6 = vrot.slane %v4145_v18, 2 }
0x1138   :  { %v4130_v40 = vmul.f32 %v4126_v11, %v4123_v13 }
0x1139   :  { %v4133_v1 = vadd.f32 %v4129_v23, %v5741_v37  ;;  %v4147_v54 = vadd.f32 %v4146_v6, %v4145_v18  ;;  %v4161_v37 = vadd.f32 %v4483_v35, %v4160_v21 }
0x113a   :  { %v4134_v52 = vadd.f32 %v4130_v40, %v5739_v17 }
0x113b   :  { %v4137_v12 = vadd.f32 %v4133_v1, %v5488_v20  ;;  %v4148_v45 = vrot.slane %v4147_v54, 1  ;;  %v4163_v20 = vsel %vm4162_vm7, %v4483_v35, %v4161_v37 }
0x113c   :  { %v4138_v25 = vadd.f32 %v4134_v52, %v5498_v55 }
0x113d   :  { %v4141_v27 = vmax.f32 %v4137_v12, 0.0  ;;  %v4149_v50 = vadd.f32 %v4148_v45, %v4147_v54 }
0x113e   :  { %v4142_v28 = vmax.f32 %v4138_v25, 0.0 }
0x113f   :  { %v4164_v55 = vmul.f32 %v4163_v20, %v4149_v50 }
0x1140   :  { %v4150_v60 = vadd.f32 %v4142_v28, %v4141_v27 }
0x1142   :  { %v4151_v33 = vrot.slane %v4150_v60, 4 }
0x1144   :  { %v4152_v59 = vadd.f32 %v4151_v33, %v4150_v60 }
0x1146   :  { %v4153_v47 = vrot.slane %v4152_v59, 2 }
0x1148   :  { %v4154_v19 = vadd.f32 %v4153_v47, %v4152_v59 }
0x114a   :  { %v4155_v17 = vrot.slane %v4154_v19, 1 }
0x114c   :  { %v4156_v41 = vadd.f32 %v4155_v17, %v4154_v19 }
0x114e   :  { %v4165_v42 = vmul.f32 %v4163_v20, %v4156_v41 }
0x1150   :  { %v4187_v31 = vsel %vm4186_vm8, %v4165_v42, %v4164_v55 }
0x1151   :  { %4205 = vmatmul.f32.vlgmr.msrb.gmra.mxu1 %v4187_v31 }
0x11ce   :  { %v4206_v46 = vpop.f32.mrf.mxu1 }
0x11cf   :  { %v4207_v39 = vadd.f32 %v4459_v43, %v4206_v46 }
0x11d1   :  { %4210 = vst.msk [vmem:[#allocation7] sm:$0x3] %vm4209_vm9, %v4207_v39 }
0x11d2   :  { %4221 = dma.vmem_to_hbm [thread:$0]  %s4217_s19, 32, %s4219_s22, [#allocation4]  }
0x11d3   :  { %4552 = dma.done.wait [#allocation4], 32  }
0x11d4   :  { %4553 = vsyncadd [#allocation4], 4294967264 }
0x11d5   :  { %4226 = vsyncpa [#allocation3], 1 }
0x11d6   :  { %4227 = vsyncpa [#allocation4], 1 }
0x11d7   :  { %4228 = vsyncpa [#allocation5], 1 }

</bundles_post_ra>
